<compile_context>
chip_gen: v5e
topology: v5e:2x2
jax: 0.10.0
libtpu: 0.0.40
codegen_flags: <defaults>
</compile_context>

<pallas_src>
import functools

import jax
import jax.numpy as jnp
from jax.experimental import pallas as pl
from jax.experimental.pallas import tpu as pltpu

K = 3              # depthwise kernel size of the residual branch (odd -> "same")
PW = 8             # sublane-aligned halo width along W (only 1 column is used)
_INV_SQRT2 = 0.7071067811865476


def _residual_kernel(x_ref, w_ref, scale_ref, shift_ref, o_ref, xpad_ref, *,
                     approximate_gelu):
    # Block shapes (Cb = channel block, channels on the 128-lane axis):
    #   x_ref     : (1, H, W, Cb)        input tile (single HBM read per element)
    #   w_ref     : (K*K, Cb)            per-channel depthwise taps (lane vectors)
    #   scale_ref : (1, Cb)              folded BN scale
    #   shift_ref : (1, Cb)              folded BN shift
    #   o_ref     : (1, H, W, Cb)
    #   xpad_ref  : (H+2, W+2*PW, Cb)    scratch, input dtype, aligned halo
    H, W = o_ref.shape[1], o_ref.shape[2]
    cb = o_ref.shape[3]
    wp = W + 2 * PW
    dt = xpad_ref.dtype

    # --- Halo-only zeroing (every step: the scratch is per-core; gating on
    # program_id==0 would leave the second core's scratch uninitialized). ---
    zrow = jnp.zeros((1, wp, cb), dt)
    xpad_ref[0:1, :, :] = zrow
    xpad_ref[H + 1:H + 2, :, :] = zrow
    zcol = jnp.zeros((H, PW, cb), dt)
    xpad_ref[1:H + 1, 0:PW, :] = zcol
    xpad_ref[1:H + 1, PW + W:wp, :] = zcol

    # --- Interior copy: row offset is on the leading dim, column offset PW=8
    # is on the sublane axis -> fully aligned stores, input dtype. ---
    xpad_ref[1:H + 1, PW:PW + W, :] = x_ref[0]

    # --- Depthwise "same" 3x3 conv: 9 statically unrolled shifted MACs (VPU).
    # Taps read / cast / shaped once outside the loop; products in the input
    # dtype (bf16-packed VALU on v6e/v7x), accumulation in f32. ---
    w_all = w_ref[...].astype(dt)                             # (K*K, Cb)
    taps = [w_all[t, :].reshape(1, 1, cb) for t in range(K * K)]

    acc = jnp.zeros((H, W, cb), jnp.float32)
    for di in range(K):
        for dj in range(K):
            src = xpad_ref[di:di + H, PW - 1 + dj:PW - 1 + dj + W, :]
            acc = acc + (src * taps[di * K + dj]).astype(jnp.float32)

    # --- GELU.  Exact erf form matches torch.nn.GELU() default; the tanh
    # approximation runs on the EUP slot (cheaper when VALU-bound). ---
    if approximate_gelu:
        g = jax.nn.gelu(acc, approximate=True)
    else:
        g = 0.5 * acc * (1.0 + jax.lax.erf(acc * jnp.float32(_INV_SQRT2)))

    # --- BatchNorm2d (eval) folded to per-channel scale/shift lane vectors. ---
    bn = g * scale_ref[0, :] + shift_ref[0, :]

    # --- Residual: fn(x) + x.  Re-read the resident input tile instead of
    # keeping a full-tile f32 copy live across the kernel. ---
    o_ref[0] = (bn + x_ref[0].astype(jnp.float32)).astype(o_ref.dtype)


def _vmem_capacity_bytes():
    try:
        return int(pltpu.get_tpu_info().vmem_capacity_bytes)
    except Exception:
        return 64 << 20                       # conservative (v7x per-core VMEM)


def _footprint_bytes(H, W, cb, itemsize):
    """Approximate per-core VMEM residency for one channel block."""
    tile = H * W * cb * itemsize
    scratch = (H + 2) * (W + 2 * PW) * cb * itemsize
    f32_temps = 3 * H * W * cb * 4            # acc / GELU / BN live f32 values
    params = 2 * (K * K + 2) * cb * 4
    # 2x double-buffered input + 2x double-buffered output + scratch + temps.
    return 2 * tile + 2 * tile + scratch + f32_temps + params


def _plan_blocks(N, H, W, C, itemsize):
    """Pick the channel block cb and an explicit scoped-VMEM limit."""
    cap = _vmem_capacity_bytes()
    if cap >= (96 << 20):                     # 128 MiB parts (v5e / v6e): go big,
        budget = 72 << 20                     # prefer cb == C (contiguous DMA).
    else:                                     # 64 MiB parts (v7x): ~24-28 MiB.
        budget = min(int(cap * 0.42), 28 << 20)

    def fits(blk):
        return _footprint_bytes(H, W, blk, itemsize) <= budget

    if C % 128 == 0:
        cands = sorted((d for d in range(128, C + 1, 128) if C % d == 0),
                       reverse=True)
        cb = next((d for d in cands if fits(d)), cands[-1])
    else:
        # Odd channel count: keep full C.  Non-lane-dense last dim => masked
        # partial stores (perf hazard only, not a correctness issue).
        cb = C

    # Guarantee >=2 grid programs so both v7x TensorCores get work (one extra
    # grid step is noise on the single-core v5e/v6e parts).
    if N * (C // cb) < 2 and cb % 256 == 0:
        cb //= 2

    footprint = _footprint_bytes(H, W, cb, itemsize)
    vmem_limit = int(min(max(footprint + footprint // 2, 32 << 20),
                         int(cap * 0.85)))
    return cb, vmem_limit


def residual_forward_nhwc(x, w, scale, shift, *, approximate_gelu=False):
    """x: (N, H, W, C); w: (C, K, K); scale/shift: (C,).  Returns fn(x)+x (NHWC)."""
    N, H, W, C = x.shape
    cb, vmem_limit = _plan_blocks(N, H, W, C, x.dtype.itemsize)

    # Per-channel params as lane vectors: (K*K, C) and (1, C).
    w_l = jnp.transpose(w, (1, 2, 0)).reshape(K * K, C)
    scale_l = scale.reshape(1, C).astype(jnp.float32)
    shift_l = shift.reshape(1, C).astype(jnp.float32)

    kernel = functools.partial(_residual_kernel,
                               approximate_gelu=approximate_gelu)

    return pl.pallas_call(
        kernel,
        out_shape=jax.ShapeDtypeStruct((N, H, W, C), x.dtype),
        grid_spec=pltpu.PrefetchScalarGridSpec(
            num_scalar_prefetch=0,
            grid=(N, C // cb),
            in_specs=[
                pl.BlockSpec((1, H, W, cb), lambda n, c: (n, 0, 0, c)),
                pl.BlockSpec((K * K, cb), lambda n, c: (0, c)),
                pl.BlockSpec((1, cb), lambda n, c: (0, c)),
                pl.BlockSpec((1, cb), lambda n, c: (0, c)),
            ],
            out_specs=pl.BlockSpec((1, H, W, cb), lambda n, c: (n, 0, 0, c)),
            # Default double-buffering; deeper pipelining only burns VMEM.
            scratch_shapes=[pltpu.VMEM((H + 2, W + 2 * PW, cb), x.dtype)],
        ),
        compiler_params=pltpu.CompilerParams(
            dimension_semantics=("parallel", "parallel"),
            vmem_limit_bytes=vmem_limit),
    )(x, w_l, scale_l, shift_l)


def residual_forward(x_nchw, w, scale, shift, *, approximate_gelu=False):
    """PyTorch-layout entry point (x: N, C, H, W).  Transposes to NHWC for the
    lane-dense kernel; in a full ConvMixer keep NHWC end-to-end and call
    residual_forward_nhwc directly (no transpose traffic)."""
    x_nhwc = jnp.transpose(x_nchw, (0, 2, 3, 1))
    out = residual_forward_nhwc(x_nhwc, w, scale, shift,
                                approximate_gelu=approximate_gelu)
    return jnp.transpose(out, (0, 3, 1, 2))


def residual_reference(x, w, scale, shift):
    """Pure-JAX NCHW reference of fn(x) + x for correctness checking."""
    N, C, H, W = x.shape
    conv = jax.lax.conv_general_dilated(
        x, w.reshape(C, 1, K, K), window_strides=(1, 1), padding="SAME",
        dimension_numbers=("NCHW", "OIHW", "NCHW"), feature_group_count=C)
    g = 0.5 * conv * (1.0 + jax.lax.erf(conv / jnp.sqrt(jnp.float32(2.0))))
    bn = g * scale[None, :, None, None] + shift[None, :, None, None]
    return bn + x


if __name__ == "__main__":
    # Small shapes consistent with the module usage: batch=2, channels=4, 16x16.
    N, C, H, W = 2, 4, 16, 16
    key = jax.random.PRNGKey(0)
    kx, kw = jax.random.split(key)

    x = jax.random.normal(kx, (N, C, H, W), jnp.float32)

    # Deterministic parameter init (shapes per ConvMixer residual branch).
    bound = 1.0 / (K * K) ** 0.5
    w = jax.random.uniform(kw, (C, K, K), jnp.float32, -bound, bound)
    # BatchNorm2d defaults: gamma=1, beta=0, running_mean=0, running_var=1.
    gamma = jnp.ones((C,), jnp.float32)
    beta = jnp.zeros((C,), jnp.float32)
    running_mean = jnp.zeros((C,), jnp.float32)
    running_var = jnp.ones((C,), jnp.float32)
    eps = 1e-5
    scale = gamma / jnp.sqrt(running_var + eps)
    shift = beta - running_mean * scale

    out = residual_forward(x, w, scale, shift)
    out = jax.block_until_ready(out)

    ref = residual_reference(x, w, scale, shift)
    assert out.shape == (N, C, H, W)
    assert jnp.allclose(out, ref, atol=1e-5, rtol=1e-5), "mismatch vs reference"

    print("KERNEL_OK")
</pallas_src>

<mosaic_0001>
module attributes {stable_mosaic.version = 11 : i64} {
  func.func @_residual_kernel(%arg0: i32, %arg1: i32, %arg2: memref<1x16x16x4xf32, #tpu.memory_space<vmem>>, %arg3: memref<9x4xf32, #tpu.memory_space<vmem>>, %arg4: memref<1x4xf32, #tpu.memory_space<vmem>>, %arg5: memref<1x4xf32, #tpu.memory_space<vmem>>, %arg6: memref<1x16x16x4xf32, #tpu.memory_space<vmem>>, %arg7: memref<18x32x4xf32, #tpu.memory_space<vmem>>) attributes {dimension_semantics = [#tpu.dimension_semantics<parallel>, #tpu.dimension_semantics<parallel>], iteration_bounds = array<i64: 2, 1>, scalar_prefetch = 0 : i64, scratch_operands = 1 : i64, tpu.core_type = #tpu.core_type<tc>, window_params = [{transform_indices = @transform_0, window_bounds = array<i64: 1, 16, 16, 4>}, {transform_indices = @transform_1, window_bounds = array<i64: 9, 4>}, {transform_indices = @transform_2, window_bounds = array<i64: 1, 4>}, {transform_indices = @transform_3, window_bounds = array<i64: 1, 4>}, {transform_indices = @transform_4, window_bounds = array<i64: 1, 16, 16, 4>}]} {
    %cst = arith.constant 0.000000e+00 : f32
    %0 = vector.broadcast %cst : f32 to vector<1x32x4xf32>
    %c0 = arith.constant 0 : index
    %c0_0 = arith.constant 0 : index
    %c0_1 = arith.constant 0 : index
    %1 = vector.load %arg7[%c0, %c0_0, %c0_1] : memref<18x32x4xf32, #tpu.memory_space<vmem>>, vector<1x32x4xf32>
    tpu.vector_store %arg7[%c0, %c0_0, %c0_1], %0 {strides = array<i32>} : memref<18x32x4xf32, #tpu.memory_space<vmem>>, vector<1x32x4xf32>,
    %c17 = arith.constant 17 : index
    %c0_2 = arith.constant 0 : index
    %c0_3 = arith.constant 0 : index
    %2 = vector.load %arg7[%c17, %c0_2, %c0_3] : memref<18x32x4xf32, #tpu.memory_space<vmem>>, vector<1x32x4xf32>
    tpu.vector_store %arg7[%c17, %c0_2, %c0_3], %0 {strides = array<i32>} : memref<18x32x4xf32, #tpu.memory_space<vmem>>, vector<1x32x4xf32>,
    %cst_4 = arith.constant 0.000000e+00 : f32
    %3 = vector.broadcast %cst_4 : f32 to vector<16x8x4xf32>
    %c1 = arith.constant 1 : index
    %c0_5 = arith.constant 0 : index
    %c0_6 = arith.constant 0 : index
    %4 = vector.load %arg7[%c1, %c0_5, %c0_6] : memref<18x32x4xf32, #tpu.memory_space<vmem>>, vector<16x8x4xf32>
    tpu.vector_store %arg7[%c1, %c0_5, %c0_6], %3 {strides = array<i32>} : memref<18x32x4xf32, #tpu.memory_space<vmem>>, vector<16x8x4xf32>,
    %c1_7 = arith.constant 1 : index
    %c24 = arith.constant 24 : index
    %c0_8 = arith.constant 0 : index
    %5 = vector.load %arg7[%c1_7, %c24, %c0_8] : memref<18x32x4xf32, #tpu.memory_space<vmem>>, vector<16x8x4xf32>
    tpu.vector_store %arg7[%c1_7, %c24, %c0_8], %3 {strides = array<i32>} : memref<18x32x4xf32, #tpu.memory_space<vmem>>, vector<16x8x4xf32>,
    %c0_9 = arith.constant 0 : index
    %c0_10 = arith.constant 0 : index
    %c0_11 = arith.constant 0 : index
    %c0_12 = arith.constant 0 : index
    %6 = vector.load %arg2[%c0_9, %c0_10, %c0_11, %c0_12] : memref<1x16x16x4xf32, #tpu.memory_space<vmem>>, vector<1x16x16x4xf32>
    %7 = vector.shape_cast %6 : vector<1x16x16x4xf32> to vector<16x16x4xf32>
    %c1_13 = arith.constant 1 : index
    %c8 = arith.constant 8 : index
    %c0_14 = arith.constant 0 : index
    %8 = vector.load %arg7[%c1_13, %c8, %c0_14] : memref<18x32x4xf32, #tpu.memory_space<vmem>>, vector<16x16x4xf32>
    tpu.vector_store %arg7[%c1_13, %c8, %c0_14], %7 {strides = array<i32>} : memref<18x32x4xf32, #tpu.memory_space<vmem>>, vector<16x16x4xf32>,
    %c0_15 = arith.constant 0 : index
    %c0_16 = arith.constant 0 : index
    %9 = vector.load %arg3[%c0_15, %c0_16] : memref<9x4xf32, #tpu.memory_space<vmem>>, vector<9x4xf32>
    %10 = vector.extract_strided_slice %9 {offsets = [0, 0], sizes = [1, 4], strides = [1, 1]} : vector<9x4xf32> to vector<1x4xf32>
    %11 = vector.shape_cast %10 : vector<1x4xf32> to vector<4xf32>
    %12 = vector.shape_cast %11 : vector<4xf32> to vector<1x1x4xf32>
    %13 = vector.extract_strided_slice %9 {offsets = [1, 0], sizes = [1, 4], strides = [1, 1]} : vector<9x4xf32> to vector<1x4xf32>
    %14 = vector.shape_cast %13 : vector<1x4xf32> to vector<4xf32>
    %15 = vector.shape_cast %14 : vector<4xf32> to vector<1x1x4xf32>
    %16 = vector.extract_strided_slice %9 {offsets = [2, 0], sizes = [1, 4], strides = [1, 1]} : vector<9x4xf32> to vector<1x4xf32>
    %17 = vector.shape_cast %16 : vector<1x4xf32> to vector<4xf32>
    %18 = vector.shape_cast %17 : vector<4xf32> to vector<1x1x4xf32>
    %19 = vector.extract_strided_slice %9 {offsets = [3, 0], sizes = [1, 4], strides = [1, 1]} : vector<9x4xf32> to vector<1x4xf32>
    %20 = vector.shape_cast %19 : vector<1x4xf32> to vector<4xf32>
    %21 = vector.shape_cast %20 : vector<4xf32> to vector<1x1x4xf32>
    %22 = vector.extract_strided_slice %9 {offsets = [4, 0], sizes = [1, 4], strides = [1, 1]} : vector<9x4xf32> to vector<1x4xf32>
    %23 = vector.shape_cast %22 : vector<1x4xf32> to vector<4xf32>
    %24 = vector.shape_cast %23 : vector<4xf32> to vector<1x1x4xf32>
    %25 = vector.extract_strided_slice %9 {offsets = [5, 0], sizes = [1, 4], strides = [1, 1]} : vector<9x4xf32> to vector<1x4xf32>
    %26 = vector.shape_cast %25 : vector<1x4xf32> to vector<4xf32>
    %27 = vector.shape_cast %26 : vector<4xf32> to vector<1x1x4xf32>
    %28 = vector.extract_strided_slice %9 {offsets = [6, 0], sizes = [1, 4], strides = [1, 1]} : vector<9x4xf32> to vector<1x4xf32>
    %29 = vector.shape_cast %28 : vector<1x4xf32> to vector<4xf32>
    %30 = vector.shape_cast %29 : vector<4xf32> to vector<1x1x4xf32>
    %31 = vector.extract_strided_slice %9 {offsets = [7, 0], sizes = [1, 4], strides = [1, 1]} : vector<9x4xf32> to vector<1x4xf32>
    %32 = vector.shape_cast %31 : vector<1x4xf32> to vector<4xf32>
    %33 = vector.shape_cast %32 : vector<4xf32> to vector<1x1x4xf32>
    %34 = vector.extract_strided_slice %9 {offsets = [8, 0], sizes = [1, 4], strides = [1, 1]} : vector<9x4xf32> to vector<1x4xf32>
    %35 = vector.shape_cast %34 : vector<1x4xf32> to vector<4xf32>
    %36 = vector.shape_cast %35 : vector<4xf32> to vector<1x1x4xf32>
    %cst_17 = arith.constant 0.000000e+00 : f32
    %37 = vector.broadcast %cst_17 : f32 to vector<16x16x4xf32>
    %c0_18 = arith.constant 0 : index
    %c7 = arith.constant 7 : index
    %c0_19 = arith.constant 0 : index
    %38 = vector.load %arg7[%c0_18, %c7, %c0_19] : memref<18x32x4xf32, #tpu.memory_space<vmem>>, vector<16x16x4xf32>
    %39 = vector.broadcast %12 : vector<1x1x4xf32> to vector<16x16x4xf32>
    %40 = arith.mulf %38, %39 : vector<16x16x4xf32>
    %41 = arith.addf %37, %40 : vector<16x16x4xf32>
    %c0_20 = arith.constant 0 : index
    %c8_21 = arith.constant 8 : index
    %c0_22 = arith.constant 0 : index
    %42 = vector.load %arg7[%c0_20, %c8_21, %c0_22] : memref<18x32x4xf32, #tpu.memory_space<vmem>>, vector<16x16x4xf32>
    %43 = vector.broadcast %15 : vector<1x1x4xf32> to vector<16x16x4xf32>
    %44 = arith.mulf %42, %43 : vector<16x16x4xf32>
    %45 = arith.addf %41, %44 : vector<16x16x4xf32>
    %c0_23 = arith.constant 0 : index
    %c9 = arith.constant 9 : index
    %c0_24 = arith.constant 0 : index
    %46 = vector.load %arg7[%c0_23, %c9, %c0_24] : memref<18x32x4xf32, #tpu.memory_space<vmem>>, vector<16x16x4xf32>
    %47 = vector.broadcast %18 : vector<1x1x4xf32> to vector<16x16x4xf32>
    %48 = arith.mulf %46, %47 : vector<16x16x4xf32>
    %49 = arith.addf %45, %48 : vector<16x16x4xf32>
    %c1_25 = arith.constant 1 : index
    %c7_26 = arith.constant 7 : index
    %c0_27 = arith.constant 0 : index
    %50 = vector.load %arg7[%c1_25, %c7_26, %c0_27] : memref<18x32x4xf32, #tpu.memory_space<vmem>>, vector<16x16x4xf32>
    %51 = vector.broadcast %21 : vector<1x1x4xf32> to vector<16x16x4xf32>
    %52 = arith.mulf %50, %51 : vector<16x16x4xf32>
    %53 = arith.addf %49, %52 : vector<16x16x4xf32>
    %c1_28 = arith.constant 1 : index
    %c8_29 = arith.constant 8 : index
    %c0_30 = arith.constant 0 : index
    %54 = vector.load %arg7[%c1_28, %c8_29, %c0_30] : memref<18x32x4xf32, #tpu.memory_space<vmem>>, vector<16x16x4xf32>
    %55 = vector.broadcast %24 : vector<1x1x4xf32> to vector<16x16x4xf32>
    %56 = arith.mulf %54, %55 : vector<16x16x4xf32>
    %57 = arith.addf %53, %56 : vector<16x16x4xf32>
    %c1_31 = arith.constant 1 : index
    %c9_32 = arith.constant 9 : index
    %c0_33 = arith.constant 0 : index
    %58 = vector.load %arg7[%c1_31, %c9_32, %c0_33] : memref<18x32x4xf32, #tpu.memory_space<vmem>>, vector<16x16x4xf32>
    %59 = vector.broadcast %27 : vector<1x1x4xf32> to vector<16x16x4xf32>
    %60 = arith.mulf %58, %59 : vector<16x16x4xf32>
    %61 = arith.addf %57, %60 : vector<16x16x4xf32>
    %c2 = arith.constant 2 : index
    %c7_34 = arith.constant 7 : index
    %c0_35 = arith.constant 0 : index
    %62 = vector.load %arg7[%c2, %c7_34, %c0_35] : memref<18x32x4xf32, #tpu.memory_space<vmem>>, vector<16x16x4xf32>
    %63 = vector.broadcast %30 : vector<1x1x4xf32> to vector<16x16x4xf32>
    %64 = arith.mulf %62, %63 : vector<16x16x4xf32>
    %65 = arith.addf %61, %64 : vector<16x16x4xf32>
    %c2_36 = arith.constant 2 : index
    %c8_37 = arith.constant 8 : index
    %c0_38 = arith.constant 0 : index
    %66 = vector.load %arg7[%c2_36, %c8_37, %c0_38] : memref<18x32x4xf32, #tpu.memory_space<vmem>>, vector<16x16x4xf32>
    %67 = vector.broadcast %33 : vector<1x1x4xf32> to vector<16x16x4xf32>
    %68 = arith.mulf %66, %67 : vector<16x16x4xf32>
    %69 = arith.addf %65, %68 : vector<16x16x4xf32>
    %c2_39 = arith.constant 2 : index
    %c9_40 = arith.constant 9 : index
    %c0_41 = arith.constant 0 : index
    %70 = vector.load %arg7[%c2_39, %c9_40, %c0_41] : memref<18x32x4xf32, #tpu.memory_space<vmem>>, vector<16x16x4xf32>
    %71 = vector.broadcast %36 : vector<1x1x4xf32> to vector<16x16x4xf32>
    %72 = arith.mulf %70, %71 : vector<16x16x4xf32>
    %73 = arith.addf %69, %72 : vector<16x16x4xf32>
    %cst_42 = arith.constant 5.000000e-01 : f32
    %74 = vector.broadcast %cst_42 : f32 to vector<16x16x4xf32>
    %75 = arith.mulf %74, %73 : vector<16x16x4xf32>
    %cst_43 = arith.constant 0.707106769 : f32
    %76 = vector.broadcast %cst_43 : f32 to vector<16x16x4xf32>
    %77 = arith.mulf %73, %76 : vector<16x16x4xf32>
    %78 = math.erf %77 : vector<16x16x4xf32>
    %cst_44 = arith.constant 1.000000e+00 : f32
    %79 = vector.broadcast %cst_44 : f32 to vector<16x16x4xf32>
    %80 = arith.addf %79, %78 : vector<16x16x4xf32>
    %81 = arith.mulf %75, %80 : vector<16x16x4xf32>
    %c0_45 = arith.constant 0 : index
    %c0_46 = arith.constant 0 : index
    %82 = vector.load %arg4[%c0_45, %c0_46] : memref<1x4xf32, #tpu.memory_space<vmem>>, vector<1x4xf32>
    %83 = vector.shape_cast %82 : vector<1x4xf32> to vector<4xf32>
    %84 = vector.shape_cast %83 : vector<4xf32> to vector<1x1x4xf32>
    %85 = vector.broadcast %84 : vector<1x1x4xf32> to vector<16x16x4xf32>
    %86 = arith.mulf %81, %85 : vector<16x16x4xf32>
    %c0_47 = arith.constant 0 : index
    %c0_48 = arith.constant 0 : index
    %87 = vector.load %arg5[%c0_47, %c0_48] : memref<1x4xf32, #tpu.memory_space<vmem>>, vector<1x4xf32>
    %88 = vector.shape_cast %87 : vector<1x4xf32> to vector<4xf32>
    %89 = vector.shape_cast %88 : vector<4xf32> to vector<1x1x4xf32>
    %90 = vector.broadcast %89 : vector<1x1x4xf32> to vector<16x16x4xf32>
    %91 = arith.addf %86, %90 : vector<16x16x4xf32>
    %c0_49 = arith.constant 0 : index
    %c0_50 = arith.constant 0 : index
    %c0_51 = arith.constant 0 : index
    %c0_52 = arith.constant 0 : index
    %92 = vector.load %arg2[%c0_49, %c0_50, %c0_51, %c0_52] : memref<1x16x16x4xf32, #tpu.memory_space<vmem>>, vector<1x16x16x4xf32>
    %93 = vector.shape_cast %92 : vector<1x16x16x4xf32> to vector<16x16x4xf32>
    %94 = arith.addf %91, %93 : vector<16x16x4xf32>
    %c0_53 = arith.constant 0 : index
    %c0_54 = arith.constant 0 : index
    %c0_55 = arith.constant 0 : index
    %c0_56 = arith.constant 0 : index
    %95 = vector.load %arg6[%c0_53, %c0_54, %c0_55, %c0_56] : memref<1x16x16x4xf32, #tpu.memory_space<vmem>>, vector<1x16x16x4xf32>
    %96 = vector.shape_cast %95 : vector<1x16x16x4xf32> to vector<16x16x4xf32>
    %97 = vector.shape_cast %94 : vector<16x16x4xf32> to vector<1x16x16x4xf32>
    tpu.vector_store %arg6[%c0_53, %c0_54, %c0_55, %c0_56], %97 {strides = array<i32>} : memref<1x16x16x4xf32, #tpu.memory_space<vmem>>, vector<1x16x16x4xf32>,
    return
  }
  func.func @transform_0(%arg0: i32, %arg1: i32) -> (i32, i32, i32, i32) {
    %c0_i32 = arith.constant 0 : i32
    %c0_i32_0 = arith.constant 0 : i32
    %c0_i32_1 = arith.constant 0 : i32
    return %arg0, %c0_i32, %c0_i32_0, %arg1 : i32, i32, i32, i32
  }
  func.func @transform_1(%arg0: i32, %arg1: i32) -> (i32, i32) {
    %c0_i32 = arith.constant 0 : i32
    %c0_i32_0 = arith.constant 0 : i32
    return %c0_i32, %arg1 : i32, i32
  }
  func.func @transform_2(%arg0: i32, %arg1: i32) -> (i32, i32) {
    %c0_i32 = arith.constant 0 : i32
    %c0_i32_0 = arith.constant 0 : i32
    return %c0_i32, %arg1 : i32, i32
  }
  func.func @transform_3(%arg0: i32, %arg1: i32) -> (i32, i32) {
    %c0_i32 = arith.constant 0 : i32
    %c0_i32_0 = arith.constant 0 : i32
    return %c0_i32, %arg1 : i32, i32
  }
  func.func @transform_4(%arg0: i32, %arg1: i32) -> (i32, i32, i32, i32) {
    %c0_i32 = arith.constant 0 : i32
    %c0_i32_0 = arith.constant 0 : i32
    %c0_i32_1 = arith.constant 0 : i32
    return %arg0, %c0_i32, %c0_i32_0, %arg1 : i32, i32, i32, i32
  }
}

</mosaic_0001>

<bundles_post_ra>
// kernel: tpu_custom_call.1
= control target key start
LH: loop header
LB: loop body
LE: loop exit
PB: predicated region body
PF: predicated region fallthrough
CT: control target
= control target key end

     0   :  { %s3155_s15 = smov 0   ;;  %s3157_s16 = smov 0   ;;  %s5364_s0 = inlined_call_operand.vmem [shape: f32[2,16,16,4], index: 0, kind: input, shape index: {}]   ;;  %s5365_s1 = inlined_call_operand.vmem [shape: f32[9,4], index: 1, kind: input, shape index: {}]   ;;  %s5366_s2 = inlined_call_operand.vmem [shape: f32[1,4], index: 2, kind: input, shape index: {}]   ;;  %s5367_s3 = inlined_call_operand.vmem [shape: f32[1,4], index: 3, kind: input, shape index: {}]   ;;  %s5368_s4 = inlined_call_operand.vmem [shape: f32[2,16,16,4], index: 4, kind: output, shape index: {}]  }
   0x1   :  { %s3159_s17 = smov 0  }
   0x2 LB: > { %s26_s18 = sadd.s32 1, %s3123_s16  ;;  %p2963_p0 = scmp.ge.s32.totalorder %s3127_s17, 1  ;;  %s3127_s17 = sphi %s3159_s17, %s14_s17   ;;  %s3123_s16 = sphi %s3157_s16, %s5416_s16   ;;  %s3119_s15 = sphi %s3155_s15, %s5415_s15  }
   0x3   : > { %p28_p1 = scmp.ge.s32.totalorder %s26_s18, 2  ;;  %p206_p2 = scmp.lt.s32.totalorder %s3127_s17, 3 }
   0x5   : > { %s5418_s18 = smov (%p28_p1, %s26_s18), 0  ;;  %p207_p3 = pnand %p2963_p0, %p206_p2 }
   0x7   : > { %210 = sbr.rel (%p207_p3) target bundleno = 588 (0x24c), region = 36 }
   0xc   : > { %vm274_vm0 = vcmask 31744   ;;  %v3129_v0 = vmov 0.0   ;;  %p248_p4 = scmp.lt.s32.totalorder %s3119_s15, 1  ;;  %v381_v4 = vld [vmem:[%s5365_s1] sm:$0xff]  ;;  %v3300_v48 = vld [vmem:[%s5365_s1 + $0x8] ss:$0 sm:$0xff] }
   0xd   : > { %275 = vst.msk [vmem:[#allocation2] sm:$0xff] %vm274_vm0, %v3129_v0  ;;  %v3239_v6 = vperm.slane %v381_v4, 0  ;;  %v3241_v8 = vperm.slane %v381_v4, 1  ;;  %v3248_v11 = vperm.slane %v381_v4, 2  ;;  %v3272_v26 = vperm.slane %v381_v4, 3 }
   0xe   : > { %276 = vst.msk [vmem:[#allocation2 + $0x8] sm:$0xff] %vm274_vm0, %v3129_v0  ;;  %s5420_s15 = smov (!%p248_p4, %s3119_s15), 1  ;;  %v3281_v33 = vperm.slane %v381_v4, 4  ;;  %v3288_v40 = vperm.slane %v381_v4, 5  ;;  %v3293_v46 = vperm.slane %v381_v4, 6  ;;  %v3295_v47 = vperm.slane %v381_v4, 7 }
   0xf   : > { %277 = vst.msk [vmem:[#allocation2 + $0x10] sm:$0xff] %vm274_vm0, %v3129_v0  ;;  %s3002_s19 = sshll.u32 %s5420_s15, 8 }
  0x10   : > { %278 = vst.msk [vmem:[#allocation2 + $0x18] sm:$0xff] %vm274_vm0, %v3129_v0  ;;  %s3220_s22 = scalar_lea.vmem %s5364_s0, %s3002_s19  ;;  %s3632_s7 = scalar_lea.vmem %s5368_s4, %s3002_s19 }
  0x11   : > { %280 = vst.msk [vmem:[#allocation2 + $0x220] sm:$0xff] %vm274_vm0, %v3129_v0  ;;  %v3226_v1 = vld [vmem:[%s3220_s22] sm:$0xff]  ;;  %v3230_v2 = vld [vmem:[%s3220_s22 + $0x8] sm:$0xff]  ;;  %v3233_v3 = vld [vmem:[%s3220_s22 + $0x10] sm:$0xff] }
  0x12   : > { %281 = vst.msk [vmem:[#allocation2 + $0x228] sm:$0xff] %vm274_vm0, %v3129_v0  ;;  %v3246_v10 = vld [vmem:[%s3220_s22 + $0x18] sm:$0xff]  ;;  %v3253_v13 = vld [vmem:[%s3220_s22 + $0x20] sm:$0xff]  ;;  %v3260_v17 = vld [vmem:[%s3220_s22 + $0x28] sm:$0xff] }
  0x13   : > { %282 = vst.msk [vmem:[#allocation2 + $0x230] sm:$0xff] %vm274_vm0, %v3129_v0  ;;  %v323_v22 = vld [vmem:[%s3220_s22 + $0x30] sm:$0xff]  ;;  %v324_v25 = vld [vmem:[%s3220_s22 + $0x38] sm:$0xff]  ;;  %v325_v28 = vld [vmem:[%s3220_s22 + $0x40] sm:$0xff] }
  0x14   : > { %283 = vst.msk [vmem:[#allocation2 + $0x238] sm:$0xff] %vm274_vm0, %v3129_v0  ;;  %v326_v29 = vld [vmem:[%s3220_s22 + $0x48] sm:$0xff]  ;;  %v327_v30 = vld [vmem:[%s3220_s22 + $0x50] sm:$0xff]  ;;  %v328_v31 = vld [vmem:[%s3220_s22 + $0x58] sm:$0xff] }
  0x15   : > { %285 = vst.msk [vmem:[#allocation2 + $0x20] sm:$0xff] %vm274_vm0, %v3129_v0  ;;  %v383_v5 = vld [vmem:[#allocation2 + $0x7] sm:$0xff]  ;;  %v331_v55 = vld [vmem:[%s3220_s22 + $0x70] sm:$0xff]  ;;  %v332_v59 = vld [vmem:[%s3220_s22 + $0x78] sm:$0xff] }
  0x16   : > { %286 = vst.msk [vmem:[#allocation2 + $0x40] sm:$0xff] %vm274_vm0, %v3129_v0  ;;  %v480_v7 = vld [vmem:[#allocation2 + $0x8] sm:$0xff]  ;;  %v416_v14 = vmul.f32 %v3239_v6, %v383_v5  ;;  %v481_v16 = vld [vmem:[#allocation2 + $0x10] sm:$0xff]  ;;  %v329_v34 = vld [vmem:[%s3220_s22 + $0x60] sm:$0xff] }
  0x17   : > { %287 = vst.msk [vmem:[#allocation2 + $0x60] sm:$0xff] %vm274_vm0, %v3129_v0  ;;  %v577_v9 = vld [vmem:[#allocation2 + $0x9] sm:$0xff]  ;;  %v513_v15 = vmul.f32 %v3241_v8, %v480_v7  ;;  %v514_v20 = vmul.f32 %v3241_v8, %v481_v16  ;;  %v578_v21 = vld [vmem:[#allocation2 + $0x11] sm:$0xff]  ;;  %v333_v4 = vld [vmem:[%s3220_s22 + $0x80] sm:$0xff] }
  0x18   : > { %288 = vst.msk [vmem:[#allocation2 + $0x80] sm:$0xff] %vm274_vm0, %v3129_v0  ;;  %v384_v12 = vld [vmem:[#allocation2 + $0xf] sm:$0xff]  ;;  %v610_v18 = vmul.f32 %v3248_v11, %v577_v9  ;;  %v611_v24 = vmul.f32 %v3248_v11, %v578_v21 }
  0x19   : > { %289 = vst.msk [vmem:[#allocation2 + $0xa0] sm:$0xff] %vm274_vm0, %v3129_v0  ;;  %v417_v19 = vmul.f32 %v3239_v6, %v384_v12  ;;  %v545_v23 = vadd.f32 %v513_v15, %v416_v14  ;;  %v330_v38 = vld [vmem:[%s3220_s22 + $0x68] sm:$0xff] }
  0x1a   : > { %290 = vst.msk [vmem:[#allocation2 + $0xc0] sm:$0xff] %vm274_vm0, %v3129_v0  ;;  %v334_v15 = vld [vmem:[%s3220_s22 + $0x88] sm:$0xff] }
  0x1b   : > { %291 = vst.msk [vmem:[#allocation2 + $0xe0] sm:$0xff] %vm274_vm0, %v3129_v0  ;;  %v546_v27 = vadd.f32 %v514_v20, %v417_v19  ;;  %v642_v32 = vadd.f32 %v610_v18, %v545_v23 }
  0x1c   : > { %292 = vst.msk [vmem:[#allocation2 + $0x100] sm:$0xff] %vm274_vm0, %v3129_v0 }
  0x1d   : > { %293 = vst.msk [vmem:[#allocation2 + $0x120] sm:$0xff] %vm274_vm0, %v3129_v0  ;;  %v643_v37 = vadd.f32 %v611_v24, %v546_v27 }
  0x1e   : > { %294 = vst.msk [vmem:[#allocation2 + $0x140] sm:$0xff] %vm274_vm0, %v3129_v0 }
  0x1f   : > { %295 = vst.msk [vmem:[#allocation2 + $0x160] sm:$0xff] %vm274_vm0, %v3129_v0 }
  0x20   : > { %296 = vst.msk [vmem:[#allocation2 + $0x180] sm:$0xff] %vm274_vm0, %v3129_v0 }
  0x21   : > { %297 = vst.msk [vmem:[#allocation2 + $0x1a0] sm:$0xff] %vm274_vm0, %v3129_v0 }
  0x22   : > { %298 = vst.msk [vmem:[#allocation2 + $0x1c0] sm:$0xff] %vm274_vm0, %v3129_v0 }
  0x23   : > { %299 = vst.msk [vmem:[#allocation2 + $0x1e0] sm:$0xff] %vm274_vm0, %v3129_v0 }
  0x24   : > { %300 = vst.msk [vmem:[#allocation2 + $0x200] sm:$0xff] %vm274_vm0, %v3129_v0 }
  0x25   : > { %301 = vst.msk [vmem:[#allocation2 + $0x38] sm:$0xff] %vm274_vm0, %v3129_v0 }
  0x26   : > { %302 = vst.msk [vmem:[#allocation2 + $0x58] sm:$0xff] %vm274_vm0, %v3129_v0 }
  0x27   : > { %303 = vst.msk [vmem:[#allocation2 + $0x78] sm:$0xff] %vm274_vm0, %v3129_v0 }
  0x28   : > { %304 = vst.msk [vmem:[#allocation2 + $0x98] sm:$0xff] %vm274_vm0, %v3129_v0 }
  0x29   : > { %305 = vst.msk [vmem:[#allocation2 + $0xb8] sm:$0xff] %vm274_vm0, %v3129_v0 }
  0x2a   : > { %306 = vst.msk [vmem:[#allocation2 + $0xd8] sm:$0xff] %vm274_vm0, %v3129_v0 }
  0x2b   : > { %307 = vst.msk [vmem:[#allocation2 + $0xf8] sm:$0xff] %vm274_vm0, %v3129_v0 }
  0x2c   : > { %308 = vst.msk [vmem:[#allocation2 + $0x118] sm:$0xff] %vm274_vm0, %v3129_v0 }
  0x2d   : > { %309 = vst.msk [vmem:[#allocation2 + $0x138] sm:$0xff] %vm274_vm0, %v3129_v0 }
  0x2e   : > { %310 = vst.msk [vmem:[#allocation2 + $0x158] sm:$0xff] %vm274_vm0, %v3129_v0 }
  0x2f   : > { %311 = vst.msk [vmem:[#allocation2 + $0x178] sm:$0xff] %vm274_vm0, %v3129_v0 }
  0x30   : > { %312 = vst.msk [vmem:[#allocation2 + $0x198] sm:$0xff] %vm274_vm0, %v3129_v0 }
  0x31   : > { %313 = vst.msk [vmem:[#allocation2 + $0x1b8] sm:$0xff] %vm274_vm0, %v3129_v0 }
  0x32   : > { %314 = vst.msk [vmem:[#allocation2 + $0x1d8] sm:$0xff] %vm274_vm0, %v3129_v0 }
  0x33   : > { %315 = vst.msk [vmem:[#allocation2 + $0x1f8] sm:$0xff] %vm274_vm0, %v3129_v0 }
  0x34   : > { %316 = vst.msk [vmem:[#allocation2 + $0x218] sm:$0xff] %vm274_vm0, %v3129_v0 }
  0x35   : > { %349 = vst.msk [vmem:[#allocation2 + $0x28] sm:$0xff] %vm274_vm0, %v3226_v1 }
  0x36   : > { %350 = vst.msk [vmem:[#allocation2 + $0x30] sm:$0xff] %vm274_vm0, %v3230_v2 }
  0x37   : > { %5375 = vst [vmem:[#allocation3_spill] sm:$0xff] %v3253_v13 }
  0x38   : > { %351 = vst.msk [vmem:[#allocation2 + $0x48] sm:$0xff] %vm274_vm0, %v3233_v3 }
  0x39   : > { %5376 = vst [vmem:[#allocation4_spill] sm:$0xff] %v3260_v17 }
  0x3a   : > { %352 = vst.msk [vmem:[#allocation2 + $0x50] sm:$0xff] %vm274_vm0, %v3246_v10 }
  0x3b   : > { %353 = vst.msk [vmem:[#allocation2 + $0x68] sm:$0xff] %vm274_vm0, %v3253_v13 }
  0x3c   : > { %354 = vst.msk [vmem:[#allocation2 + $0x70] sm:$0xff] %vm274_vm0, %v3260_v17  ;;  %v674_v35 = vld [vmem:[#allocation2 + $0x27] sm:$0xff] }
  0x3d   : > { %355 = vst.msk [vmem:[#allocation2 + $0x88] sm:$0xff] %vm274_vm0, %v323_v22  ;;  %v771_v36 = vld [vmem:[#allocation2 + $0x28] sm:$0xff]  ;;  %v707_v39 = vmul.f32 %v3272_v26, %v674_v35  ;;  %v772_v42 = vld [vmem:[#allocation2 + $0x30] sm:$0xff]  ;;  %v418_v43 = vmul.f32 %v674_v35, %v3239_v6 }
  0x3e   : > { %356 = vst.msk [vmem:[#allocation2 + $0x90] sm:$0xff] %vm274_vm0, %v324_v25  ;;  %v675_v41 = vld [vmem:[#allocation2 + $0x2f] sm:$0xff]  ;;  %v515_v44 = vmul.f32 %v771_v36, %v3241_v8  ;;  %v804_v51 = vmul.f32 %v3281_v33, %v771_v36  ;;  %v805_v58 = vmul.f32 %v3281_v33, %v772_v42  ;;  %v516_v27 = vmul.f32 %v772_v42, %v3241_v8 }
  0x3f   : > { %357 = vst.msk [vmem:[#allocation2 + $0xa8] sm:$0xff] %vm274_vm0, %v325_v28  ;;  %v868_v45 = vld [vmem:[#allocation2 + $0x29] sm:$0xff]  ;;  %v708_v49 = vmul.f32 %v3272_v26, %v675_v41  ;;  %v739_v50 = vadd.f32 %v707_v39, %v642_v32  ;;  %v869_v54 = vld [vmem:[#allocation2 + $0x31] sm:$0xff]  ;;  %v419_v25 = vmul.f32 %v675_v41, %v3239_v6 }
  0x40   : > { %358 = vst.msk [vmem:[#allocation2 + $0xb0] sm:$0xff] %vm274_vm0, %v326_v29  ;;  %v966_v52 = vld [vmem:[#allocation2 + $0x47] sm:$0xff]  ;;  %v901_v61 = vmul.f32 %v3288_v40, %v868_v45  ;;  %v547_v63 = vadd.f32 %v515_v44, %v418_v43  ;;  %v612_v0 = vmul.f32 %v868_v45, %v3248_v11  ;;  %v902_v12 = vmul.f32 %v3288_v40, %v869_v54  ;;  %v335_v22 = vld [vmem:[%s3220_s22 + $0x90] sm:$0xff]  ;;  %v336_v28 = vld [vmem:[%s3220_s22 + $0x98] sm:$0xff] }
  0x41   : > { %359 = vst.msk [vmem:[#allocation2 + $0xc8] sm:$0xff] %vm274_vm0, %v327_v30  ;;  %v1063_v53 = vld [vmem:[#allocation2 + $0x48] sm:$0xff]  ;;  %v740_v57 = vadd.f32 %v708_v49, %v643_v37  ;;  %v836_v60 = vadd.f32 %v804_v51, %v739_v50  ;;  %v999_v5 = vmul.f32 %v3293_v46, %v966_v52  ;;  %v3321_v14 = vld [vmem:[#allocation2 + $0x50] sm:$0xff]  ;;  %v709_v21 = vmul.f32 %v966_v52, %v3272_v26 }
  0x42   : > { %360 = vst.msk [vmem:[#allocation2 + $0xd0] sm:$0xff] %vm274_vm0, %v328_v31  ;;  %v3307_v56 = vld [vmem:[#allocation2 + $0x49] sm:$0xff]  ;;  %v1096_v7 = vmul.f32 %v3295_v47, %v1063_v53  ;;  %v3327_v19 = vld [vmem:[#allocation2 + $0x51] sm:$0xff]  ;;  %v644_v20 = vadd.f32 %v612_v0, %v547_v63  ;;  %v1097_v30 = vmul.f32 %v3295_v47, %v3321_v14  ;;  %v806_v32 = vmul.f32 %v1063_v53, %v3281_v33  ;;  %v341_v0 = vld [vmem:[%s3220_s22 + $0xc0] sm:$0xff] }
  0x43   : > { %361 = vst.msk [vmem:[#allocation2 + $0xe8] sm:$0xff] %vm274_vm0, %v329_v34  ;;  %v3313_v62 = vld [vmem:[#allocation2 + $0x4f] sm:$0xff]  ;;  %v837_v9 = vadd.f32 %v805_v58, %v740_v57  ;;  %v933_v16 = vadd.f32 %v901_v61, %v836_v60  ;;  %v1193_v18 = vmul.f32 %v3300_v48, %v3307_v56  ;;  %v337_v34 = vld [vmem:[%s3220_s22 + $0xa0] sm:$0xff]  ;;  %v1194_v36 = vmul.f32 %v3300_v48, %v3327_v19  ;;  %v340_v58 = vld [vmem:[%s3220_s22 + $0xb8] sm:$0xff] }
  0x44   : > { %362 = vst.msk [vmem:[#allocation2 + $0xf0] sm:$0xff] %vm274_vm0, %v330_v38  ;;  %v1000_v24 = vmul.f32 %v3293_v46, %v3313_v62  ;;  %v741_v31 = vadd.f32 %v709_v21, %v644_v20  ;;  %v3345_v37 = vld [vmem:[#allocation2 + $0x67] sm:$0xff]  ;;  %v548_v38 = vadd.f32 %v516_v27, %v419_v25  ;;  %v613_v39 = vmul.f32 %v869_v54, %v3248_v11  ;;  %v339_v49 = vld [vmem:[%s3220_s22 + $0xb0] sm:$0xff]  ;;  %v344_v27 = vld [vmem:[%s3220_s22 + $0xd8] sm:$0xff] }
  0x45   : > { %363 = vst.msk [vmem:[#allocation2 + $0x108] sm:$0xff] %vm274_vm0, %v331_v55  ;;  %v934_v23 = vadd.f32 %v902_v12, %v837_v9  ;;  %v1031_v29 = vadd.f32 %v999_v5, %v933_v16  ;;  %v338_v41 = vld [vmem:[%s3220_s22 + $0xa8] sm:$0xff]  ;;  %v903_v44 = vmul.f32 %v3307_v56, %v3288_v40  ;;  %v710_v45 = vmul.f32 %v3313_v62, %v3272_v26  ;;  %v343_v20 = vld [vmem:[%s3220_s22 + $0xd0] sm:$0xff] }
  0x46   : > { %364 = vst.msk [vmem:[#allocation2 + $0x110] sm:$0xff] %vm274_vm0, %v332_v59  ;;  %v838_v43 = vadd.f32 %v806_v32, %v741_v31  ;;  %v3356_v51 = vld [vmem:[#allocation2 + $0x68] sm:$0xff]  ;;  %v645_v55 = vadd.f32 %v613_v39, %v548_v38  ;;  %v420_v54 = vmul.f32 %v966_v52, %v3239_v6  ;;  %v517_v57 = vmul.f32 %v1063_v53, %v3241_v8  ;;  %v345_v31 = vld [vmem:[%s3220_s22 + $0xe0] sm:$0xff]  ;;  %v3550_v13 = vld [vmem:[#allocation2 + $0x91] sm:$0xff] }
  0x47   : > { %365 = vst.msk [vmem:[#allocation2 + $0x128] sm:$0xff] %vm274_vm0, %v333_v4  ;;  %v1032_v35 = vadd.f32 %v1000_v24, %v934_v23  ;;  %v1128_v42 = vadd.f32 %v1096_v7, %v1031_v29  ;;  %v1001_v61 = vmul.f32 %v3293_v46, %v3345_v37  ;;  %v807_v63 = vmul.f32 %v3321_v14, %v3281_v33  ;;  %v3368_v52 = vld [vmem:[#allocation2 + $0x69] sm:$0xff]  ;;  %v3388_v24 = vld [vmem:[#allocation2 + $0x71] sm:$0xff] }
  0x48   : > { %366 = vst.msk [vmem:[#allocation2 + $0x130] sm:$0xff] %vm274_vm0, %v334_v15  ;;  %v935_v60 = vadd.f32 %v903_v44, %v838_v43  ;;  %v742_v5 = vadd.f32 %v710_v45, %v645_v55  ;;  %v549_v53 = vadd.f32 %v517_v57, %v420_v54  ;;  %v614_v7 = vmul.f32 %v3307_v56, %v3248_v11  ;;  %v342_v9 = vld [vmem:[%s3220_s22 + $0xc8] sm:$0xff]  ;;  %v3386_v23 = vld [vmem:[#allocation2 + $0x70] sm:$0xff]  ;;  %v348_v45 = vld [vmem:[%s3220_s22 + $0xf8] sm:$0xff] }
  0x49   : > { %367 = vst.msk [vmem:[#allocation2 + $0x148] sm:$0xff] %vm274_vm0, %v335_v22  ;;  %v1129_v50 = vadd.f32 %v1097_v30, %v1032_v35  ;;  %v1225_v59 = vadd.f32 %v1193_v18, %v1128_v42  ;;  %v1098_v16 = vmul.f32 %v3295_v47, %v3356_v51  ;;  %v3378_v18 = vld [vmem:[#allocation2 + $0x6f] sm:$0xff]  ;;  %v904_v56 = vmul.f32 %v3327_v19, %v3288_v40 }
  0x4a   : > { %368 = vst.msk [vmem:[#allocation2 + $0x150] sm:$0xff] %vm274_vm0, %v336_v28  ;;  %v1033_v15 = vadd.f32 %v1001_v61, %v935_v60  ;;  %v839_v22 = vadd.f32 %v807_v63, %v742_v5  ;;  %v646_v25 = vadd.f32 %v614_v7, %v549_v53  ;;  %v1195_v30 = vmul.f32 %v3300_v48, %v3368_v52  ;;  %v346_v38 = vld [vmem:[%s3220_s22 + $0xe8] sm:$0xff]  ;;  %v347_v44 = vld [vmem:[%s3220_s22 + $0xf0] sm:$0xff] }
  0x4b   : > { %369 = vst.msk [vmem:[#allocation2 + $0x168] sm:$0xff] %vm274_vm0, %v337_v34  ;;  %v1226_v4 = vadd.f32 %v1194_v36, %v1129_v50  ;;  %v3374_v12 = vmul.f32 0.70710677, %v1225_v59  ;;  %v1002_v35 = vmul.f32 %v3293_v46, %v3378_v18  ;;  %v711_v36 = vmul.f32 %v3345_v37, %v3272_v26  ;;  %v3428_v63 = vld [vmem:[#allocation2 + $0x87] sm:$0xff] }
  0x4c   : > { %370 = vst.msk [vmem:[#allocation2 + $0x170] sm:$0xff] %vm274_vm0, %v338_v41  ;;  %v1130_v29 = vadd.f32 %v1098_v16, %v1033_v15  ;;  %v936_v34 = vadd.f32 %v904_v56, %v839_v22  ;;  %v1099_v41 = vmul.f32 %v3295_v47, %v3386_v23  ;;  %v1196_v42 = vmul.f32 %v3300_v48, %v3388_v24  ;;  %v3436_v15 = vld [vmem:[#allocation2 + $0x88] sm:$0xff] }
  0x4d   : > { %371 = vst.msk [vmem:[#allocation2 + $0x188] sm:$0xff] %vm274_vm0, %v339_v49  ;;  %v3382_v21 = vmul.f32 0.70710677, %v1226_v4  ;;  %v1321_v28 = vmul.f32 %v3374_v12, %v3374_v12  ;;  %v808_v43 = vmul.f32 %v3356_v51, %v3281_v33  ;;  %v3417_v49 = vmul.f32 0.5, %v1225_v59 }
  0x4e   : > { %372 = vst.msk [vmem:[#allocation2 + $0x190] sm:$0xff] %vm274_vm0, %v340_v58  ;;  %v1034_v55 = vadd.f32 %v1002_v35, %v936_v34  ;;  %v743_v54 = vadd.f32 %v711_v36, %v646_v25  ;;  %v3424_v60 = vadd.f32 %v1195_v30, %v1130_v29  ;;  %v905_v61 = vmul.f32 %v3368_v52, %v3288_v40 }
  0x4f   : > { %373 = vst.msk [vmem:[#allocation2 + $0x1a8] sm:$0xff] %vm274_vm0, %v341_v0  ;;  %v1361_v32 = vmul.f32 %v3382_v21, %v3382_v21  ;;  %v3406_v39 = vmin.f32 %v1321_v28, 16.0  ;;  %v3431_v59 = vmul.f32 0.5, %v1226_v4  ;;  %v421_v16 = vmul.f32 %v3313_v62, %v3239_v6 }
  0x50   : > { %374 = vst.msk [vmem:[#allocation2 + $0x1b0] sm:$0xff] %vm274_vm0, %v342_v9  ;;  %v1131_v53 = vadd.f32 %v1099_v41, %v1034_v55  ;;  %v840_v25 = vadd.f32 %v808_v43, %v743_v54  ;;  %v3448_v29 = vmul.f32 0.70710677, %v3424_v60  ;;  %v1003_v62 = vmul.f32 %v3293_v46, %v3428_v63 }
  0x51   : > { %375 = vst.msk [vmem:[#allocation2 + $0x1c8] sm:$0xff] %vm274_vm0, %v343_v20  ;;  %v3419_v50 = vmin.f32 %v1361_v32, 16.0  ;;  %v1323_v57 = vmul.f32 2.1237322e-06, %v3406_v39  ;;  %v1334_v58 = vmul.f32 3.8918573e-05, %v3406_v39  ;;  %v518_v20 = vmul.f32 %v3321_v14, %v3241_v8 }
  0x52   : > { %376 = vst.msk [vmem:[#allocation2 + $0x1d0] sm:$0xff] %vm274_vm0, %v344_v27  ;;  %v3443_v56 = vadd.f32 %v1196_v42, %v1131_v53  ;;  %v1100_v32 = vmul.f32 %v3295_v47, %v3436_v15  ;;  %v1401_v36 = vmul.f32 %v3448_v29, %v3448_v29 }
  0x53   : > { %377 = vst.msk [vmem:[#allocation2 + $0x1e8] sm:$0xff] %vm274_vm0, %v345_v31  ;;  %v1363_v0 = vmul.f32 2.1237322e-06, %v3419_v50  ;;  %v1374_v5 = vmul.f32 3.8918573e-05, %v3419_v50  ;;  %v550_v41 = vadd.f32 %v518_v20, %v421_v16 }
  0x54   : > { %378 = vst.msk [vmem:[#allocation2 + $0x1f0] sm:$0xff] %vm274_vm0, %v346_v38  ;;  %v1324_v7 = vadd.f32 0.00028619796, %v1323_v57  ;;  %v1335_v9 = vadd.f32 0.001143296, %v1334_v58  ;;  %v3461_v38 = vld [vmem:[#allocation2 + $0x89] sm:$0xff]  ;;  %v615_v58 = vmul.f32 %v3327_v19, %v3248_v11  ;;  %v712_v19 = vmul.f32 %v3378_v18, %v3272_v26 }
  0x55   : > { %379 = vst.msk [vmem:[#allocation2 + $0x208] sm:$0xff] %vm274_vm0, %v347_v44  ;;  %v1364_v4 = vadd.f32 0.00028619796, %v1363_v0  ;;  %v1375_v22 = vadd.f32 0.001143296, %v1374_v5  ;;  %v3467_v57 = vmin.f32 %v1401_v36, 16.0 }
  0x56   : > { %380 = vst.msk [vmem:[#allocation2 + $0x210] sm:$0xff] %vm274_vm0, %v348_v45  ;;  %v1325_v27 = vmul.f32 %v1324_v7, %v3406_v39  ;;  %v1336_v28 = vmul.f32 %v1335_v9, %v3406_v39  ;;  %v3455_v31 = vmul.f32 0.70710677, %v3443_v56  ;;  %v937_v45 = vadd.f32 %v905_v61, %v840_v25 }
  0x57   : > { %v1365_v30 = vmul.f32 %v1364_v4, %v3419_v50  ;;  %v1376_v14 = vmul.f32 %v1375_v22, %v3419_v50  ;;  %v1197_v7 = vmul.f32 %v3300_v48, %v3461_v38  ;;  %v1403_v16 = vmul.f32 2.1237322e-06, %v3467_v57 }
  0x58   : > { %v1326_v34 = vadd.f32 0.0036580483, %v1325_v27  ;;  %v1337_v35 = vadd.f32 0.014752088, %v1336_v28  ;;  %v1441_v44 = vmul.f32 %v3455_v31, %v3455_v31  ;;  %v647_v20 = vadd.f32 %v615_v58, %v550_v41 }
  0x59   : > { %v1366_v42 = vadd.f32 0.0036580483, %v1365_v30  ;;  %v1377_v43 = vadd.f32 0.014752088, %v1376_v14  ;;  %v1035_v25 = vadd.f32 %v1003_v62, %v937_v45  ;;  %v1404_v30 = vadd.f32 0.00028619796, %v1403_v16 }
  0x5a   : > { %v1327_v55 = vmul.f32 %v1326_v34, %v3406_v39  ;;  %v1338_v54 = vmul.f32 %v1337_v35, %v3406_v39  ;;  %v3473_v53 = vmin.f32 %v1441_v44, 16.0  ;;  %v1414_v14 = vmul.f32 3.8918573e-05, %v3467_v57 }
  0x5b   : > { %v1367_v0 = vmul.f32 %v1366_v42, %v3419_v50  ;;  %v1378_v5 = vmul.f32 %v1377_v43, %v3419_v50  ;;  %v1405_v43 = vmul.f32 %v1404_v30, %v3467_v57  ;;  %v744_v58 = vadd.f32 %v712_v19, %v647_v20  ;;  %v3499_v19 = vld [vmem:[#allocation2 + $0x8f] sm:$0xff] }
  0x5c   : > { %v1328_v9 = vadd.f32 0.05243302, %v1327_v55  ;;  %v1339_v61 = vadd.f32 0.112945676, %v1338_v54  ;;  %v1443_v36 = vmul.f32 2.1237322e-06, %v3473_v53  ;;  %v809_v20 = vmul.f32 %v3386_v23, %v3281_v33 }
  0x5d   : > { %v1368_v4 = vadd.f32 0.05243302, %v1367_v0  ;;  %v1379_v22 = vadd.f32 0.112945676, %v1378_v5  ;;  %v1454_v41 = vmul.f32 3.8918573e-05, %v3473_v53 }
  0x5e   : > { %v1329_v27 = vmul.f32 %v1328_v9, %v3406_v39  ;;  %v1340_v28 = vmul.f32 %v1339_v61, %v3406_v39  ;;  %v1415_v44 = vadd.f32 0.001143296, %v1414_v14  ;;  %v1444_v54 = vadd.f32 0.00028619796, %v1443_v36  ;;  %5377 = vst [vmem:[#allocation5_spill] sm:$0xff] %v3499_v19 }
  0x5f   : > { %v1369_v34 = vmul.f32 %v1368_v4, %v3419_v50  ;;  %v1380_v35 = vmul.f32 %v1379_v22, %v3419_v50  ;;  %v1406_v9 = vadd.f32 0.0036580483, %v1405_v43  ;;  %v1455_v22 = vadd.f32 0.001143296, %v1454_v41 }
  0x60   : > { %v1330_v42 = vadd.f32 0.18741608, %v1329_v27  ;;  %v1341_v62 = vadd.f32 0.4994258, %v1340_v28  ;;  %v1416_v61 = vmul.f32 %v1415_v44, %v3467_v57  ;;  %v1445_v4 = vmul.f32 %v1444_v54, %v3473_v53 }
  0x61   : > { %v1370_v45 = vadd.f32 0.18741608, %v1369_v34  ;;  %v1381_v55 = vadd.f32 0.4994258, %v1380_v35  ;;  %v1132_v27 = vadd.f32 %v1100_v32, %v1035_v25  ;;  %v1407_v14 = vmul.f32 %v1406_v9, %v3467_v57 }
  0x62   : > { %v1331_v0 = vmul.f32 %v1330_v42, %v3406_v39  ;;  %v1342_v5 = vmul.f32 %v1341_v62, %v3406_v39  ;;  %v1417_v34 = vadd.f32 0.014752088, %v1416_v61  ;;  %v1446_v35 = vadd.f32 0.0036580483, %v1445_v4  ;;  %v3504_v42 = vld [vmem:[#allocation2 + $0x90] sm:$0xff] }
  0x63   : > { %v1382_v16 = vmul.f32 %v1381_v55, %v3419_v50  ;;  %v1371_v30 = vmul.f32 %v1370_v45, %v3419_v50  ;;  %v1456_v36 = vmul.f32 %v1455_v22, %v3473_v53  ;;  %5378 = vst [vmem:[#allocation6_spill] sm:$0xff] %v3504_v42  ;;  %v3508_v50 = vmul.f32 0.5, %v3424_v60 }
  0x64   : > { %v3493_v28 = vadd.f32 1.0, %v1342_v5  ;;  %v1332_v32 = vadd.f32 1.1283791, %v1331_v0  ;;  %v841_v25 = vadd.f32 %v809_v20, %v744_v58  ;;  %v3511_v41 = vadd.f32 %v1197_v7, %v1132_v27 }
  0x65   : > { %v3501_v39 = vadd.f32 1.0, %v1382_v16  ;;  %v906_v62 = vmul.f32 %v3388_v24, %v3288_v40  ;;  %v1004_v43 = vmul.f32 %v3293_v46, %v3499_v19  ;;  %v1372_v45 = vadd.f32 1.1283791, %v1371_v30 }
  0x66   : > { %3032 = vrcp.f32 %v3493_v28  ;;  %v1353_v44 = vand.u32 2147483647, %v3493_v28  ;;  %v1408_v55 = vadd.f32 0.05243302, %v1407_v14  ;;  %v1101_v54 = vmul.f32 %v3295_v47, %v3504_v42 }
  0x67   : > { %3034 = vrcp.f32 %v3501_v39  ;;  %v1355_v60 = vand.u32 2147483648, %v3493_v28  ;;  %v1418_v58 = vmul.f32 %v1417_v34, %v3467_v57  ;;  %v1447_v7 = vmul.f32 %v1446_v35, %v3473_v53 }
  0x68   : > { %v1457_v0 = vadd.f32 0.014752088, %v1456_v36  ;;  %v1333_v5 = vmul.f32 %v1332_v32, %v3374_v12  ;;  %v1393_v9 = vand.u32 2147483647, %v3501_v39  ;;  %v1409_v61 = vmul.f32 %v1408_v55, %v3467_v57 }
  0x69   : > { %v938_v16 = vadd.f32 %v906_v62, %v841_v25  ;;  %vm1349_vm1 = vweird.f32 %v3493_v28  ;;  %v1419_v4 = vadd.f32 0.112945676, %v1418_v58  ;;  %v1448_v22 = vadd.f32 0.05243302, %v1447_v7 }
  0x6a   : > { %v1458_v27 = vmul.f32 %v1457_v0, %v3473_v53  ;;  %v3529_v30 = vmul.f32 0.70710677, %v3511_v41  ;;  %v1373_v20 = vmul.f32 %v1372_v45, %v3382_v21  ;;  %vm1389_vm2 = vweird.f32 %v3501_v39 }
  0x6b   : > { %v1395_v12 = vand.u32 2147483648, %v3501_v39  ;;  %v1410_v34 = vadd.f32 0.18741608, %v1409_v61  ;;  %vm3535_vm3 = vcmp.eq.f32.partialorder %v1353_v44, 8.507059e+37  ;;  %v1356_v25 = vor.u32 1.1754944e-38, %v1355_v60 }
  0x6c   : > { %v3033_v14 = vpop.eup %3032  ;;  %v1420_v62 = vmul.f32 %v1419_v4, %v3467_v57  ;;  %v1449_v55 = vmul.f32 %v1448_v22, %v3473_v53  ;;  %vm3542_vm4 = vcmp.eq.f32.partialorder %v1393_v9, 8.507059e+37  ;;  %v1459_v45 = vadd.f32 0.112945676, %v1458_v27 }
  0x6d   : > { %v3035_v35 = vpop.eup %3034  ;;  %v1345_v36 = vmul.f32 %v3033_v14, %v3493_v28  ;;  %v1036_v7 = vadd.f32 %v1004_v43, %v938_v16  ;;  %v1481_v44 = vmul.f32 %v3529_v30, %v3529_v30  ;;  %vm1350_vm5 = vweird.f32 %v3033_v14 }
  0x6e   : > { %v1385_v58 = vmul.f32 %v3035_v35, %v3501_v39  ;;  %v1421_v61 = vadd.f32 0.4994258, %v1420_v62  ;;  %v1450_v17 = vadd.f32 0.18741608, %v1449_v55  ;;  %v1411_v4 = vmul.f32 %v1410_v34, %v3467_v57  ;;  %vm1351_vm7 = vmor %vm1349_vm1, %vm1350_vm5 }
  0x6f   : > { %v1346_v0 = vsub.f32 1.0, %v1345_v36  ;;  %v1460_v22 = vmul.f32 %v1459_v45, %v3473_v53  ;;  %v3554_v43 = vmin.f32 %v1481_v44, 16.0  ;;  %vm1390_vm6 = vweird.f32 %v3035_v35 }
  0x70   : > { %v1386_v60 = vsub.f32 1.0, %v1385_v58  ;;  %v1422_v42 = vmul.f32 %v1421_v61, %v3467_v57  ;;  %v1451_v27 = vmul.f32 %v1450_v17, %v3473_v53  ;;  %v1396_v36 = vor.u32 1.1754944e-38, %v1395_v12  ;;  %vm1391_vm8 = vmor %vm1389_vm2, %vm1390_vm6 }
  0x71   : > { %v1347_v9 = vmul.f32 %v3033_v14, %v1346_v0  ;;  %v1461_v62 = vadd.f32 0.4994258, %v1460_v22  ;;  %v1133_v58 = vadd.f32 %v1101_v54, %v1036_v7  ;;  %v1198_v34 = vmul.f32 %v3300_v48, %v3550_v13 }
  0x72   : > { %v1387_v16 = vmul.f32 %v3035_v35, %v1386_v60  ;;  %v3556_v19 = vadd.f32 1.0, %v1422_v42  ;;  %v1483_v45 = vmul.f32 2.1237322e-06, %v3554_v43  ;;  %v1494_v0 = vmul.f32 3.8918573e-05, %v3554_v43 }
  0x73   : > { %v1348_v55 = vadd.f32 %v3033_v14, %v1347_v9  ;;  %v1462_v17 = vmul.f32 %v1461_v62, %v3473_v53  ;;  %v1412_v42 = vadd.f32 1.1283791, %v1411_v4  ;;  %v1452_v54 = vadd.f32 1.1283791, %v1451_v27 }
  0x74   : > { %v1388_v57 = vadd.f32 %v3035_v35, %v1387_v16  ;;  %3036 = vrcp.f32 %v3556_v19  ;;  %v1435_v61 = vand.u32 2147483648, %v3556_v19  ;;  %v422_v53 = vmul.f32 %v3345_v37, %v3239_v6  ;;  %v3589_v37 = vld [vmem:[%s5366_s2] ss:$0 sm:$0xff] }
  0x75   : > { %v1352_v12 = vsel %vm1351_vm7, %v3033_v14, %v1348_v55  ;;  %v3576_v60 = vadd.f32 1.0, %v1462_v17  ;;  %v3578_v39 = vadd.f32 %v1198_v34, %v1133_v58  ;;  %v1433_v22 = vand.u32 2147483647, %v3556_v19 }
  0x76   : > { %v1357_v7 = vsel %vm3535_vm3, %v1356_v25, %v1352_v12  ;;  %v1392_v28 = vsel %vm1391_vm8, %v3035_v35, %v1388_v57  ;;  %v1484_v9 = vadd.f32 0.00028619796, %v1483_v45  ;;  %v1495_v32 = vadd.f32 0.001143296, %v1494_v0  ;;  %v3610_v0 = vld [vmem:[%s5367_s3] ss:$0 sm:$0xff] }
  0x77   : > { %v1358_v44 = vmul.f32 %v1357_v7, %v1333_v5  ;;  %v1397_v14 = vsel %vm3542_vm4, %v1396_v36, %v1392_v28  ;;  %v1413_v35 = vmul.f32 %v1412_v42, %v3448_v29  ;;  %v3583_v27 = vmul.f32 %v1452_v54, %v3455_v31 }
  0x78   : > { %v1398_v4 = vmul.f32 %v1397_v14, %v1373_v20  ;;  %3038 = vrcp.f32 %v3576_v60  ;;  %vm1429_vm9 = vweird.f32 %v3556_v19  ;;  %v1436_v20 = vor.u32 1.1754944e-38, %v1435_v61 }
  0x79   : > { %v2968_v25 = vclamps-f32 %v1358_v44, 1.0  ;;  %v1485_v21 = vmul.f32 %v1484_v9, %v3554_v43  ;;  %v1496_v16 = vmul.f32 %v1495_v32, %v3554_v43  ;;  %v1473_v31 = vand.u32 2147483647, %v3576_v60 }
  0x7a   : > { %v2969_v5 = vclamps-f32 %v1398_v4, 1.0  ;;  %v3037_v36 = vpop.eup %3036  ;;  %v3596_v62 = vmul.f32 0.70710677, %v3578_v39  ;;  %v519_v55 = vmul.f32 %v3356_v51, %v3241_v8  ;;  %vm3601_vm11 = vcmp.eq.f32.partialorder %v1433_v22, 8.507059e+37 }
  0x7b   : > { %v2601_v29 = vadd.f32 1.0, %v2968_v25  ;;  %v1425_v34 = vmul.f32 %v3037_v36, %v3556_v19  ;;  %vm1430_vm10 = vweird.f32 %v3037_v36  ;;  %v1475_v17 = vand.u32 2147483648, %v3576_v60 }
  0x7c   : > { %v2602_v58 = vadd.f32 1.0, %v2969_v5  ;;  %v1486_v12 = vadd.f32 0.0036580483, %v1485_v21  ;;  %v1497_v42 = vadd.f32 0.014752088, %v1496_v16  ;;  %v1521_v51 = vmul.f32 %v3596_v62, %v3596_v62  ;;  %vm1431_vm14 = vmor %vm1429_vm9, %vm1430_vm10 }
  0x7d   : > { %v2633_v45 = vmul.f32 %v2601_v29, %v3417_v49  ;;  %v1426_v7 = vsub.f32 1.0, %v1425_v34  ;;  %vm1469_vm12 = vweird.f32 %v3576_v60  ;;  %v551_v28 = vadd.f32 %v519_v55, %v422_v53 }
  0x7e   : > { %v2634_v54 = vmul.f32 %v2602_v58, %v3431_v59  ;;  %v616_v49 = vmul.f32 %v3368_v52, %v3248_v11  ;;  %v3039_v61 = vpop.eup %3038  ;;  %v1487_v14 = vmul.f32 %v1486_v12, %v3554_v43  ;;  %v1498_v4 = vmul.f32 %v1497_v42, %v3554_v43 }
  0x7f   : > { %v2669_v44 = vmul.f32 %v3589_v37, %v2633_v45  ;;  %v3621_v22 = vmin.f32 %v1521_v51, 16.0  ;;  %v1427_v59 = vmul.f32 %v3037_v36, %v1426_v7  ;;  %v1465_v32 = vmul.f32 %v3039_v61, %v3576_v60 }
  0x80   : > { %v2670_v9 = vmul.f32 %v3589_v37, %v2634_v54  ;;  %vm1470_vm13 = vweird.f32 %v3039_v61  ;;  %v1488_v25 = vadd.f32 0.05243302, %v1487_v14  ;;  %v1499_v5 = vadd.f32 0.112945676, %v1498_v4 }
  0x81   : > { %v2705_v53 = vadd.f32 %v3610_v0, %v2669_v44  ;;  %v1523_v52 = vmul.f32 2.1237322e-06, %v3621_v22  ;;  %v1428_v16 = vadd.f32 %v3037_v36, %v1427_v59  ;;  %v1466_v29 = vsub.f32 1.0, %v1465_v32  ;;  %vm1471_vm15 = vmor %vm1469_vm12, %vm1470_vm13 }
  0x82   : > { %v2706_v21 = vadd.f32 %v3610_v0, %v2670_v9  ;;  %v1534_v55 = vmul.f32 3.8918573e-05, %v3621_v22  ;;  %v1489_v34 = vmul.f32 %v1488_v25, %v3554_v43  ;;  %v1500_v45 = vmul.f32 %v1499_v5, %v3554_v43 }
  0x83   : > { %v2769_v58 = vadd.f32 %v2705_v53, %v3226_v1  ;;  %v1524_v12 = vadd.f32 0.00028619796, %v1523_v52  ;;  %v1432_v51 = vsel %vm1431_vm14, %v3037_v36, %v1428_v16  ;;  %v1467_v54 = vmul.f32 %v3039_v61, %v1466_v29 }
  0x84   : > { %v2770_v42 = vadd.f32 %v2706_v21, %v3230_v2  ;;  %v1535_v7 = vadd.f32 0.001143296, %v1534_v55  ;;  %v1437_v44 = vsel %vm3601_vm11, %v1436_v20, %v1432_v51  ;;  %v1490_v1 = vadd.f32 0.18741608, %v1489_v34  ;;  %v3671_v34 = vld [vmem:[#allocation2 + $0xa7] sm:$0xff] }
  0x85   : > { %2801 = vst.msk [vmem:[%s3632_s7] sm:$0xff] %vm274_vm0, %v2769_v58  ;;  %v1501_v14 = vadd.f32 0.4994258, %v1500_v45  ;;  %v1525_v19 = vmul.f32 %v1524_v12, %v3621_v22  ;;  %v1438_v4 = vmul.f32 %v1437_v44, %v1413_v35  ;;  %v1468_v9 = vadd.f32 %v3039_v61, %v1467_v54 }
  0x86   : > { %2802 = vst.msk [vmem:[%s3632_s7 + $0x8] sm:$0xff] %vm274_vm0, %v2770_v42  ;;  %v1536_v59 = vmul.f32 %v1535_v7, %v3621_v22  ;;  %v648_v32 = vadd.f32 %v616_v49, %v551_v28  ;;  %vm1474_vm1 = vcmp.eq.f32.partialorder %v1473_v31, 8.507059e+37  ;;  %v1476_v2 = vor.u32 1.1754944e-38, %v1475_v17  ;;  %v3675_v42 = vld [vmem:[#allocation2 + $0xa8] sm:$0xff] }
  0x87   : > { %v1502_v36 = vmul.f32 %v1501_v14, %v3554_v43  ;;  %v1526_v20 = vadd.f32 0.0036580483, %v1525_v19  ;;  %v2970_v57 = vclamps-f32 %v1438_v4, 1.0  ;;  %v1472_v53 = vsel %vm1471_vm15, %v3039_v61, %v1468_v9  ;;  %v3684_v19 = vld [vmem:[#allocation2 + $0xa9] sm:$0xff] }
  0x88   : > { %v1537_v25 = vadd.f32 0.014752088, %v1536_v59  ;;  %v713_v5 = vmul.f32 %v3428_v63, %v3272_v26  ;;  %v1477_v35 = vsel %vm1474_vm1, %v1476_v2, %v1472_v53  ;;  %v1491_v52 = vmul.f32 %v1490_v1, %v3554_v43 }
  0x89   : > { %v3658_v21 = vadd.f32 1.0, %v1502_v36  ;;  %v1527_v28 = vmul.f32 %v1526_v20, %v3621_v22  ;;  %v2603_v60 = vadd.f32 1.0, %v2970_v57  ;;  %v1478_v31 = vmul.f32 %v1477_v35, %v3583_v27 }
  0x8a   : > { %v1538_v17 = vmul.f32 %v1537_v25, %v3621_v22  ;;  %v745_v49 = vadd.f32 %v713_v5, %v648_v32  ;;  %v1260_v16 = vmul.f32 0.5, %v3443_v56  ;;  %v810_v61 = vmul.f32 %v3436_v15, %v3281_v33 }
  0x8b   : > { %3040 = vrcp.f32 %v3658_v21  ;;  %v2635_v29 = vmul.f32 %v2603_v60, %v3508_v50  ;;  %v2971_v43 = vclamps-f32 %v1478_v31, 1.0  ;;  %v3669_v55 = vmul.f32 0.5, %v3511_v41 }
  0x8c   : > { %v1528_v58 = vadd.f32 0.05243302, %v1527_v28  ;;  %v1492_v27 = vadd.f32 1.1283791, %v1491_v52  ;;  %v1539_v45 = vadd.f32 0.112945676, %v1538_v17  ;;  %v842_v12 = vadd.f32 %v810_v61, %v745_v49 }
  0x8d   : > { %v907_v56 = vmul.f32 %v3461_v38, %v3288_v40  ;;  %v2671_v51 = vmul.f32 %v3589_v37, %v2635_v29  ;;  %v2604_v54 = vadd.f32 1.0, %v2971_v43  ;;  %v1513_v50 = vand.u32 2147483647, %v3658_v21 }
  0x8e   : > { %v1529_v7 = vmul.f32 %v1528_v58, %v3621_v22  ;;  %v1515_v41 = vand.u32 2147483648, %v3658_v21  ;;  %v1540_v44 = vmul.f32 %v1539_v45, %v3621_v22  ;;  %v1005_v14 = vmul.f32 %v3293_v46, %v3671_v34 }
  0x8f   : > { %v939_v1 = vadd.f32 %v907_v56, %v842_v12  ;;  %v2707_v4 = vadd.f32 %v3610_v0, %v2671_v51  ;;  %v2636_v9 = vmul.f32 %v2604_v54, %v1260_v16  ;;  %v1102_v32 = vmul.f32 %v3295_v47, %v3675_v42  ;;  %v3719_v12 = vld [vmem:[#allocation2 + $0xaf] sm:$0xff] }
  0x90   : > { %v1530_v59 = vadd.f32 0.18741608, %v1529_v7  ;;  %v1541_v36 = vadd.f32 0.4994258, %v1540_v44  ;;  %v423_v57 = vmul.f32 %v3378_v18, %v3239_v6  ;;  %v520_v53 = vmul.f32 %v3386_v23, %v3241_v8  ;;  %v3721_v56 = vld [vmem:[#allocation2 + $0xb0] sm:$0xff] }
  0x91   : > { %v3041_v2 = vpop.eup %3040  ;;  %v1037_v20 = vadd.f32 %v1005_v14, %v939_v1  ;;  %v2771_v25 = vadd.f32 %v2707_v4, %v3233_v3  ;;  %v2672_v5 = vmul.f32 %v3589_v37, %v2636_v9  ;;  %v1199_v52 = vmul.f32 %v3300_v48, %v3684_v19  ;;  %v3739_v4 = vld [vmem:[#allocation2 + $0xb1] sm:$0xff] }
  0x92   : > { %v1505_v35 = vmul.f32 %v3041_v2, %v3658_v21  ;;  %v1531_v28 = vmul.f32 %v1530_v59, %v3621_v22  ;;  %v1542_v60 = vmul.f32 %v1541_v36, %v3621_v22  ;;  %v552_v17 = vadd.f32 %v520_v53, %v423_v57 }
  0x93   : > { %v1134_v31 = vadd.f32 %v1102_v32, %v1037_v20  ;;  %2803 = vst.msk [vmem:[%s3632_s7 + $0x10] sm:$0xff] %vm274_vm0, %v2771_v25  ;;  %v2708_v18 = vadd.f32 %v3610_v0, %v2672_v5  ;;  %v1493_v23 = vmul.f32 %v1492_v27, %v3529_v30  ;;  %v617_v49 = vmul.f32 %v3388_v24, %v3248_v11  ;;  %v5387_v24 = vld [vmem:[#allocation5_spill] sm:$0xff] }
  0x94   : > { %v1506_v3 = vsub.f32 1.0, %v1505_v35  ;;  %vm1509_vm2 = vweird.f32 %v3658_v21  ;;  %v1532_v16 = vadd.f32 1.1283791, %v1531_v28  ;;  %v3707_v61 = vadd.f32 1.0, %v1542_v60 }
  0x95   : > { %v3709_v29 = vadd.f32 %v1199_v52, %v1134_v31  ;;  %v2772_v22 = vadd.f32 %v2708_v18, %v3246_v10  ;;  %vm1510_vm3 = vweird.f32 %v3041_v2  ;;  %v649_v58 = vadd.f32 %v617_v49, %v552_v17 }
  0x96   : > { %v1507_v43 = vmul.f32 %v3041_v2, %v1506_v3  ;;  %vm3712_vm4 = vcmp.eq.f32.partialorder %v1513_v50, 8.507059e+37  ;;  %v1516_v30 = vor.u32 1.1754944e-38, %v1515_v41  ;;  %3042 = vrcp.f32 %v3707_v61  ;;  %v5388_v50 = vld [vmem:[#allocation6_spill] sm:$0xff]  ;;  %vm1511_vm5 = vmor %vm1509_vm2, %vm1510_vm3 }
  0x97   : > { %v714_v27 = vmul.f32 %v5387_v24, %v3272_v26  ;;  %2804 = vst.msk [vmem:[%s3632_s7 + $0x18] sm:$0xff] %vm274_vm0, %v2772_v22  ;;  %v1555_v51 = vand.u32 2147483648, %v3707_v61  ;;  %v3727_v54 = vmul.f32 0.70710677, %v3709_v29  ;;  %v811_v7 = vmul.f32 %v5388_v50, %v3281_v33 }
  0x98   : > { %v1508_v10 = vadd.f32 %v3041_v2, %v1507_v43  ;;  %v3734_v41 = vmul.f32 %v1532_v16, %v3596_v62  ;;  %v1553_v44 = vand.u32 2147483647, %v3707_v61  ;;  %v908_v14 = vmul.f32 %v3550_v13, %v3288_v40 }
  0x99   : > { %v746_v1 = vadd.f32 %v714_v27, %v649_v58  ;;  %v1561_v59 = vmul.f32 %v3727_v54, %v3727_v54  ;;  %v1006_v32 = vmul.f32 %v3293_v46, %v3719_v12  ;;  %v1103_v21 = vmul.f32 %v3295_v47, %v3721_v56 }
  0x9a   : > { %v1512_v9 = vsel %vm1511_vm5, %v3041_v2, %v1508_v10  ;;  %v424_v20 = vmul.f32 %v3428_v63, %v3239_v6  ;;  %v521_v57 = vmul.f32 %v3436_v15, %v3241_v8  ;;  %vm1549_vm6 = vweird.f32 %v3707_v61 }
  0x9b   : > { %v1517_v62 = vsel %vm3712_vm4, %v1516_v30, %v1512_v9  ;;  %v843_v36 = vadd.f32 %v811_v7, %v746_v1  ;;  %v1556_v53 = vor.u32 1.1754944e-38, %v1555_v51  ;;  %v3754_v25 = vmin.f32 %v1561_v59, 16.0  ;;  %v3777_v51 = vld [vmem:[#allocation2 + $0xc8] sm:$0xff] }
  0x9c   : > { %v1518_v2 = vmul.f32 %v1517_v62, %v1493_v23  ;;  %v1200_v5 = vmul.f32 %v3300_v48, %v3739_v4  ;;  %v3043_v35 = vpop.eup %3042  ;;  %v553_v28 = vadd.f32 %v521_v57, %v424_v20  ;;  %v618_v60 = vmul.f32 %v3461_v38, %v3248_v11  ;;  %v3770_v23 = vld [vmem:[#allocation2 + $0xc7] sm:$0xff] }
  0x9d   : > { %v940_v52 = vadd.f32 %v908_v14, %v843_v36  ;;  %v715_v63 = vmul.f32 %v3671_v34, %v3272_v26  ;;  %v1545_v15 = vmul.f32 %v3043_v35, %v3707_v61  ;;  %vm3763_vm7 = vcmp.eq.f32.partialorder %v1553_v44, 8.507059e+37 }
  0x9e   : > { %v2972_v31 = vclamps-f32 %v1518_v2, 1.0  ;;  %v1563_v18 = vmul.f32 2.1237322e-06, %v3754_v25  ;;  %v812_v48 = vmul.f32 %v3675_v42, %v3281_v33  ;;  %v1574_v3 = vmul.f32 3.8918573e-05, %v3754_v25 }
  0x9f   : > { %v1038_v38 = vadd.f32 %v1006_v32, %v940_v52  ;;  %v650_v49 = vadd.f32 %v618_v60, %v553_v28  ;;  %v909_v16 = vmul.f32 %v3684_v19, %v3288_v40  ;;  %v1546_v43 = vsub.f32 1.0, %v1545_v15  ;;  %v3798_v60 = vld [vmem:[#allocation2 + $0xc9] sm:$0xff] }
  0xa0   : > { %v2605_v22 = vadd.f32 1.0, %v2972_v31  ;;  %vm1550_vm8 = vweird.f32 %v3043_v35  ;;  %v1564_v58 = vadd.f32 0.00028619796, %v1563_v18  ;;  %v1575_v45 = vadd.f32 0.001143296, %v1574_v3 }
  0xa1   : > { %v1135_v30 = vadd.f32 %v1103_v21, %v1038_v38  ;;  %v747_v27 = vadd.f32 %v715_v63, %v650_v49  ;;  %v1007_v10 = vmul.f32 %v3293_v46, %v3770_v23  ;;  %v1547_v44 = vmul.f32 %v3043_v35, %v1546_v43  ;;  %vm1551_vm9 = vmor %vm1549_vm6, %vm1550_vm8 }
  0xa2   : > { %v2637_v7 = vmul.f32 %v2605_v22, %v3669_v55  ;;  %v1565_v1 = vmul.f32 %v1564_v58, %v3754_v25  ;;  %v425_v14 = vmul.f32 %v5387_v24, %v3239_v6  ;;  %v1576_v9 = vmul.f32 %v1575_v45, %v3754_v25 }
  0xa3   : > { %v1232_v59 = vadd.f32 %v1200_v5, %v1135_v30  ;;  %v844_v32 = vadd.f32 %v812_v48, %v747_v27  ;;  %v522_v21 = vmul.f32 %v5388_v50, %v3241_v8  ;;  %v1548_v36 = vadd.f32 %v3043_v35, %v1547_v44  ;;  %v5391_v48 = vld [vmem:[#allocation3_spill] sm:$0xff] }
  0xa4   : > { %v2673_v62 = vmul.f32 %v3589_v37, %v2637_v7  ;;  %v1566_v20 = vadd.f32 0.0036580483, %v1565_v1  ;;  %v1104_v55 = vmul.f32 %v3295_v47, %v3777_v51  ;;  %v1577_v57 = vadd.f32 0.014752088, %v1576_v9 }
  0xa5   : > { %v3792_v24 = vmul.f32 0.70710677, %v1232_v59  ;;  %v941_v2 = vadd.f32 %v909_v16, %v844_v32  ;;  %v619_v5 = vmul.f32 %v3550_v13, %v3248_v11  ;;  %v1552_v52 = vsel %vm1551_vm9, %v3043_v35, %v1548_v36 }
  0xa6   : > { %v2709_v50 = vadd.f32 %v3610_v0, %v2673_v62  ;;  %v1567_v28 = vmul.f32 %v1566_v20, %v3754_v25  ;;  %v554_v63 = vadd.f32 %v522_v21, %v425_v14  ;;  %v1557_v61 = vsel %vm3763_vm7, %v1556_v53, %v1552_v52  ;;  %v3812_v53 = vld [vmem:[%s5365_s1 + $0x8] ss:$0 sm:$0xff] }
  0xa7   : > { %v1578_v31 = vmul.f32 %v1577_v57, %v3754_v25  ;;  %v1601_v15 = vmul.f32 %v3792_v24, %v3792_v24  ;;  %v1039_v18 = vadd.f32 %v1007_v10, %v941_v2  ;;  %v1558_v3 = vmul.f32 %v1557_v61, %v3734_v41 }
  0xa8   : > { %v2773_v13 = vadd.f32 %v2709_v50, %v5391_v48  ;;  %v1568_v35 = vadd.f32 0.05243302, %v1567_v28  ;;  %v651_v38 = vadd.f32 %v619_v5, %v554_v63  ;;  %v1201_v17 = vmul.f32 %v3812_v53, %v3798_v60  ;;  %v3838_v63 = vld [vmem:[#allocation2 + $0xcf] sm:$0xff] }
  0xa9   : > { %v1579_v49 = vadd.f32 0.112945676, %v1578_v31  ;;  %v3807_v16 = vmin.f32 %v1601_v15, 16.0  ;;  %v1136_v22 = vadd.f32 %v1104_v55, %v1039_v18  ;;  %v2973_v43 = vclamps-f32 %v1558_v3, 1.0 }
  0xaa   : > { %2805 = vst.msk [vmem:[%s3632_s7 + $0x20] sm:$0xff] %vm274_vm0, %v2773_v13  ;;  %v1569_v58 = vmul.f32 %v1568_v35, %v3754_v25  ;;  %v716_v41 = vmul.f32 %v3719_v12, %v3272_v26  ;;  %v1262_v7 = vmul.f32 0.5, %v3578_v39  ;;  %v813_v62 = vmul.f32 %v3721_v56, %v3281_v33  ;;  %v3850_v35 = vld [vmem:[#allocation2 + $0xd0] sm:$0xff] }
  0xab   : > { %v1580_v45 = vmul.f32 %v1579_v49, %v3754_v25  ;;  %v1603_v30 = vmul.f32 2.1237322e-06, %v3807_v16  ;;  %v1614_v27 = vmul.f32 3.8918573e-05, %v3807_v16  ;;  %v1233_v10 = vadd.f32 %v1201_v17, %v1136_v22  ;;  %v3855_v22 = vld [vmem:[#allocation2 + $0xd1] sm:$0xff] }
  0xac   : > { %v2606_v44 = vadd.f32 1.0, %v2973_v43  ;;  %v1570_v1 = vadd.f32 0.18741608, %v1569_v58  ;;  %v748_v14 = vadd.f32 %v716_v41, %v651_v38  ;;  %v910_v57 = vmul.f32 %v3739_v4, %v3288_v40 }
  0xad   : > { %v1581_v9 = vadd.f32 0.4994258, %v1580_v45  ;;  %v1604_v32 = vadd.f32 0.00028619796, %v1603_v30  ;;  %v1615_v21 = vadd.f32 0.001143296, %v1614_v27  ;;  %v1008_v49 = vmul.f32 %v3293_v46, %v3838_v63 }
  0xae   : > { %v2638_v36 = vmul.f32 %v2606_v44, %v1262_v7  ;;  %v1571_v20 = vmul.f32 %v1570_v1, %v3754_v25  ;;  %v3828_v55 = vmul.f32 0.70710677, %v1233_v10  ;;  %v845_v50 = vadd.f32 %v813_v62, %v748_v14 }
  0xaf   : > { %v1582_v2 = vmul.f32 %v1581_v9, %v3754_v25  ;;  %v1605_v39 = vmul.f32 %v1604_v32, %v3807_v16  ;;  %v1616_v5 = vmul.f32 %v1615_v21, %v3807_v16  ;;  %v3844_v25 = vmul.f32 0.5, %v3709_v29  ;;  %v5392_v29 = vld [vmem:[#allocation4_spill] sm:$0xff] }
  0xb0   : > { %v2674_v52 = vmul.f32 %v3589_v37, %v2638_v36  ;;  %v1641_v28 = vmul.f32 %v3828_v55, %v3828_v55  ;;  %v942_v18 = vadd.f32 %v910_v57, %v845_v50  ;;  %v3846_v13 = vmul.f32 0.5, %v1232_v59 }
  0xb1   : > { %v3840_v61 = vadd.f32 1.0, %v1582_v2  ;;  %v1606_v31 = vadd.f32 0.0036580483, %v1605_v39  ;;  %v1617_v15 = vadd.f32 0.014752088, %v1616_v5  ;;  %v426_v17 = vmul.f32 %v3671_v34, %v3239_v6 }
  0xb2   : > { %v2710_v48 = vadd.f32 %v3610_v0, %v2674_v52  ;;  %v3848_v3 = vmin.f32 %v1641_v28, 16.0  ;;  %v1572_v38 = vadd.f32 1.1283791, %v1571_v20  ;;  %v3863_v45 = vmul.f32 0.5, %v1233_v10 }
  0xb3   : > { %3044 = vrcp.f32 %v3840_v61  ;;  %v1607_v59 = vmul.f32 %v1606_v31, %v3807_v16  ;;  %v1618_v58 = vmul.f32 %v1617_v15, %v3807_v16  ;;  %v1040_v27 = vadd.f32 %v1008_v49, %v942_v18 }
  0xb4   : > { %v2774_v43 = vadd.f32 %v2710_v48, %v5392_v29  ;;  %v1643_v41 = vmul.f32 2.1237322e-06, %v3848_v3  ;;  %v1654_v30 = vmul.f32 3.8918573e-05, %v3848_v3  ;;  %v1105_v7 = vmul.f32 %v3295_v47, %v3850_v35 }
  0xb5   : > { %v1608_v44 = vadd.f32 0.05243302, %v1607_v59  ;;  %v1619_v34 = vadd.f32 0.112945676, %v1618_v58  ;;  %v1202_v1 = vmul.f32 %v3812_v53, %v3855_v22  ;;  %v523_v14 = vmul.f32 %v3675_v42, %v3241_v8 }
  0xb6   : > { %2806 = vst.msk [vmem:[%s3632_s7 + $0x28] sm:$0xff] %vm274_vm0, %v2774_v43  ;;  %v1573_v9 = vmul.f32 %v1572_v38, %v3727_v54  ;;  %v1644_v10 = vadd.f32 0.00028619796, %v1643_v41  ;;  %v1655_v32 = vadd.f32 0.001143296, %v1654_v30  ;;  %v1137_v21 = vadd.f32 %v1105_v7, %v1040_v27 }
  0xb7   : > { %vm1589_vm10 = vweird.f32 %v3840_v61  ;;  %v1593_v62 = vand.u32 2147483647, %v3840_v61  ;;  %v1609_v36 = vmul.f32 %v1608_v44, %v3807_v16  ;;  %v1620_v20 = vmul.f32 %v1619_v34, %v3807_v16  ;;  %v3902_v44 = vld [vmem:[#allocation2 + $0xe7] sm:$0xff] }
  0xb8   : > { %v555_v57 = vadd.f32 %v523_v14, %v426_v17  ;;  %v1645_v39 = vmul.f32 %v1644_v10, %v3848_v3  ;;  %v1656_v5 = vmul.f32 %v1655_v32, %v3848_v3  ;;  %v3881_v42 = vadd.f32 %v1202_v1, %v1137_v21 }
  0xb9   : > { %v3045_v2 = vpop.eup %3044  ;;  %v620_v54 = vmul.f32 %v3684_v19, %v3248_v11  ;;  %v1595_v52 = vand.u32 2147483648, %v3840_v61  ;;  %v1610_v28 = vadd.f32 0.18741608, %v1609_v36  ;;  %v1621_v31 = vadd.f32 0.4994258, %v1620_v20 }
  0xba   : > { %v1585_v50 = vmul.f32 %v3045_v2, %v3840_v61  ;;  %v1646_v15 = vadd.f32 0.0036580483, %v1645_v39  ;;  %v1657_v18 = vadd.f32 0.014752088, %v1656_v5  ;;  %v717_v38 = vmul.f32 %v3770_v23, %v3272_v26 }
  0xbb   : > { %v652_v48 = vadd.f32 %v620_v54, %v555_v57  ;;  %v1611_v17 = vmul.f32 %v1610_v28, %v3807_v16  ;;  %v1622_v29 = vmul.f32 %v1621_v31, %v3807_v16  ;;  %v3892_v43 = vmul.f32 0.70710677, %v3881_v42  ;;  %v3904_v16 = vld [vmem:[#allocation2 + $0xe8] sm:$0xff] }
  0xbc   : > { %v1586_v49 = vsub.f32 1.0, %v1585_v50  ;;  %v1647_v19 = vmul.f32 %v1646_v15, %v3848_v3  ;;  %v1658_v59 = vmul.f32 %v1657_v18, %v3848_v3  ;;  %v814_v41 = vmul.f32 %v3777_v51, %v3281_v33  ;;  %v3919_v28 = vld [vmem:[#allocation2 + $0xe9] sm:$0xff] }
  0xbd   : > { %v749_v58 = vadd.f32 %v717_v38, %v652_v48  ;;  %vm1590_vm11 = vweird.f32 %v3045_v2  ;;  %v3898_v27 = vadd.f32 1.0, %v1622_v29  ;;  %v1681_v7 = vmul.f32 %v3892_v43, %v3892_v43 }
  0xbe   : > { %v1587_v30 = vmul.f32 %v3045_v2, %v1586_v49  ;;  %v1612_v34 = vadd.f32 1.1283791, %v1611_v17  ;;  %v1648_v1 = vadd.f32 0.05243302, %v1647_v19  ;;  %v1659_v14 = vadd.f32 0.112945676, %v1658_v59  ;;  %vm1591_vm13 = vmor %vm1589_vm10, %vm1590_vm11 }
  0xbf   : > { %v846_v10 = vadd.f32 %v814_v41, %v749_v58  ;;  %vm1594_vm12 = vcmp.eq.f32.partialorder %v1593_v62, 8.507059e+37  ;;  %3046 = vrcp.f32 %v3898_v27  ;;  %v911_v21 = vmul.f32 %v3798_v60, %v3288_v40 }
  0xc0   : > { %v1588_v32 = vadd.f32 %v3045_v2, %v1587_v30  ;;  %v1596_v36 = vor.u32 1.1754944e-38, %v1595_v52  ;;  %v1649_v20 = vmul.f32 %v1648_v1, %v3848_v3  ;;  %v1660_v57 = vmul.f32 %v1659_v14, %v3848_v3 }
  0xc1   : > { %v1009_v39 = vmul.f32 %v3293_v46, %v3902_v44  ;;  %v3915_v54 = vmin.f32 %v1681_v7, 16.0  ;;  %v943_v62 = vadd.f32 %v911_v21, %v846_v10  ;;  %v1106_v50 = vmul.f32 %v3295_v47, %v3904_v16 }
  0xc2   : > { %v1592_v5 = vsel %vm1591_vm13, %v3045_v2, %v1588_v32  ;;  %v1613_v61 = vmul.f32 %v1612_v34, %v3792_v24  ;;  %v1633_v52 = vand.u32 2147483647, %v3898_v27  ;;  %v1650_v15 = vadd.f32 0.18741608, %v1649_v20 }
  0xc3   : > { %v1597_v31 = vsel %vm1594_vm12, %v1596_v36, %v1592_v5  ;;  %v1661_v48 = vadd.f32 0.4994258, %v1660_v57  ;;  %v1683_v38 = vmul.f32 2.1237322e-06, %v3915_v54  ;;  %v1694_v2 = vmul.f32 3.8918573e-05, %v3915_v54 }
  0xc4   : > { %v1598_v18 = vmul.f32 %v1597_v31, %v1573_v9  ;;  %v1635_v49 = vand.u32 2147483648, %v3898_v27  ;;  %v1651_v17 = vmul.f32 %v1650_v15, %v3848_v3  ;;  %v1041_v29 = vadd.f32 %v1009_v39, %v943_v62 }
  0xc5   : > { %v1203_v19 = vmul.f32 %v3812_v53, %v3919_v28  ;;  %v3047_v59 = vpop.eup %3046  ;;  %v1662_v24 = vmul.f32 %v1661_v48, %v3848_v3  ;;  %v1684_v41 = vadd.f32 0.00028619796, %v1683_v38  ;;  %v1695_v30 = vadd.f32 0.001143296, %v1694_v2  ;;  %v3982_v3 = vld [vmem:[#allocation2 + $0xef] sm:$0xff] }
  0xc6   : > { %v2974_v58 = vclamps-f32 %v1598_v18, 1.0  ;;  %v1625_v9 = vmul.f32 %v3047_v59, %v3898_v27  ;;  %v1138_v7 = vadd.f32 %v1106_v50, %v1041_v29  ;;  %v427_v34 = vmul.f32 %v3719_v12, %v3239_v6  ;;  %v2743_v18 = vld [vmem:[%s3220_s22 + $0x30] sm:$0xff] }
  0xc7   : > { %v524_v1 = vmul.f32 %v3721_v56, %v3241_v8  ;;  %v3935_v10 = vadd.f32 1.0, %v1662_v24  ;;  %v1685_v32 = vmul.f32 %v1684_v41, %v3915_v54  ;;  %v1696_v21 = vmul.f32 %v1695_v30, %v3915_v54 }
  0xc8   : > { %v2607_v14 = vadd.f32 1.0, %v2974_v58  ;;  %v1626_v36 = vsub.f32 1.0, %v1625_v9  ;;  %vm1629_vm14 = vweird.f32 %v3898_v27  ;;  %vm3940_vm15 = vcmp.eq.f32.partialorder %v1633_v52, 8.507059e+37 }
  0xc9   : > { %v3944_v20 = vadd.f32 %v1203_v19, %v1138_v7  ;;  %vm1630_vm1 = vweird.f32 %v3047_v59  ;;  %v1636_v56 = vor.u32 1.1754944e-38, %v1635_v49  ;;  %3048 = vrcp.f32 %v3935_v10 }
  0xca   : > { %v2639_v12 = vmul.f32 %v2607_v14, %v3844_v25  ;;  %v1627_v57 = vmul.f32 %v3047_v59, %v1626_v36  ;;  %v3948_v39 = vadd.f32 1.1283791, %v1651_v17  ;;  %v1686_v5 = vadd.f32 0.0036580483, %v1685_v32  ;;  %vm1631_vm2 = vmor %vm1629_vm14, %vm1630_vm1 }
  0xcb   : > { %v1697_v62 = vadd.f32 0.014752088, %v1696_v21  ;;  %v1673_v31 = vand.u32 2147483647, %v3935_v10  ;;  %v3953_v52 = vmul.f32 0.70710677, %v3944_v20  ;;  %v556_v15 = vadd.f32 %v524_v1, %v427_v34 }
  0xcc   : > { %v2675_v50 = vmul.f32 %v3589_v37, %v2639_v12  ;;  %v1628_v48 = vadd.f32 %v3047_v59, %v1627_v57  ;;  %v1675_v25 = vand.u32 2147483648, %v3935_v10  ;;  %v1687_v38 = vmul.f32 %v1686_v5, %v3915_v54 }
  0xcd   : > { %v1698_v2 = vmul.f32 %v1697_v62, %v3915_v54  ;;  %v1721_v17 = vmul.f32 %v3953_v52, %v3953_v52  ;;  %v621_v29 = vmul.f32 %v3739_v4, %v3248_v11  ;;  %v718_v19 = vmul.f32 %v3838_v63, %v3272_v26 }
  0xce   : > { %v2711_v49 = vadd.f32 %v3610_v0, %v2675_v50  ;;  %v1632_v58 = vsel %vm1631_vm2, %v3047_v59, %v1628_v48  ;;  %v1688_v24 = vadd.f32 0.05243302, %v1687_v38  ;;  %v815_v30 = vmul.f32 %v3850_v35, %v3281_v33 }
  0xcf   : > { %v1699_v41 = vadd.f32 0.112945676, %v1698_v2  ;;  %v3049_v9 = vpop.eup %3048  ;;  %v1637_v27 = vsel %vm3940_vm15, %v1636_v56, %v1632_v58  ;;  %v3973_v34 = vmin.f32 %v1721_v17, 16.0  ;;  %v653_v1 = vadd.f32 %v621_v29, %v556_v15 }
  0xd0   : > { %v2775_v7 = vadd.f32 %v2743_v18, %v2711_v49  ;;  %v1638_v14 = vmul.f32 %v1637_v27, %v1613_v61  ;;  %v1665_v4 = vmul.f32 %v3049_v9, %v3935_v10  ;;  %vm1670_vm3 = vweird.f32 %v3049_v9 }
  0xd1   : > { %v1689_v32 = vmul.f32 %v1688_v24, %v3915_v54  ;;  %v1700_v59 = vmul.f32 %v1699_v41, %v3915_v54  ;;  %v1723_v21 = vmul.f32 2.1237322e-06, %v3973_v34  ;;  %v1734_v36 = vmul.f32 3.8918573e-05, %v3973_v34 }
  0xd2   : > { %2807 = vst.msk [vmem:[%s3632_s7 + $0x30] sm:$0xff] %vm274_vm0, %v2775_v7  ;;  %v750_v12 = vadd.f32 %v718_v19, %v653_v1  ;;  %v2975_v56 = vclamps-f32 %v1638_v14, 1.0  ;;  %v1666_v57 = vsub.f32 1.0, %v1665_v4  ;;  %v912_v61 = vmul.f32 %v3855_v22, %v3288_v40  ;;  %v3994_v7 = vld [vmem:[#allocation2 + $0xf0] sm:$0xff] }
  0xd3   : > { %v1690_v5 = vadd.f32 0.18741608, %v1689_v32  ;;  %v1701_v62 = vadd.f32 0.4994258, %v1700_v59  ;;  %v1724_v50 = vadd.f32 0.00028619796, %v1723_v21  ;;  %v1010_v49 = vmul.f32 %v3293_v46, %v3982_v3 }
  0xd4   : > { %v1735_v15 = vadd.f32 0.001143296, %v1734_v36  ;;  %v847_v18 = vadd.f32 %v815_v30, %v750_v12  ;;  %v2608_v48 = vadd.f32 1.0, %v2975_v56  ;;  %v1667_v38 = vmul.f32 %v3049_v9, %v1666_v57 }
  0xd5   : > { %v1691_v2 = vmul.f32 %v1690_v5, %v3915_v54  ;;  %v1702_v17 = vmul.f32 %v1701_v62, %v3915_v54  ;;  %v1725_v29 = vmul.f32 %v1724_v50, %v3973_v34  ;;  %vm1669_vm4 = vweird.f32 %v3935_v10  ;;  %v2744_v10 = vld [vmem:[%s3220_s22 + $0x38] sm:$0xff] }
  0xd6   : > { %v1736_v19 = vmul.f32 %v1735_v15, %v3973_v34  ;;  %v944_v58 = vadd.f32 %v912_v61, %v847_v18  ;;  %v2640_v24 = vmul.f32 %v2608_v48, %v3846_v13  ;;  %v1668_v41 = vadd.f32 %v3049_v9, %v1667_v38  ;;  %vm1671_vm5 = vmor %vm1669_vm4, %vm1670_vm3  ;;  %v4002_v13 = vld [vmem:[#allocation2 + $0xf1] sm:$0xff] }
  0xd7   : > { %v1676_v30 = vor.u32 1.1754944e-38, %v1675_v25  ;;  %v3997_v27 = vadd.f32 1.0, %v1702_v17  ;;  %v1726_v1 = vadd.f32 0.0036580483, %v1725_v29  ;;  %v1653_v32 = vmul.f32 %v3948_v39, %v3828_v55 }
  0xd8   : > { %v1737_v54 = vadd.f32 0.014752088, %v1736_v19  ;;  %v1042_v14 = vadd.f32 %v1010_v49, %v944_v58  ;;  %v2676_v4 = vmul.f32 %v3589_v37, %v2640_v24  ;;  %v1672_v59 = vsel %vm1671_vm5, %v3049_v9, %v1668_v41 }
  0xd9   : > { %vm1674_vm6 = vcmp.eq.f32.partialorder %v1673_v31, 8.507059e+37  ;;  %v1692_v21 = vadd.f32 1.1283791, %v1691_v2  ;;  %3050 = vrcp.f32 %v3997_v27  ;;  %v1107_v36 = vmul.f32 %v3295_v47, %v3994_v7 }
  0xda   : > { %v1677_v25 = vsel %vm1674_vm6, %v1676_v30, %v1672_v59  ;;  %v2712_v12 = vadd.f32 %v3610_v0, %v2676_v4  ;;  %v4010_v57 = vmul.f32 0.5, %v3881_v42  ;;  %v1727_v55 = vmul.f32 %v1726_v1, %v3973_v34 }
  0xdb   : > { %v1678_v56 = vmul.f32 %v1677_v25, %v1653_v32  ;;  %v1738_v39 = vmul.f32 %v1737_v54, %v3973_v34  ;;  %v1139_v31 = vadd.f32 %v1107_v36, %v1042_v14  ;;  %v1204_v9 = vmul.f32 %v3812_v53, %v4002_v13 }
  0xdc   : > { %v428_v5 = vmul.f32 %v3770_v23, %v3239_v6  ;;  %v2776_v61 = vadd.f32 %v2744_v10, %v2712_v12  ;;  %v1713_v50 = vand.u32 2147483647, %v3997_v27  ;;  %v1728_v15 = vadd.f32 0.05243302, %v1727_v55  ;;  %v2745_v10 = vld [vmem:[%s3220_s22 + $0x40] sm:$0xff]  ;;  %v4055_v55 = vld [vmem:[#allocation2 + $0x108] sm:$0xff] }
  0xdd   : > { %v2976_v62 = vclamps-f32 %v1678_v56, 1.0  ;;  %v1693_v18 = vmul.f32 %v1692_v21, %v3892_v43  ;;  %v1739_v42 = vadd.f32 0.112945676, %v1738_v39  ;;  %v4020_v48 = vadd.f32 %v1204_v9, %v1139_v31  ;;  %v4053_v56 = vld [vmem:[#allocation2 + $0x107] sm:$0xff] }
  0xde   : > { %v525_v38 = vmul.f32 %v3777_v51, %v3241_v8  ;;  %2808 = vst.msk [vmem:[%s3632_s7 + $0x38] sm:$0xff] %vm274_vm0, %v2776_v61  ;;  %vm1709_vm7 = vweird.f32 %v3997_v27  ;;  %v1715_v23 = vand.u32 2147483648, %v3997_v27  ;;  %v1729_v49 = vmul.f32 %v1728_v15, %v3973_v34 }
  0xdf   : > { %v2609_v2 = vadd.f32 1.0, %v2976_v62  ;;  %v3051_v17 = vpop.eup %3050  ;;  %v1740_v29 = vmul.f32 %v1739_v42, %v3973_v34  ;;  %v4031_v43 = vmul.f32 0.70710677, %v4020_v48  ;;  %v622_v51 = vmul.f32 %v3798_v60, %v3248_v11  ;;  %v4068_v42 = vld [vmem:[#allocation2 + $0x109] sm:$0xff] }
  0xe0   : > { %v557_v19 = vadd.f32 %v525_v38, %v428_v5  ;;  %v1705_v24 = vmul.f32 %v3051_v17, %v3997_v27  ;;  %vm4037_vm8 = vcmp.eq.f32.partialorder %v1713_v50, 8.507059e+37  ;;  %v1730_v30 = vadd.f32 0.18741608, %v1729_v49 }
  0xe1   : > { %v2641_v58 = vmul.f32 %v2609_v2, %v3863_v45  ;;  %v1741_v1 = vadd.f32 0.4994258, %v1740_v29  ;;  %v1761_v54 = vmul.f32 %v4031_v43, %v4031_v43  ;;  %v719_v4 = vmul.f32 %v3902_v44, %v3272_v26 }
  0xe2   : > { %v654_v14 = vadd.f32 %v622_v51, %v557_v19  ;;  %v1706_v60 = vsub.f32 1.0, %v1705_v24  ;;  %v1716_v59 = vor.u32 1.1754944e-38, %v1715_v23  ;;  %v816_v45 = vmul.f32 %v3904_v16, %v3281_v33 }
  0xe3   : > { %v2677_v32 = vmul.f32 %v3589_v37, %v2641_v58  ;;  %v1731_v25 = vmul.f32 %v1730_v30, %v3973_v34  ;;  %v1742_v21 = vmul.f32 %v1741_v1, %v3973_v34  ;;  %v4051_v36 = vmin.f32 %v1761_v54, 16.0 }
  0xe4   : > { %v751_v12 = vadd.f32 %v719_v4, %v654_v14  ;;  %v1707_v37 = vmul.f32 %v3051_v17, %v1706_v60  ;;  %vm1710_vm9 = vweird.f32 %v3051_v17  ;;  %v913_v31 = vmul.f32 %v3919_v28, %v3288_v40  ;;  %v4092_v60 = vld [vmem:[#allocation2 + $0x10f] sm:$0xff] }
  0xe5   : > { %v2713_v39 = vadd.f32 %v3610_v0, %v2677_v32  ;;  %v4060_v9 = vadd.f32 1.0, %v1742_v21  ;;  %v1763_v5 = vmul.f32 2.1237322e-06, %v4051_v36  ;;  %v1774_v34 = vmul.f32 3.8918573e-05, %v4051_v36  ;;  %vm1711_vm10 = vmor %vm1709_vm7, %vm1710_vm9 }
  0xe6   : > { %v848_v61 = vadd.f32 %v816_v45, %v751_v12  ;;  %v1708_v50 = vadd.f32 %v3051_v17, %v1707_v37  ;;  %v1011_v15 = vmul.f32 %v3293_v46, %v4053_v56  ;;  %v1108_v0 = vmul.f32 %v3295_v47, %v4055_v55 }
  0xe7   : > { %v2777_v62 = vadd.f32 %v2745_v10, %v2713_v39  ;;  %v1732_v38 = vadd.f32 1.1283791, %v1731_v25  ;;  %3052 = vrcp.f32 %v4060_v9  ;;  %v1755_v2 = vand.u32 2147483648, %v4060_v9  ;;  %v4095_v10 = vld [vmem:[#allocation2 + $0x110] sm:$0xff] }
  0xe8   : > { %v429_v23 = vmul.f32 %v3838_v63, %v3239_v6  ;;  %v1712_v49 = vsel %vm1711_vm10, %v3051_v17, %v1708_v50  ;;  %v1764_v29 = vadd.f32 0.00028619796, %v1763_v5  ;;  %v1775_v19 = vadd.f32 0.001143296, %v1774_v34 }
  0xe9   : > { %2809 = vst.msk [vmem:[%s3632_s7 + $0x40] sm:$0xff] %vm274_vm0, %v2777_v62  ;;  %v945_v51 = vadd.f32 %v913_v31, %v848_v61  ;;  %v1717_v58 = vsel %vm4037_vm8, %v1716_v59, %v1712_v49  ;;  %v1753_v27 = vand.u32 2147483647, %v4060_v9  ;;  %v1205_v24 = vmul.f32 %v3812_v53, %v4068_v42 }
  0xea   : > { %v526_v30 = vmul.f32 %v3850_v35, %v3241_v8  ;;  %v1718_v1 = vmul.f32 %v1717_v58, %v1693_v18  ;;  %v1765_v63 = vmul.f32 %v1764_v29, %v4051_v36  ;;  %v1776_v54 = vmul.f32 %v1775_v19, %v4051_v36 }
  0xeb   : > { %v1043_v17 = vadd.f32 %v1011_v15, %v945_v51  ;;  %v4088_v14 = vmul.f32 %v1732_v38, %v3953_v52  ;;  %v1756_v4 = vor.u32 1.1754944e-38, %v1755_v2  ;;  %v623_v32 = vmul.f32 %v3855_v22, %v3248_v11  ;;  %v4125_v51 = vld [vmem:[%s5366_s2] ss:$0 sm:$0xff] }
  0xec   : > { %v558_v41 = vadd.f32 %v526_v30, %v429_v23  ;;  %v2977_v59 = vclamps-f32 %v1718_v1, 1.0  ;;  %vm1749_vm11 = vweird.f32 %v4060_v9  ;;  %v1766_v35 = vadd.f32 0.0036580483, %v1765_v63 }
  0xed   : > { %v1777_v18 = vadd.f32 0.014752088, %v1776_v54  ;;  %v1140_v45 = vadd.f32 %v1108_v0, %v1043_v17  ;;  %v3053_v25 = vpop.eup %3052  ;;  %v720_v52 = vmul.f32 %v3982_v3, %v3272_v26  ;;  %v817_v12 = vmul.f32 %v3994_v7, %v3281_v33  ;;  %v4140_v17 = vld [vmem:[%s5367_s3] ss:$0 sm:$0xff] }
  0xee   : > { %v655_v21 = vadd.f32 %v623_v32, %v558_v41  ;;  %v914_v22 = vmul.f32 %v4002_v13, %v3288_v40  ;;  %v2610_v39 = vadd.f32 1.0, %v2977_v59  ;;  %v1745_v37 = vmul.f32 %v3053_v25, %v4060_v9 }
  0xef   : > { %vm4104_vm12 = vcmp.eq.f32.partialorder %v1753_v27, 8.507059e+37  ;;  %v1767_v5 = vmul.f32 %v1766_v35, %v4051_v36  ;;  %v1012_v34 = vmul.f32 %v3293_v46, %v4092_v60  ;;  %v1778_v61 = vmul.f32 %v1777_v18, %v4051_v36 }
  0xf0   : > { %v4112_v62 = vadd.f32 %v1205_v24, %v1140_v45  ;;  %v752_v50 = vadd.f32 %v720_v52, %v655_v21  ;;  %v1109_v15 = vmul.f32 %v3295_v47, %v4095_v10  ;;  %v2642_v0 = vmul.f32 %v2610_v39, %v4010_v57 }
  0xf1   : > { %v1746_v38 = vsub.f32 1.0, %v1745_v37  ;;  %v1768_v2 = vadd.f32 0.05243302, %v1767_v5  ;;  %v430_v23 = vmul.f32 %v3902_v44, %v3239_v6  ;;  %vm1750_vm13 = vweird.f32 %v3053_v25  ;;  %v2746_v44 = vld [vmem:[%s3220_s22 + $0x48] sm:$0xff] }
  0xf2   : > { %v1779_v49 = vadd.f32 0.112945676, %v1778_v61  ;;  %v4120_v29 = vmul.f32 0.70710677, %v4112_v62  ;;  %v849_v19 = vadd.f32 %v817_v12, %v752_v50  ;;  %v2678_v58 = vmul.f32 %v4125_v51, %v2642_v0  ;;  %vm1751_vm14 = vmor %vm1749_vm11, %vm1750_vm13 }
  0xf3   : > { %v1747_v27 = vmul.f32 %v3053_v25, %v1746_v38  ;;  %v1769_v57 = vmul.f32 %v1768_v2, %v4051_v36  ;;  %v527_v24 = vmul.f32 %v3904_v16, %v3241_v8  ;;  %v624_v54 = vmul.f32 %v3919_v28, %v3248_v11  ;;  %v4148_v28 = vld [vmem:[#allocation2 + $0x111] sm:$0xff] }
  0xf4   : > { %v1780_v30 = vmul.f32 %v1779_v49, %v4051_v36  ;;  %v1801_v1 = vmul.f32 %v4120_v29, %v4120_v29  ;;  %v946_v63 = vadd.f32 %v914_v22, %v849_v19  ;;  %v2714_v41 = vadd.f32 %v4140_v17, %v2678_v58 }
  0xf5   : > { %v1748_v32 = vadd.f32 %v3053_v25, %v1747_v27  ;;  %v1770_v59 = vadd.f32 0.18741608, %v1769_v57  ;;  %v559_v16 = vadd.f32 %v527_v24, %v430_v23  ;;  %v721_v21 = vmul.f32 %v4053_v56, %v3272_v26 }
  0xf6   : > { %v1781_v35 = vadd.f32 0.4994258, %v1780_v30  ;;  %v4146_v18 = vmin.f32 %v1801_v1, 16.0  ;;  %v1044_v45 = vadd.f32 %v1012_v34, %v946_v63  ;;  %v2778_v52 = vadd.f32 %v2746_v44, %v2714_v41  ;;  %v4180_v44 = vld [vmem:[#allocation2 + $0x128] sm:$0xff] }
  0xf7   : > { %v1752_v12 = vsel %vm1751_vm14, %v3053_v25, %v1748_v32  ;;  %v1771_v22 = vmul.f32 %v1770_v59, %v4051_v36  ;;  %v656_v39 = vadd.f32 %v624_v54, %v559_v16  ;;  %v1206_v25 = vmul.f32 %v3812_v53, %v4148_v28 }
  0xf8   : > { %v1757_v37 = vsel %vm4104_vm12, %v1756_v4, %v1752_v12  ;;  %v1782_v9 = vmul.f32 %v1781_v35, %v4051_v36  ;;  %v1803_v5 = vmul.f32 2.1237322e-06, %v4146_v18  ;;  %v1814_v61 = vmul.f32 3.8918573e-05, %v4146_v18  ;;  %2810 = vst.msk [vmem:[%s3632_s7 + $0x48] sm:$0xff] %vm274_vm0, %v2778_v52 }
  0xf9   : > { %v1758_v34 = vmul.f32 %v1757_v37, %v4088_v14  ;;  %v1772_v50 = vadd.f32 1.1283791, %v1771_v22  ;;  %v1141_v0 = vadd.f32 %v1109_v15, %v1044_v45  ;;  %v753_v4 = vadd.f32 %v721_v21, %v656_v39  ;;  %v4174_v15 = vld [vmem:[#allocation2 + $0x127] sm:$0xff] }
  0xfa   : > { %v4163_v38 = vadd.f32 1.0, %v1782_v9  ;;  %v1804_v2 = vadd.f32 0.00028619796, %v1803_v5  ;;  %v1815_v31 = vadd.f32 0.001143296, %v1814_v61  ;;  %v1267_v49 = vmul.f32 0.5, %v3944_v20 }
  0xfb   : > { %v2978_v23 = vclamps-f32 %v1758_v34, 1.0  ;;  %v4165_v36 = vadd.f32 %v1206_v25, %v1141_v0  ;;  %v4169_v19 = vmul.f32 %v1772_v50, %v4031_v43  ;;  %v818_v14 = vmul.f32 %v4055_v55, %v3281_v33  ;;  %v4182_v20 = vld [vmem:[#allocation2 + $0x129] sm:$0xff] }
  0xfc   : > { %3054 = vrcp.f32 %v4163_v38  ;;  %v1805_v27 = vmul.f32 %v1804_v2, %v4146_v18  ;;  %v1816_v57 = vmul.f32 %v1815_v31, %v4146_v18  ;;  %v915_v24 = vmul.f32 %v4068_v42, %v3288_v40  ;;  %v2747_v9 = vld [vmem:[%s3220_s22 + $0x50] sm:$0xff] }
  0xfd   : > { %v2611_v58 = vadd.f32 1.0, %v2978_v23  ;;  %v1793_v43 = vand.u32 2147483647, %v4163_v38  ;;  %v1795_v30 = vand.u32 2147483648, %v4163_v38  ;;  %v4187_v1 = vmul.f32 0.70710677, %v4165_v36 }
  0xfe   : > { %v850_v63 = vadd.f32 %v818_v14, %v753_v4  ;;  %v1806_v41 = vadd.f32 0.0036580483, %v1805_v27  ;;  %v1817_v32 = vadd.f32 0.014752088, %v1816_v57  ;;  %v1013_v59 = vmul.f32 %v3293_v46, %v4174_v15 }
  0xff   : > { %v2643_v54 = vmul.f32 %v2611_v58, %v1267_v49  ;;  %v1841_v16 = vmul.f32 %v4187_v1, %v4187_v1  ;;  %v1110_v45 = vmul.f32 %v3295_v47, %v4180_v44  ;;  %v1207_v21 = vmul.f32 %v3812_v53, %v4182_v20 }
 0x100   : > { %v947_v35 = vadd.f32 %v915_v24, %v850_v63  ;;  %vm1789_vm15 = vweird.f32 %v4163_v38  ;;  %v1807_v12 = vmul.f32 %v1806_v41, %v4146_v18  ;;  %v1818_v22 = vmul.f32 %v1817_v32, %v4146_v18 }
 0x101   : > { %v2679_v52 = vmul.f32 %v4125_v51, %v2643_v54  ;;  %v431_v39 = vmul.f32 %v3982_v3, %v3239_v6  ;;  %v4204_v5 = vmin.f32 %v1841_v16, 16.0  ;;  %v528_v34 = vmul.f32 %v3994_v7, %v3241_v8 }
 0x102   : > { %v3055_v37 = vpop.eup %3054  ;;  %v1045_v61 = vadd.f32 %v1013_v59, %v947_v35  ;;  %v625_v50 = vmul.f32 %v4002_v13, %v3248_v11  ;;  %v1808_v2 = vadd.f32 0.05243302, %v1807_v12  ;;  %v1819_v31 = vadd.f32 0.112945676, %v1818_v22 }
 0x103   : > { %v2715_v0 = vadd.f32 %v4140_v17, %v2679_v52  ;;  %v1785_v25 = vmul.f32 %v3055_v37, %v4163_v38  ;;  %vm1790_vm1 = vweird.f32 %v3055_v37  ;;  %v1843_v3 = vmul.f32 2.1237322e-06, %v4204_v5 }
 0x104   : > { %v1854_v4 = vmul.f32 3.8918573e-05, %v4204_v5  ;;  %v1142_v23 = vadd.f32 %v1110_v45, %v1045_v61  ;;  %v1809_v7 = vmul.f32 %v1808_v2, %v4146_v18  ;;  %v560_v58 = vadd.f32 %v528_v34, %v431_v39  ;;  %vm1791_vm3 = vmor %vm1789_vm15, %vm1790_vm1 }
 0x105   : > { %v2779_v49 = vadd.f32 %v2747_v9, %v2715_v0  ;;  %v1786_v14 = vsub.f32 1.0, %v1785_v25  ;;  %v1820_v13 = vmul.f32 %v1819_v31, %v4146_v18  ;;  %v1844_v27 = vadd.f32 0.00028619796, %v1843_v3 }
 0x106   : > { %v1855_v57 = vadd.f32 0.001143296, %v1854_v4  ;;  %v4216_v24 = vadd.f32 %v1207_v21, %v1142_v23  ;;  %v1810_v54 = vadd.f32 0.18741608, %v1809_v7  ;;  %v657_v41 = vadd.f32 %v625_v50, %v560_v58 }
 0x107   : > { %2811 = vst.msk [vmem:[%s3632_s7 + $0x50] sm:$0xff] %vm274_vm0, %v2779_v49  ;;  %v1787_v63 = vmul.f32 %v3055_v37, %v1786_v14  ;;  %v722_v32 = vmul.f32 %v4092_v60, %v3272_v26  ;;  %vm4222_vm2 = vcmp.eq.f32.partialorder %v1793_v43, 8.507059e+37  ;;  %v1821_v16 = vadd.f32 0.4994258, %v1820_v13  ;;  %v4253_v49 = vld [vmem:[#allocation2 + $0x12f] sm:$0xff] }
 0x108   : > { %v1845_v35 = vmul.f32 %v1844_v27, %v4204_v5  ;;  %v1856_v45 = vmul.f32 %v1855_v57, %v4204_v5  ;;  %v1811_v21 = vmul.f32 %v1810_v54, %v4146_v18  ;;  %v4230_v12 = vmul.f32 0.70710677, %v4216_v24  ;;  %v4255_v27 = vld [vmem:[#allocation2 + $0x130] sm:$0xff] }
 0x109   : > { %v1788_v52 = vadd.f32 %v3055_v37, %v1787_v63  ;;  %v754_v22 = vadd.f32 %v722_v32, %v657_v41  ;;  %v1796_v43 = vor.u32 1.1754944e-38, %v1795_v30  ;;  %v1822_v39 = vmul.f32 %v1821_v16, %v4146_v18  ;;  %v4269_v16 = vld [vmem:[#allocation2 + $0x131] sm:$0xff] }
 0x10a   : > { %v1846_v9 = vadd.f32 0.0036580483, %v1845_v35  ;;  %v1857_v61 = vadd.f32 0.014752088, %v1856_v45  ;;  %v1812_v50 = vadd.f32 1.1283791, %v1811_v21  ;;  %v1881_v0 = vmul.f32 %v4230_v12, %v4230_v12 }
 0x10b   : > { %v1792_v34 = vsel %vm1791_vm3, %v3055_v37, %v1788_v52  ;;  %v819_v25 = vmul.f32 %v4095_v10, %v3281_v33  ;;  %v4242_v31 = vadd.f32 1.0, %v1822_v39  ;;  %v916_v4 = vmul.f32 %v4148_v28, %v3288_v40 }
 0x10c   : > { %v1797_v2 = vsel %vm4222_vm2, %v1796_v43, %v1792_v34  ;;  %v1847_v38 = vmul.f32 %v1846_v9, %v4204_v5  ;;  %v1858_v30 = vmul.f32 %v1857_v61, %v4204_v5  ;;  %v4247_v3 = vmin.f32 %v1881_v0, 16.0 }
 0x10d   : > { %v1798_v18 = vmul.f32 %v1797_v2, %v4169_v19  ;;  %v851_v37 = vadd.f32 %v819_v25, %v754_v22  ;;  %v1268_v23 = vmul.f32 0.5, %v4020_v48  ;;  %3056 = vrcp.f32 %v4242_v31 }
 0x10e   : > { %v1848_v7 = vadd.f32 0.05243302, %v1847_v38  ;;  %v1859_v58 = vadd.f32 0.112945676, %v1858_v30  ;;  %v4258_v19 = vmul.f32 0.5, %v4112_v62  ;;  %v4261_v57 = vmul.f32 %v1812_v50, %v4120_v29  ;;  %v2748_v30 = vld [vmem:[%s3220_s22 + $0x58] sm:$0xff] }
 0x10f   : > { %v2979_v14 = vclamps-f32 %v1798_v18, 1.0  ;;  %v948_v13 = vadd.f32 %v916_v4, %v851_v37  ;;  %v1883_v63 = vmul.f32 2.1237322e-06, %v4247_v3  ;;  %v1894_v48 = vmul.f32 3.8918573e-05, %v4247_v3 }
 0x110   : > { %v1849_v41 = vmul.f32 %v1848_v7, %v4204_v5  ;;  %v1860_v32 = vmul.f32 %v1859_v58, %v4204_v5  ;;  %v1014_v59 = vmul.f32 %v3293_v46, %v4253_v49  ;;  %v1833_v62 = vand.u32 2147483647, %v4242_v31 }
 0x111   : > { %v2612_v54 = vadd.f32 1.0, %v2979_v14  ;;  %v1884_v35 = vadd.f32 0.00028619796, %v1883_v63  ;;  %v1895_v29 = vadd.f32 0.001143296, %v1894_v48  ;;  %v1111_v45 = vmul.f32 %v3295_v47, %v4255_v27 }
 0x112   : > { %v1850_v21 = vadd.f32 0.18741608, %v1849_v41  ;;  %v1861_v22 = vadd.f32 0.4994258, %v1860_v32  ;;  %v1046_v43 = vadd.f32 %v1014_v59, %v948_v13  ;;  %v432_v34 = vmul.f32 %v4053_v56, %v3239_v6 }
 0x113   : > { %v2644_v52 = vmul.f32 %v2612_v54, %v1268_v23  ;;  %v3057_v39 = vpop.eup %3056  ;;  %v1885_v9 = vmul.f32 %v1884_v35, %v4247_v3  ;;  %v1896_v61 = vmul.f32 %v1895_v29, %v4247_v3  ;;  %v529_v50 = vmul.f32 %v4055_v55, %v3241_v8 }
 0x114   : > { %v1825_v25 = vmul.f32 %v3057_v39, %v4242_v31  ;;  %v1851_v2 = vmul.f32 %v1850_v21, %v4204_v5  ;;  %v1208_v38 = vmul.f32 %v3812_v53, %v4269_v16  ;;  %v1862_v18 = vmul.f32 %v1861_v22, %v4204_v5 }
 0x115   : > { %v2680_v0 = vmul.f32 %v4125_v51, %v2644_v52  ;;  %v1886_v37 = vadd.f32 0.0036580483, %v1885_v9  ;;  %v1897_v4 = vadd.f32 0.014752088, %v1896_v61  ;;  %v1143_v23 = vadd.f32 %v1111_v45, %v1046_v43 }
 0x116   : > { %v1826_v14 = vsub.f32 1.0, %v1825_v25  ;;  %v1835_v55 = vand.u32 2147483648, %v4242_v31  ;;  %v561_v7 = vadd.f32 %v529_v50, %v432_v34  ;;  %v4289_v58 = vadd.f32 1.0, %v1862_v18 }
 0x117   : > { %v2716_v56 = vadd.f32 %v4140_v17, %v2680_v0  ;;  %v1887_v13 = vmul.f32 %v1886_v37, %v4247_v3  ;;  %v1898_v63 = vmul.f32 %v1897_v4, %v4247_v3  ;;  %v4293_v53 = vadd.f32 %v1208_v38, %v1143_v23  ;;  %v4328_v4 = vld [vmem:[#allocation2 + $0x147] sm:$0xff] }
 0x118   : > { %v1827_v5 = vmul.f32 %v3057_v39, %v1826_v14  ;;  %vm1829_vm4 = vweird.f32 %v4242_v31  ;;  %vm1830_vm5 = vweird.f32 %v3057_v39  ;;  %vm4296_vm6 = vcmp.eq.f32.partialorder %v1833_v62, 8.507059e+37 }
 0x119   : > { %v2780_v48 = vadd.f32 %v2748_v30, %v2716_v56  ;;  %v1852_v41 = vadd.f32 1.1283791, %v1851_v2  ;;  %3058 = vrcp.f32 %v4289_v58  ;;  %v626_v32 = vmul.f32 %v4068_v42, %v3248_v11  ;;  %vm1831_vm7 = vmor %vm1829_vm4, %vm1830_vm5 }
 0x11a   : > { %v1828_v59 = vadd.f32 %v3057_v39, %v1827_v5  ;;  %v1836_v35 = vor.u32 1.1754944e-38, %v1835_v55  ;;  %v1888_v29 = vadd.f32 0.05243302, %v1887_v13  ;;  %v1899_v45 = vadd.f32 0.112945676, %v1898_v63 }
 0x11b   : > { %2812 = vst.msk [vmem:[%s3632_s7 + $0x58] sm:$0xff] %vm274_vm0, %v2780_v48  ;;  %v1873_v31 = vand.u32 2147483647, %v4289_v58  ;;  %v1875_v62 = vand.u32 2147483648, %v4289_v58  ;;  %v4308_v52 = vmul.f32 0.70710677, %v4293_v53  ;;  %v658_v21 = vadd.f32 %v626_v32, %v561_v7 }
 0x11c   : > { %v1832_v22 = vsel %vm1831_vm7, %v3057_v39, %v1828_v59  ;;  %v1889_v43 = vmul.f32 %v1888_v29, %v4247_v3  ;;  %v1900_v42 = vmul.f32 %v1899_v45, %v4247_v3  ;;  %v723_v9 = vmul.f32 %v4174_v15, %v3272_v26  ;;  %v4345_v32 = vld [vmem:[#allocation2 + $0x149] sm:$0xff] }
 0x11d   : > { %v1837_v61 = vsel %vm4296_vm6, %v1836_v35, %v1832_v22  ;;  %v4317_v34 = vmul.f32 0.5, %v4165_v36  ;;  %v1853_v50 = vmul.f32 %v1852_v41, %v4187_v1  ;;  %v1921_v0 = vmul.f32 %v4308_v52, %v4308_v52  ;;  %v4343_v41 = vld [vmem:[#allocation2 + $0x148] sm:$0xff] }
 0x11e   : > { %v1838_v39 = vmul.f32 %v1837_v61, %v4261_v57  ;;  %v1890_v25 = vadd.f32 0.18741608, %v1889_v43  ;;  %v1901_v2 = vadd.f32 0.4994258, %v1900_v42  ;;  %v755_v38 = vadd.f32 %v723_v9, %v658_v21 }
 0x11f   : > { %v3059_v30 = vpop.eup %3058  ;;  %vm1869_vm8 = vweird.f32 %v4289_v58  ;;  %v1876_v18 = vor.u32 1.1754944e-38, %v1875_v62  ;;  %v4324_v37 = vmin.f32 %v1921_v0, 16.0  ;;  %v820_v36 = vmul.f32 %v4180_v44, %v3281_v33  ;;  %v2749_v0 = vld [vmem:[%s3220_s22 + $0x60] sm:$0xff] }
 0x120   : > { %v2980_v1 = vclamps-f32 %v1838_v39, 1.0  ;;  %v1865_v23 = vmul.f32 %v3059_v30, %v4289_v58  ;;  %vm4331_vm9 = vcmp.eq.f32.partialorder %v1873_v31, 8.507059e+37  ;;  %v1891_v57 = vmul.f32 %v1890_v25, %v4247_v3 }
 0x121   : > { %v917_v14 = vmul.f32 %v4182_v20, %v3288_v40  ;;  %v1902_v55 = vmul.f32 %v1901_v2, %v4247_v3  ;;  %v1923_v7 = vmul.f32 2.1237322e-06, %v4324_v37  ;;  %v1934_v13 = vmul.f32 3.8918573e-05, %v4324_v37 }
 0x122   : > { %v852_v63 = vadd.f32 %v820_v36, %v755_v38  ;;  %v2613_v48 = vadd.f32 1.0, %v2980_v1  ;;  %v1866_v5 = vsub.f32 1.0, %v1865_v23  ;;  %v1015_v54 = vmul.f32 %v3293_v46, %v4328_v4 }
 0x123   : > { %v433_v59 = vmul.f32 %v4092_v60, %v3239_v6  ;;  %v4349_v35 = vadd.f32 1.0, %v1902_v55  ;;  %v1924_v3 = vadd.f32 0.00028619796, %v1923_v7  ;;  %v1935_v29 = vadd.f32 0.001143296, %v1934_v13 }
 0x124   : > { %v949_v45 = vadd.f32 %v917_v14, %v852_v63  ;;  %v2645_v31 = vmul.f32 %v2613_v48, %v4258_v19  ;;  %v1867_v62 = vmul.f32 %v3059_v30, %v1866_v5  ;;  %vm1870_vm10 = vweird.f32 %v3059_v30  ;;  %v4360_v60 = vld [vmem:[%s5365_s1 + $0x8] ss:$0 sm:$0xff] }
 0x125   : > { %v530_v21 = vmul.f32 %v4095_v10, %v3241_v8  ;;  %v1892_v22 = vadd.f32 1.1283791, %v1891_v57  ;;  %3060 = vrcp.f32 %v4349_v35  ;;  %v1112_v43 = vmul.f32 %v3295_v47, %v4343_v41  ;;  %vm1871_vm11 = vmor %vm1869_vm8, %vm1870_vm10 }
 0x126   : > { %v1209_v42 = vmul.f32 %v4360_v60, %v4345_v32  ;;  %v2681_v19 = vmul.f32 %v4125_v51, %v2645_v31  ;;  %v1868_v9 = vadd.f32 %v3059_v30, %v1867_v62  ;;  %v1925_v61 = vmul.f32 %v1924_v3, %v4324_v37 }
 0x127   : > { %v1936_v10 = vmul.f32 %v1935_v29, %v4324_v37  ;;  %v1913_v39 = vand.u32 2147483647, %v4349_v35  ;;  %v1915_v25 = vand.u32 2147483648, %v4349_v35  ;;  %v1047_v2 = vadd.f32 %v1015_v54, %v949_v45 }
 0x128   : > { %v562_v38 = vadd.f32 %v530_v21, %v433_v59  ;;  %v2717_v36 = vadd.f32 %v4140_v17, %v2681_v19  ;;  %v1872_v1 = vsel %vm1871_vm11, %v3059_v30, %v1868_v9  ;;  %v1926_v23 = vadd.f32 0.0036580483, %v1925_v61  ;;  %v4397_v21 = vld [vmem:[#allocation2 + $0x14f] sm:$0xff] }
 0x129   : > { %v1937_v57 = vadd.f32 0.014752088, %v1936_v10  ;;  %v1877_v14 = vsel %vm4331_vm9, %v1876_v18, %v1872_v1  ;;  %v1893_v55 = vmul.f32 %v1892_v22, %v4230_v12  ;;  %v1144_v7 = vadd.f32 %v1112_v43, %v1047_v2 }
 0x12a   : > { %v627_v58 = vmul.f32 %v4148_v28, %v3248_v11  ;;  %v2781_v13 = vadd.f32 %v2749_v0, %v2717_v36  ;;  %v1878_v63 = vmul.f32 %v1877_v14, %v1853_v50  ;;  %v1927_v48 = vmul.f32 %v1926_v23, %v4324_v37  ;;  %v4410_v23 = vld [vmem:[#allocation2 + $0x150] sm:$0xff] }
 0x12b   : > { %v1938_v5 = vmul.f32 %v1937_v57, %v4324_v37  ;;  %v3061_v54 = vpop.eup %3060  ;;  %vm1909_vm12 = vweird.f32 %v4349_v35  ;;  %v4381_v30 = vadd.f32 %v1209_v42, %v1144_v7  ;;  %v724_v18 = vmul.f32 %v4253_v49, %v3272_v26 }
 0x12c   : > { %v659_v59 = vadd.f32 %v627_v58, %v562_v38  ;;  %2813 = vst.msk [vmem:[%s3632_s7 + $0x60] sm:$0xff] %vm274_vm0, %v2781_v13  ;;  %v2981_v12 = vclamps-f32 %v1878_v63, 1.0  ;;  %v1905_v28 = vmul.f32 %v3061_v54, %v4349_v35  ;;  %vm4388_vm13 = vcmp.eq.f32.partialorder %v1913_v39, 8.507059e+37  ;;  %v2750_v13 = vld [vmem:[%s3220_s22 + $0x68] sm:$0xff] }
 0x12d   : > { %v1916_v56 = vor.u32 1.1754944e-38, %v1915_v25  ;;  %v1928_v3 = vadd.f32 0.05243302, %v1927_v48  ;;  %v1939_v29 = vadd.f32 0.112945676, %v1938_v5  ;;  %v821_v62 = vmul.f32 %v4255_v27, %v3281_v33 }
 0x12e   : > { %v4393_v45 = vmul.f32 0.70710677, %v4381_v30  ;;  %v756_v31 = vadd.f32 %v724_v18, %v659_v59  ;;  %v2614_v22 = vadd.f32 1.0, %v2981_v12  ;;  %v1906_v43 = vsub.f32 1.0, %v1905_v28  ;;  %v4425_v59 = vld [vmem:[#allocation2 + $0x151] sm:$0xff] }
 0x12f   : > { %v1929_v42 = vmul.f32 %v1928_v3, %v4324_v37  ;;  %v918_v19 = vmul.f32 %v4269_v16, %v3288_v40  ;;  %vm1910_vm14 = vweird.f32 %v3061_v54  ;;  %v1940_v9 = vmul.f32 %v1939_v29, %v4324_v37 }
 0x130   : > { %v1961_v61 = vmul.f32 %v4393_v45, %v4393_v45  ;;  %v853_v10 = vadd.f32 %v821_v62, %v756_v31  ;;  %v2646_v0 = vmul.f32 %v2614_v22, %v4317_v34  ;;  %v1907_v39 = vmul.f32 %v3061_v54, %v1906_v43  ;;  %vm1911_vm15 = vmor %vm1909_vm12, %vm1910_vm14 }
 0x131   : > { %v1930_v25 = vadd.f32 0.18741608, %v1929_v42  ;;  %v1016_v2 = vmul.f32 %v3293_v46, %v4397_v21  ;;  %v1941_v38 = vadd.f32 0.4994258, %v1940_v9  ;;  %v434_v57 = vmul.f32 %v4174_v15, %v3239_v6 }
 0x132   : > { %v4408_v36 = vmin.f32 %v1961_v61, 16.0  ;;  %v950_v1 = vadd.f32 %v918_v19, %v853_v10  ;;  %v2682_v14 = vmul.f32 %v4125_v51, %v2646_v0  ;;  %v1908_v7 = vadd.f32 %v3061_v54, %v1907_v39  ;;  %v4451_v39 = vld [vmem:[#allocation2 + $0x167] sm:$0xff] }
 0x133   : > { %v1931_v58 = vmul.f32 %v1930_v25, %v4324_v37  ;;  %v531_v34 = vmul.f32 %v4180_v44, %v3241_v8  ;;  %v1942_v63 = vmul.f32 %v1941_v38, %v4324_v37  ;;  %v1113_v44 = vmul.f32 %v3295_v47, %v4410_v23  ;;  %v4453_v25 = vld [vmem:[#allocation2 + $0x168] sm:$0xff] }
 0x134   : > { %v1963_v48 = vmul.f32 2.1237322e-06, %v4408_v36  ;;  %v1974_v5 = vmul.f32 3.8918573e-05, %v4408_v36  ;;  %v1048_v15 = vadd.f32 %v1016_v2, %v950_v1  ;;  %v2718_v18 = vadd.f32 %v4140_v17, %v2682_v14 }
 0x135   : > { %v1912_v12 = vsel %vm1911_vm15, %v3061_v54, %v1908_v7  ;;  %v1932_v28 = vadd.f32 1.1283791, %v1931_v58  ;;  %v4432_v3 = vadd.f32 1.0, %v1942_v63  ;;  %v1210_v43 = vmul.f32 %v4360_v60, %v4425_v59 }
 0x136   : > { %v1917_v35 = vsel %vm4388_vm13, %v1916_v56, %v1912_v12  ;;  %v1964_v37 = vadd.f32 0.00028619796, %v1963_v48  ;;  %v1975_v29 = vadd.f32 0.001143296, %v1974_v5  ;;  %v2782_v31 = vadd.f32 %v2750_v13, %v2718_v18 }
 0x137   : > { %v1918_v62 = vmul.f32 %v1917_v35, %v1893_v55  ;;  %v1145_v22 = vadd.f32 %v1113_v44, %v1048_v15  ;;  %3062 = vrcp.f32 %v4432_v3  ;;  %v1955_v54 = vand.u32 2147483648, %v4432_v3 }
 0x138   : > { %v563_v42 = vadd.f32 %v531_v34, %v434_v57  ;;  %2814 = vst.msk [vmem:[%s3632_s7 + $0x68] sm:$0xff] %vm274_vm0, %v2782_v31  ;;  %v1965_v50 = vmul.f32 %v1964_v37, %v4408_v36  ;;  %v1976_v56 = vmul.f32 %v1975_v29, %v4408_v36  ;;  %v1271_v55 = vmul.f32 0.5, %v4216_v24  ;;  %v2751_v37 = vld [vmem:[%s3220_s22 + $0x70] sm:$0xff] }
 0x139   : > { %v2982_v19 = vclamps-f32 %v1918_v62, 1.0  ;;  %v4442_v9 = vadd.f32 %v1210_v43, %v1145_v22  ;;  %v4446_v61 = vmul.f32 %v1932_v28, %v4308_v52  ;;  %v1953_v10 = vand.u32 2147483647, %v4432_v3 }
 0x13a   : > { %v628_v0 = vmul.f32 %v4182_v20, %v3248_v11  ;;  %v1956_v38 = vor.u32 1.1754944e-38, %v1955_v54  ;;  %v1966_v1 = vadd.f32 0.0036580483, %v1965_v50  ;;  %v1977_v57 = vadd.f32 0.014752088, %v1976_v56 }
 0x13b   : > { %v2615_v2 = vadd.f32 1.0, %v2982_v19  ;;  %v4456_v14 = vmul.f32 0.70710677, %v4442_v9  ;;  %v725_v52 = vmul.f32 %v4328_v4, %v3272_v26  ;;  %v822_v7 = vmul.f32 %v4343_v41, %v3281_v33 }
 0x13c   : > { %v660_v24 = vadd.f32 %v628_v0, %v563_v42  ;;  %vm1949_vm1 = vweird.f32 %v4432_v3  ;;  %v1967_v58 = vmul.f32 %v1966_v1, %v4408_v36  ;;  %v1978_v34 = vmul.f32 %v1977_v57, %v4408_v36  ;;  %v4491_v0 = vld [vmem:[#allocation2 + $0x169] sm:$0xff] }
 0x13d   : > { %v2647_v20 = vmul.f32 %v2615_v2, %v1271_v55  ;;  %v919_v13 = vmul.f32 %v4345_v32, %v3288_v40  ;;  %v3063_v63 = vpop.eup %3062  ;;  %v2001_v48 = vmul.f32 %v4456_v14, %v4456_v14  ;;  %v1017_v15 = vmul.f32 %v3293_v46, %v4451_v39 }
 0x13e   : > { %v757_v5 = vadd.f32 %v725_v52, %v660_v24  ;;  %v1114_v18 = vmul.f32 %v3295_v47, %v4453_v25  ;;  %v1945_v28 = vmul.f32 %v3063_v63, %v4432_v3  ;;  %vm1950_vm2 = vweird.f32 %v3063_v63 }
 0x13f   : > { %v2683_v12 = vmul.f32 %v4125_v51, %v2647_v20  ;;  %vm4475_vm3 = vcmp.eq.f32.partialorder %v1953_v10, 8.507059e+37  ;;  %v1968_v35 = vadd.f32 0.05243302, %v1967_v58  ;;  %v1979_v29 = vadd.f32 0.112945676, %v1978_v34  ;;  %vm1951_vm4 = vmor %vm1949_vm1, %vm1950_vm2 }
 0x140   : > { %v4480_v31 = vmin.f32 %v2001_v48, 16.0  ;;  %v854_v62 = vadd.f32 %v822_v7, %v757_v5  ;;  %v435_v22 = vmul.f32 %v4253_v49, %v3239_v6  ;;  %v1946_v54 = vsub.f32 1.0, %v1945_v28 }
 0x141   : > { %v2719_v43 = vadd.f32 %v4140_v17, %v2683_v12  ;;  %v1969_v42 = vmul.f32 %v1968_v35, %v4408_v36  ;;  %v532_v19 = vmul.f32 %v4255_v27, %v3241_v8  ;;  %v1980_v50 = vmul.f32 %v1979_v29, %v4408_v36 }
 0x142   : > { %v2003_v56 = vmul.f32 2.1237322e-06, %v4480_v31  ;;  %v2014_v55 = vmul.f32 3.8918573e-05, %v4480_v31  ;;  %v951_v10 = vadd.f32 %v919_v13, %v854_v62  ;;  %v1947_v49 = vmul.f32 %v3063_v63, %v1946_v54 }
 0x143   : > { %v2783_v2 = vadd.f32 %v2751_v37, %v2719_v43  ;;  %v1970_v1 = vadd.f32 0.18741608, %v1969_v42  ;;  %v564_v57 = vadd.f32 %v532_v19, %v435_v22  ;;  %v1981_v24 = vadd.f32 0.4994258, %v1980_v50  ;;  %v4521_v19 = vld [vmem:[#allocation2 + $0x16f] sm:$0xff] }
 0x144   : > { %v2004_v52 = vadd.f32 0.00028619796, %v2003_v56  ;;  %v2015_v7 = vadd.f32 0.001143296, %v2014_v55  ;;  %v1049_v20 = vadd.f32 %v1017_v15, %v951_v10  ;;  %v1948_v27 = vadd.f32 %v3063_v63, %v1947_v49 }
 0x145   : > { %2815 = vst.msk [vmem:[%s3632_s7 + $0x70] sm:$0xff] %vm274_vm0, %v2783_v2  ;;  %v1971_v58 = vmul.f32 %v1970_v1, %v4408_v36  ;;  %v1211_v34 = vmul.f32 %v4360_v60, %v4491_v0  ;;  %v629_v13 = vmul.f32 %v4269_v16, %v3248_v11  ;;  %v1982_v48 = vmul.f32 %v1981_v24, %v4408_v36  ;;  %v4534_v1 = vld [vmem:[#allocation2 + $0x170] sm:$0xff] }
 0x146   : > { %v2005_v5 = vmul.f32 %v2004_v52, %v4480_v31  ;;  %v2016_v15 = vmul.f32 %v2015_v7, %v4480_v31  ;;  %v1146_v12 = vadd.f32 %v1114_v18, %v1049_v20  ;;  %v1952_v28 = vsel %vm1951_vm4, %v3063_v63, %v1948_v27  ;;  %v4542_v52 = vld [vmem:[#allocation2 + $0x171] sm:$0xff] }
 0x147   : > { %v1972_v35 = vadd.f32 1.1283791, %v1971_v58  ;;  %v661_v37 = vadd.f32 %v629_v13, %v564_v57  ;;  %v726_v29 = vmul.f32 %v4397_v21, %v3272_v26  ;;  %v1957_v16 = vsel %vm4475_vm3, %v1956_v38, %v1952_v28  ;;  %v2752_v28 = vld [vmem:[%s3220_s22 + $0x78] sm:$0xff] }
 0x148   : > { %v4510_v62 = vadd.f32 1.0, %v1982_v48  ;;  %v2006_v3 = vadd.f32 0.0036580483, %v2005_v5  ;;  %v2017_v22 = vadd.f32 0.014752088, %v2016_v15  ;;  %v1958_v36 = vmul.f32 %v1957_v16, %v4446_v61 }
 0x149   : > { %v4513_v43 = vadd.f32 %v1211_v34, %v1146_v12  ;;  %v758_v54 = vadd.f32 %v726_v29, %v661_v37  ;;  %v823_v63 = vmul.f32 %v4410_v23, %v3281_v33  ;;  %v1272_v18 = vmul.f32 0.5, %v4293_v53 }
 0x14a   : > { %3064 = vrcp.f32 %v4510_v62  ;;  %v2983_v42 = vclamps-f32 %v1958_v36, 1.0  ;;  %v2007_v44 = vmul.f32 %v2006_v3, %v4480_v31  ;;  %v2018_v38 = vmul.f32 %v2017_v22, %v4480_v31 }
 0x14b   : > { %v4524_v50 = vmul.f32 0.5, %v4381_v30  ;;  %v4527_v61 = vmul.f32 %v1972_v35, %v4393_v45  ;;  %v4530_v56 = vmul.f32 0.70710677, %v4513_v43  ;;  %v855_v55 = vadd.f32 %v823_v63, %v758_v54 }
 0x14c   : > { %v2616_v10 = vadd.f32 1.0, %v2983_v42  ;;  %v2008_v2 = vadd.f32 0.05243302, %v2007_v44  ;;  %v2019_v53 = vadd.f32 0.112945676, %v2018_v38  ;;  %v920_v49 = vmul.f32 %v4425_v59, %v3288_v40 }
 0x14d   : > { %v1993_v57 = vand.u32 2147483647, %v4510_v62  ;;  %v1995_v30 = vand.u32 2147483648, %v4510_v62  ;;  %v2041_v45 = vmul.f32 %v4530_v56, %v4530_v56  ;;  %v1018_v24 = vmul.f32 %v3293_v46, %v4521_v19 }
 0x14e   : > { %v2648_v7 = vmul.f32 %v2616_v10, %v1272_v18  ;;  %v2009_v20 = vmul.f32 %v2008_v2, %v4480_v31  ;;  %v2020_v27 = vmul.f32 %v2019_v53, %v4480_v31  ;;  %v952_v58 = vadd.f32 %v920_v49, %v855_v55 }
 0x14f   : > { %v4546_v13 = vmin.f32 %v2041_v45, 16.0  ;;  %v1115_v48 = vmul.f32 %v3295_v47, %v4534_v1  ;;  %v436_v5 = vmul.f32 %v4328_v4, %v3239_v6  ;;  %v533_v15 = vmul.f32 %v4343_v41, %v3241_v8 }
 0x150   : > { %v3065_v34 = vpop.eup %3064  ;;  %v2684_v12 = vmul.f32 %v4125_v51, %v2648_v7  ;;  %v2010_v37 = vadd.f32 0.18741608, %v2009_v20  ;;  %v1212_v29 = vmul.f32 %v4360_v60, %v4542_v52  ;;  %v2021_v16 = vadd.f32 0.4994258, %v2020_v27 }
 0x151   : > { %v1985_v35 = vmul.f32 %v3065_v34, %v4510_v62  ;;  %v2043_v3 = vmul.f32 2.1237322e-06, %v4546_v13  ;;  %v2054_v22 = vmul.f32 3.8918573e-05, %v4546_v13  ;;  %v1050_v36 = vadd.f32 %v1018_v24, %v952_v58 }
 0x152   : > { %v2720_v4 = vadd.f32 %v4140_v17, %v2684_v12  ;;  %v2011_v41 = vmul.f32 %v2010_v37, %v4480_v31  ;;  %v565_v63 = vadd.f32 %v533_v15, %v436_v5  ;;  %v2022_v18 = vmul.f32 %v2021_v16, %v4480_v31  ;;  %v4582_v12 = vld [vmem:[#allocation2 + $0x187] sm:$0xff] }
 0x153   : > { %v1986_v54 = vsub.f32 1.0, %v1985_v35  ;;  %v2044_v42 = vadd.f32 0.00028619796, %v2043_v3  ;;  %v2055_v44 = vadd.f32 0.001143296, %v2054_v22  ;;  %v1147_v38 = vadd.f32 %v1115_v48, %v1050_v36  ;;  %v4594_v3 = vld [vmem:[#allocation2 + $0x189] sm:$0xff] }
 0x154   : > { %v2784_v55 = vadd.f32 %v2752_v28, %v2720_v4  ;;  %vm1990_vm5 = vweird.f32 %v3065_v34  ;;  %v630_v2 = vmul.f32 %v4345_v32, %v3248_v11  ;;  %v4566_v53 = vadd.f32 1.0, %v2022_v18 }
 0x155   : > { %v1987_v10 = vmul.f32 %v3065_v34, %v1986_v54  ;;  %v2045_v49 = vmul.f32 %v2044_v42, %v4546_v13  ;;  %v2056_v45 = vmul.f32 %v2055_v44, %v4546_v13  ;;  %v4570_v24 = vadd.f32 %v1212_v29, %v1147_v38 }
 0x156   : > { %2816 = vst.msk [vmem:[%s3632_s7 + $0x78] sm:$0xff] %vm274_vm0, %v2784_v55  ;;  %vm1989_vm6 = vweird.f32 %v4510_v62  ;;  %vm1994_vm7 = vcmp.eq.f32.partialorder %v1993_v57, 8.507059e+37  ;;  %v662_v7 = vadd.f32 %v630_v2, %v565_v63  ;;  %v1996_v20 = vor.u32 1.1754944e-38, %v1995_v30  ;;  %v4584_v62 = vld [vmem:[#allocation2 + $0x188] sm:$0xff] }
 0x157   : > { %v1988_v31 = vadd.f32 %v3065_v34, %v1987_v10  ;;  %vm1991_vm8 = vmor %vm1989_vm6, %vm1990_vm5  ;;  %v4575_v27 = vadd.f32 1.1283791, %v2011_v41  ;;  %3066 = vrcp.f32 %v4566_v53  ;;  %v727_v32 = vmul.f32 %v4451_v39, %v3272_v26 }
 0x158   : > { %v2046_v48 = vadd.f32 0.0036580483, %v2045_v49  ;;  %v2057_v5 = vadd.f32 0.014752088, %v2056_v45  ;;  %v824_v15 = vmul.f32 %v4453_v25, %v3281_v33  ;;  %v2033_v30 = vand.u32 2147483647, %v4566_v53 }
 0x159   : > { %v1992_v58 = vsel %vm1991_vm8, %v3065_v34, %v1988_v31  ;;  %v2035_v28 = vand.u32 2147483648, %v4566_v53  ;;  %v4589_v35 = vmul.f32 0.70710677, %v4570_v24  ;;  %v759_v16 = vadd.f32 %v727_v32, %v662_v7 }
 0x15a   : > { %v1997_v57 = vsel %vm1994_vm7, %v1996_v20, %v1992_v58  ;;  %v2047_v34 = vmul.f32 %v2046_v48, %v4546_v13  ;;  %v2058_v29 = vmul.f32 %v2057_v5, %v4546_v13  ;;  %v921_v36 = vmul.f32 %v4491_v0, %v3288_v40 }
 0x15b   : > { %v1998_v37 = vmul.f32 %v1997_v57, %v4527_v61  ;;  %v2081_v22 = vmul.f32 %v4589_v35, %v4589_v35  ;;  %v1019_v4 = vmul.f32 %v3293_v46, %v4582_v12  ;;  %v1116_v54 = vmul.f32 %v3295_v47, %v4584_v62 }
 0x15c   : > { %vm2029_vm9 = vweird.f32 %v4566_v53  ;;  %v2048_v41 = vadd.f32 0.05243302, %v2047_v34  ;;  %v2059_v63 = vadd.f32 0.112945676, %v2058_v29  ;;  %v856_v18 = vadd.f32 %v824_v15, %v759_v16 }
 0x15d   : > { %v2984_v61 = vclamps-f32 %v1998_v37, 1.0  ;;  %v3067_v42 = vpop.eup %3066  ;;  %v4605_v44 = vmin.f32 %v2081_v22, 16.0  ;;  %v1213_v38 = vmul.f32 %v4360_v60, %v4594_v3  ;;  %v437_v55 = vmul.f32 %v4397_v21, %v3239_v6 }
 0x15e   : > { %v534_v10 = vmul.f32 %v4410_v23, %v3241_v8  ;;  %v2025_v49 = vmul.f32 %v3067_v42, %v4566_v53  ;;  %vm2030_vm10 = vweird.f32 %v3067_v42  ;;  %v2049_v45 = vmul.f32 %v2048_v41, %v4546_v13 }
 0x15f   : > { %v2617_v2 = vadd.f32 1.0, %v2984_v61  ;;  %v2060_v31 = vmul.f32 %v2059_v63, %v4546_v13  ;;  %v2083_v7 = vmul.f32 2.1237322e-06, %v4605_v44  ;;  %v2094_v20 = vmul.f32 3.8918573e-05, %v4605_v44  ;;  %v2753_v61 = vld [vmem:[%s3220_s22 + $0x80] sm:$0xff]  ;;  %vm2031_vm11 = vmor %vm2029_vm9, %vm2030_vm10 }
 0x160   : > { %v953_v32 = vadd.f32 %v921_v36, %v856_v18  ;;  %v2026_v21 = vsub.f32 1.0, %v2025_v49  ;;  %v2050_v48 = vadd.f32 0.18741608, %v2049_v45  ;;  %v566_v5 = vadd.f32 %v534_v10, %v437_v55 }
 0x161   : > { %v2649_v58 = vmul.f32 %v2617_v2, %v4524_v50  ;;  %v2061_v23 = vadd.f32 0.4994258, %v2060_v31  ;;  %v2084_v15 = vadd.f32 0.00028619796, %v2083_v7  ;;  %v2095_v57 = vadd.f32 0.001143296, %v2094_v20 }
 0x162   : > { %v1051_v37 = vadd.f32 %v1019_v4, %v953_v32  ;;  %v2027_v29 = vmul.f32 %v3067_v42, %v2026_v21  ;;  %v2051_v16 = vmul.f32 %v2050_v48, %v4546_v13  ;;  %v631_v22 = vmul.f32 %v4425_v59, %v3248_v11 }
 0x163   : > { %v2685_v34 = vmul.f32 %v4125_v51, %v2649_v58  ;;  %v2062_v36 = vmul.f32 %v2061_v23, %v4546_v13  ;;  %v2085_v50 = vmul.f32 %v2084_v15, %v4605_v44  ;;  %v2096_v41 = vmul.f32 %v2095_v57, %v4605_v44  ;;  %v4648_v58 = vld [vmem:[#allocation2 + $0x18f] sm:$0xff] }
 0x164   : > { %v1148_v63 = vadd.f32 %v1116_v54, %v1051_v37  ;;  %v2028_v55 = vadd.f32 %v3067_v42, %v2027_v29  ;;  %v2036_v4 = vor.u32 1.1754944e-38, %v2035_v28  ;;  %v663_v51 = vadd.f32 %v631_v22, %v566_v5  ;;  %v4656_v15 = vld [vmem:[#allocation2 + $0x190] sm:$0xff] }
 0x165   : > { %v2721_v18 = vadd.f32 %v4140_v17, %v2685_v34  ;;  %v4631_v10 = vadd.f32 1.0, %v2062_v36  ;;  %v2086_v59 = vadd.f32 0.0036580483, %v2085_v50  ;;  %v2097_v2 = vadd.f32 0.014752088, %v2096_v41  ;;  %v4727_v41 = vld [vmem:[#allocation2 + $0x1a8] sm:$0xff] }
 0x166   : > { %v4633_v13 = vadd.f32 %v1213_v38, %v1148_v63  ;;  %v2013_v54 = vmul.f32 %v4575_v27, %v4456_v14  ;;  %v2032_v45 = vsel %vm2031_vm11, %v3067_v42, %v2028_v55  ;;  %vm2034_vm12 = vcmp.eq.f32.partialorder %v2033_v30, 8.507059e+37 }
 0x167   : > { %v2785_v49 = vadd.f32 %v2753_v61, %v2721_v18  ;;  %v2037_v17 = vsel %vm2034_vm12, %v2036_v4, %v2032_v45  ;;  %v2052_v31 = vadd.f32 1.1283791, %v2051_v16  ;;  %3068 = vrcp.f32 %v4631_v10 }
 0x168   : > { %v728_v53 = vmul.f32 %v4521_v19, %v3272_v26  ;;  %v2038_v28 = vmul.f32 %v2037_v17, %v2013_v54  ;;  %v2087_v7 = vmul.f32 %v2086_v59, %v4605_v44  ;;  %v2098_v38 = vmul.f32 %v2097_v2, %v4605_v44  ;;  %v4682_v2 = vld [vmem:[%s5366_s2] ss:$0 sm:$0xff] }
 0x169   : > { %2817 = vst.msk [vmem:[%s3632_s7 + $0x80] sm:$0xff] %vm274_vm0, %v2785_v49  ;;  %v2073_v20 = vand.u32 2147483647, %v4631_v10  ;;  %v4646_v14 = vmul.f32 0.70710677, %v4633_v13  ;;  %v1274_v21 = vmul.f32 0.5, %v4442_v9  ;;  %v2053_v48 = vmul.f32 %v2052_v31, %v4530_v56 }
 0x16a   : > { %v760_v27 = vadd.f32 %v728_v53, %v663_v51  ;;  %v2985_v30 = vclamps-f32 %v2038_v28, 1.0  ;;  %v2088_v42 = vadd.f32 0.05243302, %v2087_v7  ;;  %v2099_v32 = vadd.f32 0.112945676, %v2098_v38  ;;  %v2754_v31 = vld [vmem:[%s3220_s22 + $0x88] sm:$0xff] }
 0x16b   : > { %v2121_v5 = vmul.f32 %v4646_v14, %v4646_v14  ;;  %v825_v23 = vmul.f32 %v4534_v1, %v3281_v33  ;;  %vm2069_vm13 = vweird.f32 %v4631_v10  ;;  %v2075_v37 = vand.u32 2147483648, %v4631_v10  ;;  %v4689_v38 = vld [vmem:[#allocation2 + $0x191] sm:$0xff] }
 0x16c   : > { %v2618_v57 = vadd.f32 1.0, %v2985_v30  ;;  %v2089_v34 = vmul.f32 %v2088_v42, %v4605_v44  ;;  %v2100_v29 = vmul.f32 %v2099_v32, %v4605_v44  ;;  %v922_v22 = vmul.f32 %v4542_v52, %v3288_v40 }
 0x16d   : > { %v3069_v9 = vpop.eup %3068  ;;  %v4662_v16 = vmin.f32 %v2121_v5, 16.0  ;;  %v857_v56 = vadd.f32 %v825_v23, %v760_v27  ;;  %v1020_v61 = vmul.f32 %v3293_v46, %v4648_v58  ;;  %vm4669_vm14 = vcmp.eq.f32.partialorder %v2073_v20, 8.507059e+37  ;;  %v4694_v20 = vld [vmem:[%s5367_s3] ss:$0 sm:$0xff] }
 0x16e   : > { %v2650_v36 = vmul.f32 %v2618_v57, %v1274_v21  ;;  %v2065_v50 = vmul.f32 %v3069_v9, %v4631_v10  ;;  %v1117_v63 = vmul.f32 %v3295_v47, %v4656_v15  ;;  %v438_v18 = vmul.f32 %v4451_v39, %v3239_v6 }
 0x16f   : > { %v2101_v55 = vadd.f32 0.4994258, %v2100_v29  ;;  %v2123_v4 = vmul.f32 2.1237322e-06, %v4662_v16  ;;  %v2134_v51 = vmul.f32 3.8918573e-05, %v4662_v16  ;;  %v954_v59 = vadd.f32 %v922_v22, %v857_v56 }
 0x170   : > { %v2686_v49 = vmul.f32 %v4682_v2, %v2650_v36  ;;  %v2066_v54 = vsub.f32 1.0, %v2065_v50  ;;  %v2090_v45 = vadd.f32 0.18741608, %v2089_v34  ;;  %v535_v17 = vmul.f32 %v4453_v25, %v3241_v8 }
 0x171   : > { %v2102_v39 = vmul.f32 %v2101_v55, %v4605_v44  ;;  %v2124_v53 = vadd.f32 0.00028619796, %v2123_v4  ;;  %v2135_v28 = vadd.f32 0.001143296, %v2134_v51  ;;  %v1052_v7 = vadd.f32 %v1020_v61, %v954_v59 }
 0x172   : > { %v2722_v27 = vadd.f32 %v4694_v20, %v2686_v49  ;;  %v2067_v30 = vmul.f32 %v3069_v9, %v2066_v54  ;;  %vm2070_vm15 = vweird.f32 %v3069_v9  ;;  %v567_v42 = vadd.f32 %v535_v17, %v438_v18 }
 0x173   : > { %v4697_v25 = vadd.f32 1.0, %v2102_v39  ;;  %v2125_v32 = vmul.f32 %v2124_v53, %v4662_v16  ;;  %v2136_v21 = vmul.f32 %v2135_v28, %v4662_v16  ;;  %v1149_v5 = vadd.f32 %v1117_v63, %v1052_v7  ;;  %vm2071_vm1 = vmor %vm2069_vm13, %vm2070_vm15 }
 0x174   : > { %v2786_v23 = vadd.f32 %v2754_v31, %v2722_v27  ;;  %v2068_v57 = vadd.f32 %v3069_v9, %v2067_v30  ;;  %v2091_v34 = vmul.f32 %v2090_v45, %v4605_v44  ;;  %v1214_v29 = vmul.f32 %v4360_v60, %v4689_v38 }
 0x175   : > { %v2076_v56 = vor.u32 1.1754944e-38, %v2075_v37  ;;  %3070 = vrcp.f32 %v4697_v25  ;;  %v2115_v22 = vand.u32 2147483648, %v4697_v25  ;;  %v632_v61 = vmul.f32 %v4491_v0, %v3248_v11  ;;  %v4719_v0 = vld [vmem:[#allocation2 + $0x1a7] sm:$0xff] }
 0x176   : > { %2818 = vst.msk [vmem:[%s3632_s7 + $0x88] sm:$0xff] %vm274_vm0, %v2786_v23  ;;  %v2072_v36 = vsel %vm2071_vm1, %v3069_v9, %v2068_v57  ;;  %v2126_v50 = vadd.f32 0.0036580483, %v2125_v32  ;;  %v2137_v63 = vadd.f32 0.014752088, %v2136_v21  ;;  %v4712_v44 = vadd.f32 %v1214_v29, %v1149_v5 }
 0x177   : > { %v1275_v18 = vmul.f32 0.5, %v4513_v43  ;;  %v2077_v10 = vsel %vm4669_vm14, %v2076_v56, %v2072_v36  ;;  %v664_v37 = vadd.f32 %v632_v61, %v567_v42  ;;  %v2092_v4 = vadd.f32 1.1283791, %v2091_v34 }
 0x178   : > { %v2078_v55 = vmul.f32 %v2077_v10, %v2053_v48  ;;  %v2127_v51 = vmul.f32 %v2126_v50, %v4662_v16  ;;  %v2138_v59 = vmul.f32 %v2137_v63, %v4662_v16  ;;  %v2113_v9 = vand.u32 2147483647, %v4697_v25 }
 0x179   : > { %v2116_v49 = vor.u32 1.1754944e-38, %v2115_v22  ;;  %v4723_v54 = vmul.f32 0.70710677, %v4712_v44  ;;  %v729_v43 = vmul.f32 %v4582_v12, %v3272_v26  ;;  %vm2109_vm2 = vweird.f32 %v4697_v25 }
 0x17a   : > { %v2986_v45 = vclamps-f32 %v2078_v55, 1.0  ;;  %v2128_v48 = vadd.f32 0.05243302, %v2127_v51  ;;  %v2139_v17 = vadd.f32 0.112945676, %v2138_v59  ;;  %v826_v31 = vmul.f32 %v4584_v62, %v3281_v33  ;;  %v2755_v59 = vld [vmem:[%s3220_s22 + $0x90] sm:$0xff] }
 0x17b   : > { %v3071_v39 = vpop.eup %3070  ;;  %v2161_v53 = vmul.f32 %v4723_v54, %v4723_v54  ;;  %v761_v28 = vadd.f32 %v729_v43, %v664_v37  ;;  %v923_v7 = vmul.f32 %v4594_v3, %v3288_v40  ;;  %v1021_v27 = vmul.f32 %v3293_v46, %v4719_v0 }
 0x17c   : > { %v2619_v30 = vadd.f32 1.0, %v2986_v45  ;;  %v2105_v42 = vmul.f32 %v3071_v39, %v4697_v25  ;;  %v2129_v32 = vmul.f32 %v2128_v48, %v4662_v16  ;;  %v1118_v21 = vmul.f32 %v3295_v47, %v4727_v41 }
 0x17d   : > { %v2140_v5 = vmul.f32 %v2139_v17, %v4662_v16  ;;  %v4743_v23 = vmin.f32 %v2161_v53, 16.0  ;;  %v858_v57 = vadd.f32 %v826_v31, %v761_v28  ;;  %v439_v34 = vmul.f32 %v4521_v19, %v3239_v6  ;;  %v4756_v31 = vld [vmem:[#allocation2 + $0x1a9] sm:$0xff] }
 0x17e   : > { %v2651_v29 = vmul.f32 %v2619_v30, %v1275_v18  ;;  %v2106_v56 = vsub.f32 1.0, %v2105_v42  ;;  %v2130_v22 = vadd.f32 0.18741608, %v2129_v32  ;;  %v536_v61 = vmul.f32 %v4534_v1, %v3241_v8 }
 0x17f   : > { %v2141_v36 = vadd.f32 0.4994258, %v2140_v5  ;;  %v2163_v50 = vmul.f32 2.1237322e-06, %v4743_v23  ;;  %v2174_v63 = vmul.f32 3.8918573e-05, %v4743_v23  ;;  %v955_v10 = vadd.f32 %v923_v7, %v858_v57 }
 0x180   : > { %v2687_v37 = vmul.f32 %v4682_v2, %v2651_v29  ;;  %v2107_v55 = vmul.f32 %v3071_v39, %v2106_v56  ;;  %vm2110_vm3 = vweird.f32 %v3071_v39  ;;  %v568_v51 = vadd.f32 %v536_v61, %v439_v34 }
 0x181   : > { %v2142_v19 = vmul.f32 %v2141_v36, %v4662_v16  ;;  %v2164_v18 = vadd.f32 0.00028619796, %v2163_v50  ;;  %v2175_v43 = vadd.f32 0.001143296, %v2174_v63  ;;  %v1053_v45 = vadd.f32 %v1021_v27, %v955_v10  ;;  %vm2111_vm4 = vmor %vm2109_vm2, %vm2110_vm3  ;;  %v4781_v36 = vld [vmem:[#allocation2 + $0x1af] sm:$0xff] }
 0x182   : > { %v2723_v48 = vadd.f32 %v4694_v20, %v2687_v37  ;;  %v2108_v1 = vadd.f32 %v3071_v39, %v2107_v55  ;;  %v2131_v17 = vmul.f32 %v2130_v22, %v4662_v16  ;;  %v633_v53 = vmul.f32 %v4542_v52, %v3248_v11  ;;  %v4783_v50 = vld [vmem:[#allocation2 + $0x1b0] sm:$0xff] }
 0x183   : > { %v4762_v28 = vadd.f32 1.0, %v2142_v19  ;;  %v2165_v7 = vmul.f32 %v2164_v18, %v4743_v23  ;;  %v2176_v27 = vmul.f32 %v2175_v43, %v4743_v23  ;;  %v1150_v30 = vadd.f32 %v1118_v21, %v1053_v45  ;;  %v4790_v55 = vld [vmem:[#allocation2 + $0x1b1] sm:$0xff] }
 0x184   : > { %v2787_v42 = vadd.f32 %v2755_v59, %v2723_v48  ;;  %v2093_v32 = vmul.f32 %v2092_v4, %v4589_v35  ;;  %v2112_v16 = vsel %vm2111_vm4, %v3071_v39, %v2108_v1  ;;  %vm2114_vm5 = vcmp.eq.f32.partialorder %v2113_v9, 8.507059e+37 }
 0x185   : > { %v2117_v5 = vsel %vm2114_vm5, %v2116_v49, %v2112_v16  ;;  %3072 = vrcp.f32 %v4762_v28  ;;  %v1215_v52 = vmul.f32 %v4360_v60, %v4756_v31  ;;  %v665_v25 = vadd.f32 %v633_v53, %v568_v51 }
 0x186   : > { %2819 = vst.msk [vmem:[%s3632_s7 + $0x90] sm:$0xff] %vm274_vm0, %v2787_v42  ;;  %v2118_v57 = vmul.f32 %v2117_v5, %v2093_v32  ;;  %v2155_v34 = vand.u32 2147483648, %v4762_v28  ;;  %v2166_v29 = vadd.f32 0.0036580483, %v2165_v7  ;;  %v2177_v56 = vadd.f32 0.014752088, %v2176_v27 }
 0x187   : > { %v1276_v21 = vmul.f32 0.5, %v4570_v24  ;;  %v2132_v22 = vadd.f32 1.1283791, %v2131_v17  ;;  %v4774_v35 = vadd.f32 %v1215_v52, %v1150_v30  ;;  %v730_v4 = vmul.f32 %v4648_v58, %v3272_v26 }
 0x188   : > { %v2987_v9 = vclamps-f32 %v2118_v57, 1.0  ;;  %v2153_v49 = vand.u32 2147483647, %v4762_v28  ;;  %v2167_v39 = vmul.f32 %v2166_v29, %v4743_v23  ;;  %v2178_v61 = vmul.f32 %v2177_v56, %v4743_v23 }
 0x189   : > { %v2156_v63 = vor.u32 1.1754944e-38, %v2155_v34  ;;  %v4786_v24 = vmul.f32 0.70710677, %v4774_v35  ;;  %v762_v10 = vadd.f32 %v730_v4, %v665_v25  ;;  %v827_v37 = vmul.f32 %v4656_v15, %v3281_v33  ;;  %v2756_v25 = vld [vmem:[%s3220_s22 + $0x98] sm:$0xff] }
 0x18a   : > { %v2620_v51 = vadd.f32 1.0, %v2987_v9  ;;  %vm2149_vm6 = vweird.f32 %v4762_v28  ;;  %v2168_v59 = vadd.f32 0.05243302, %v2167_v39  ;;  %v2179_v19 = vadd.f32 0.112945676, %v2178_v61 }
 0x18b   : > { %v924_v18 = vmul.f32 %v4689_v38, %v3288_v40  ;;  %v3073_v43 = vpop.eup %3072  ;;  %v2201_v45 = vmul.f32 %v4786_v24, %v4786_v24  ;;  %v859_v48 = vadd.f32 %v827_v37, %v762_v10  ;;  %v1022_v1 = vmul.f32 %v3293_v46, %v4781_v36 }
 0x18c   : > { %v1119_v17 = vmul.f32 %v3295_v47, %v4783_v50  ;;  %v2652_v53 = vmul.f32 %v2620_v51, %v1276_v21  ;;  %v2145_v7 = vmul.f32 %v3073_v43, %v4762_v28  ;;  %v2169_v27 = vmul.f32 %v2168_v59, %v4743_v23 }
 0x18d   : > { %v1216_v30 = vmul.f32 %v4360_v60, %v4790_v55  ;;  %v2180_v42 = vmul.f32 %v2179_v19, %v4743_v23  ;;  %v4806_v32 = vmin.f32 %v2201_v45, 16.0  ;;  %v956_v16 = vadd.f32 %v924_v18, %v859_v48 }
 0x18e   : > { %v440_v5 = vmul.f32 %v4582_v12, %v3239_v6  ;;  %v2688_v52 = vmul.f32 %v4682_v2, %v2652_v53  ;;  %v2146_v57 = vsub.f32 1.0, %v2145_v7  ;;  %v2170_v34 = vadd.f32 0.18741608, %v2169_v27 }
 0x18f   : > { %v537_v29 = vmul.f32 %v4584_v62, %v3241_v8  ;;  %v2181_v56 = vadd.f32 0.4994258, %v2180_v42  ;;  %v2203_v21 = vmul.f32 2.1237322e-06, %v4806_v32  ;;  %v2214_v60 = vmul.f32 3.8918573e-05, %v4806_v32 }
 0x190   : > { %v1054_v4 = vadd.f32 %v1022_v1, %v956_v16  ;;  %v2724_v9 = vadd.f32 %v4694_v20, %v2688_v52  ;;  %v2147_v39 = vmul.f32 %v3073_v43, %v2146_v57  ;;  %vm2150_vm7 = vweird.f32 %v3073_v43  ;;  %v4838_v52 = vld [vmem:[#allocation2 + $0x1c8] sm:$0xff] }
 0x191   : > { %v569_v12 = vadd.f32 %v537_v29, %v440_v5  ;;  %v2182_v61 = vmul.f32 %v2181_v56, %v4743_v23  ;;  %v2204_v10 = vadd.f32 0.00028619796, %v2203_v21  ;;  %v2215_v37 = vadd.f32 0.001143296, %v2214_v60  ;;  %vm2151_vm8 = vmor %vm2149_vm6, %vm2150_vm7 }
 0x192   : > { %v1151_v51 = vadd.f32 %v1119_v17, %v1054_v4  ;;  %v2788_v59 = vadd.f32 %v2756_v25, %v2724_v9  ;;  %v2148_v19 = vadd.f32 %v3073_v43, %v2147_v39  ;;  %v2171_v62 = vmul.f32 %v2170_v34, %v4743_v23  ;;  %v4847_v34 = vld [vmem:[#allocation2 + $0x1c9] sm:$0xff] }
 0x193   : > { %v634_v18 = vmul.f32 %v4594_v3, %v3248_v11  ;;  %v4823_v45 = vadd.f32 1.0, %v2182_v61  ;;  %v2205_v48 = vmul.f32 %v2204_v10, %v4806_v32  ;;  %v2216_v1 = vmul.f32 %v2215_v37, %v4806_v32 }
 0x194   : > { %v4827_v53 = vadd.f32 %v1216_v30, %v1151_v51  ;;  %2820 = vst.msk [vmem:[%s3632_s7 + $0x98] sm:$0xff] %vm274_vm0, %v2788_v59  ;;  %v2133_v17 = vmul.f32 %v2132_v22, %v4646_v14  ;;  %v2152_v7 = vsel %vm2151_vm8, %v3073_v43, %v2148_v19  ;;  %vm2154_vm9 = vcmp.eq.f32.partialorder %v2153_v49, 8.507059e+37  ;;  %v4836_v30 = vld [vmem:[#allocation2 + $0x1c7] sm:$0xff] }
 0x195   : > { %v666_v23 = vadd.f32 %v634_v18, %v569_v12  ;;  %v1277_v3 = vmul.f32 0.5, %v4633_v13  ;;  %v2157_v27 = vsel %vm2154_vm9, %v2156_v63, %v2152_v7  ;;  %3074 = vrcp.f32 %v4823_v45  ;;  %v4865_v51 = vld [vmem:[%s5365_s1 + $0x8] ss:$0 sm:$0xff] }
 0x196   : > { %v731_v28 = vmul.f32 %v4719_v0, %v3272_v26  ;;  %v2158_v42 = vmul.f32 %v2157_v27, %v2133_v17  ;;  %v2206_v16 = vadd.f32 0.0036580483, %v2205_v48  ;;  %v2217_v5 = vadd.f32 0.014752088, %v2216_v1 }
 0x197   : > { %v2172_v25 = vadd.f32 1.1283791, %v2171_v62  ;;  %v2193_v14 = vand.u32 2147483647, %v4823_v45  ;;  %v4842_v22 = vmul.f32 0.70710677, %v4827_v53  ;;  %v828_v56 = vmul.f32 %v4727_v41, %v3281_v33 }
 0x198   : > { %v763_v13 = vadd.f32 %v731_v28, %v666_v23  ;;  %v2988_v49 = vclamps-f32 %v2158_v42, 1.0  ;;  %v2195_v63 = vand.u32 2147483648, %v4823_v45  ;;  %v2207_v43 = vmul.f32 %v2206_v16, %v4806_v32  ;;  %v2757_v28 = vld [vmem:[%s3220_s22 + $0xa0] sm:$0xff] }
 0x199   : > { %v2218_v57 = vmul.f32 %v2217_v5, %v4806_v32  ;;  %v2241_v29 = vmul.f32 %v4842_v22, %v4842_v22  ;;  %v925_v21 = vmul.f32 %v4756_v31, %v3288_v40  ;;  %v1023_v60 = vmul.f32 %v3293_v46, %v4836_v30 }
 0x19a   : > { %v2621_v4 = vadd.f32 1.0, %v2988_v49  ;;  %vm2189_vm10 = vweird.f32 %v4823_v45  ;;  %v2208_v9 = vadd.f32 0.05243302, %v2207_v43  ;;  %v1120_v12 = vmul.f32 %v3295_v47, %v4838_v52 }
 0x19b   : > { %v2219_v39 = vadd.f32 0.112945676, %v2218_v57  ;;  %v3075_v61 = vpop.eup %3074  ;;  %v4860_v10 = vmin.f32 %v2241_v29, 16.0  ;;  %v860_v37 = vadd.f32 %v828_v56, %v763_v13  ;;  %v1217_v59 = vmul.f32 %v4865_v51, %v4847_v34 }
 0x19c   : > { %v441_v19 = vmul.f32 %v4648_v58, %v3239_v6  ;;  %v2653_v62 = vmul.f32 %v2621_v4, %v1277_v3  ;;  %v2185_v18 = vmul.f32 %v3075_v61, %v4823_v45  ;;  %vm2190_vm11 = vweird.f32 %v3075_v61 }
 0x19d   : > { %v2209_v48 = vmul.f32 %v2208_v9, %v4806_v32  ;;  %v2220_v1 = vmul.f32 %v2219_v39, %v4806_v32  ;;  %v2243_v17 = vmul.f32 2.1237322e-06, %v4860_v10  ;;  %v2254_v7 = vmul.f32 3.8918573e-05, %v4860_v10  ;;  %vm2191_vm12 = vmor %vm2189_vm10, %vm2190_vm11 }
 0x19e   : > { %v957_v23 = vadd.f32 %v925_v21, %v860_v37  ;;  %v2689_v27 = vmul.f32 %v4682_v2, %v2653_v62  ;;  %v2186_v42 = vsub.f32 1.0, %v2185_v18  ;;  %v538_v58 = vmul.f32 %v4656_v15, %v3241_v8 }
 0x19f   : > { %v2210_v16 = vadd.f32 0.18741608, %v2209_v48  ;;  %v2221_v3 = vadd.f32 0.4994258, %v2220_v1  ;;  %v2244_v5 = vadd.f32 0.00028619796, %v2243_v17 }
 0x1a0   : > { %v2255_v13 = vadd.f32 0.001143296, %v2254_v7  ;;  %v1055_v49 = vadd.f32 %v1023_v60, %v957_v23  ;;  %v2725_v43 = vadd.f32 %v4694_v20, %v2689_v27  ;;  %v2187_v57 = vmul.f32 %v3075_v61, %v2186_v42  ;;  %v4906_v42 = vld [vmem:[#allocation2 + $0x1cf] sm:$0xff] }
 0x1a1   : > { %v2211_v29 = vmul.f32 %v2210_v16, %v4806_v32  ;;  %v570_v56 = vadd.f32 %v538_v58, %v441_v19  ;;  %v2222_v21 = vmul.f32 %v2221_v3, %v4806_v32  ;;  %v2245_v4 = vmul.f32 %v2244_v5, %v4860_v10 }
 0x1a2   : > { %v2256_v9 = vmul.f32 %v2255_v13, %v4860_v10  ;;  %v1152_v39 = vadd.f32 %v1120_v12, %v1055_v49  ;;  %v2789_v37 = vadd.f32 %v2757_v28, %v2725_v43  ;;  %v2188_v15 = vadd.f32 %v3075_v61, %v2187_v57  ;;  %v4914_v13 = vld [vmem:[#allocation2 + $0x1d0] sm:$0xff] }
 0x1a3   : > { %v2196_v62 = vor.u32 1.1754944e-38, %v2195_v63  ;;  %v635_v60 = vmul.f32 %v4689_v38, %v3248_v11  ;;  %v4890_v18 = vadd.f32 1.0, %v2222_v21  ;;  %v2246_v19 = vadd.f32 0.0036580483, %v2245_v4 }
 0x1a4   : > { %v2257_v48 = vadd.f32 0.014752088, %v2256_v9  ;;  %v4892_v32 = vadd.f32 %v1217_v59, %v1152_v39  ;;  %2821 = vst.msk [vmem:[%s3632_s7 + $0xa0] sm:$0xff] %vm274_vm0, %v2789_v37  ;;  %v2173_v12 = vmul.f32 %v2172_v25, %v4723_v54  ;;  %v2192_v1 = vsel %vm2191_vm12, %v3075_v61, %v2188_v15  ;;  %v4975_v37 = vld [vmem:[#allocation2 + $0x1e8] sm:$0xff] }
 0x1a5   : > { %vm2194_vm13 = vcmp.eq.f32.partialorder %v2193_v14, 8.507059e+37  ;;  %v667_v63 = vadd.f32 %v635_v60, %v570_v56  ;;  %v2212_v7 = vadd.f32 1.1283791, %v2211_v29  ;;  %3076 = vrcp.f32 %v4890_v18 }
 0x1a6   : > { %v2197_v17 = vsel %vm2194_vm13, %v2196_v62, %v2192_v1  ;;  %v732_v38 = vmul.f32 %v4781_v36, %v3272_v26  ;;  %v2247_v23 = vmul.f32 %v2246_v19, %v4860_v10  ;;  %v2258_v59 = vmul.f32 %v2257_v48, %v4860_v10 }
 0x1a7   : > { %v2198_v45 = vmul.f32 %v2197_v17, %v2173_v12  ;;  %v2233_v27 = vand.u32 2147483647, %v4890_v18  ;;  %v4904_v28 = vmul.f32 0.70710677, %v4892_v32  ;;  %v1278_v16 = vmul.f32 0.5, %v4712_v44 }
 0x1a8   : > { %v764_v54 = vadd.f32 %v732_v38, %v667_v63  ;;  %v2248_v14 = vadd.f32 0.05243302, %v2247_v23  ;;  %v2259_v61 = vadd.f32 0.112945676, %v2258_v59  ;;  %v2213_v58 = vmul.f32 %v2212_v7, %v4786_v24  ;;  %v2758_v38 = vld [vmem:[%s3220_s22 + $0xa8] sm:$0xff] }
 0x1a9   : > { %v2989_v25 = vclamps-f32 %v2198_v45, 1.0  ;;  %v2281_v3 = vmul.f32 %v4904_v28, %v4904_v28  ;;  %v829_v5 = vmul.f32 %v4783_v50, %v3281_v33  ;;  %vm2229_vm14 = vweird.f32 %v4890_v18 }
 0x1aa   : > { %v2235_v43 = vand.u32 2147483648, %v4890_v18  ;;  %v2249_v57 = vmul.f32 %v2248_v14, %v4860_v10  ;;  %v2260_v29 = vmul.f32 %v2259_v61, %v4860_v10  ;;  %v926_v21 = vmul.f32 %v4790_v55, %v3288_v40 }
 0x1ab   : > { %v2622_v49 = vadd.f32 1.0, %v2989_v25  ;;  %v3077_v44 = vpop.eup %3076  ;;  %v4920_v56 = vmin.f32 %v2281_v3, 16.0  ;;  %v861_v24 = vadd.f32 %v829_v5, %v764_v54  ;;  %v1024_v4 = vmul.f32 %v3293_v46, %v4906_v42 }
 0x1ac   : > { %v2225_v39 = vmul.f32 %v3077_v44, %v4890_v18  ;;  %vm4927_vm15 = vcmp.eq.f32.partialorder %v2233_v27, 8.507059e+37  ;;  %v1121_v15 = vmul.f32 %v3295_v47, %v4914_v13  ;;  %v442_v62 = vmul.f32 %v4719_v0, %v3239_v6  ;;  %v4942_v0 = vld [vmem:[#allocation2 + $0x1d1] sm:$0xff] }
 0x1ad   : > { %v2654_v9 = vmul.f32 %v2622_v49, %v1278_v16  ;;  %v2261_v60 = vadd.f32 0.4994258, %v2260_v29  ;;  %v2283_v19 = vmul.f32 2.1237322e-06, %v4920_v56  ;;  %v2294_v48 = vmul.f32 3.8918573e-05, %v4920_v56 }
 0x1ae   : > { %v958_v12 = vadd.f32 %v926_v21, %v861_v24  ;;  %v2226_v63 = vsub.f32 1.0, %v2225_v39  ;;  %v2250_v17 = vadd.f32 0.18741608, %v2249_v57  ;;  %v539_v7 = vmul.f32 %v4727_v41, %v3241_v8 }
 0x1af   : > { %v2690_v1 = vmul.f32 %v4682_v2, %v2654_v9  ;;  %v2262_v45 = vmul.f32 %v2261_v60, %v4860_v10  ;;  %v2284_v23 = vadd.f32 0.00028619796, %v2283_v19  ;;  %v2295_v59 = vadd.f32 0.001143296, %v2294_v48 }
 0x1b0   : > { %v1056_v27 = vadd.f32 %v1024_v4, %v958_v12  ;;  %v2227_v25 = vmul.f32 %v3077_v44, %v2226_v63  ;;  %vm2230_vm1 = vweird.f32 %v3077_v44  ;;  %v571_v14 = vadd.f32 %v539_v7, %v442_v62 }
 0x1b1   : > { %v2726_v54 = vadd.f32 %v4694_v20, %v2690_v1  ;;  %v4945_v61 = vadd.f32 1.0, %v2262_v45  ;;  %v2285_v16 = vmul.f32 %v2284_v23, %v4920_v56  ;;  %v2296_v41 = vmul.f32 %v2295_v59, %v4920_v56  ;;  %vm2231_vm2 = vmor %vm2229_vm14, %vm2230_vm1 }
 0x1b2   : > { %v1153_v3 = vadd.f32 %v1121_v15, %v1056_v27  ;;  %v2228_v49 = vadd.f32 %v3077_v44, %v2227_v25  ;;  %v2251_v57 = vmul.f32 %v2250_v17, %v4860_v10  ;;  %v1218_v29 = vmul.f32 %v4865_v51, %v4942_v0 }
 0x1b3   : > { %v2790_v5 = vadd.f32 %v2758_v38, %v2726_v54  ;;  %v2236_v24 = vor.u32 1.1754944e-38, %v2235_v43  ;;  %3078 = vrcp.f32 %v4945_v61  ;;  %v2275_v21 = vand.u32 2147483648, %v4945_v61 }
 0x1b4   : > { %v636_v4 = vmul.f32 %v4756_v31, %v3248_v11  ;;  %v2232_v9 = vsel %vm2231_vm2, %v3077_v44, %v2228_v49  ;;  %v2286_v39 = vadd.f32 0.0036580483, %v2285_v16  ;;  %v2297_v15 = vadd.f32 0.014752088, %v2296_v41  ;;  %v4967_v31 = vld [vmem:[#allocation2 + $0x1e7] sm:$0xff] }
 0x1b5   : > { %2822 = vst.msk [vmem:[%s3632_s7 + $0xa8] sm:$0xff] %vm274_vm0, %v2790_v5  ;;  %v4960_v10 = vadd.f32 %v1218_v29, %v1153_v3  ;;  %v1279_v62 = vmul.f32 0.5, %v4774_v35  ;;  %v2237_v18 = vsel %vm4927_vm15, %v2236_v24, %v2232_v9  ;;  %v2252_v19 = vadd.f32 1.1283791, %v2251_v57 }
 0x1b6   : > { %v668_v43 = vadd.f32 %v636_v4, %v571_v14  ;;  %v2238_v60 = vmul.f32 %v2237_v18, %v2213_v58  ;;  %v2287_v48 = vmul.f32 %v2286_v39, %v4920_v56  ;;  %v2298_v12 = vmul.f32 %v2297_v15, %v4920_v56 }
 0x1b7   : > { %v2273_v44 = vand.u32 2147483647, %v4945_v61  ;;  %v2276_v1 = vor.u32 1.1754944e-38, %v2275_v21  ;;  %v4971_v63 = vmul.f32 0.70710677, %v4960_v10  ;;  %v733_v35 = vmul.f32 %v4836_v30, %v3272_v26 }
 0x1b8   : > { %v2990_v17 = vclamps-f32 %v2238_v60, 1.0  ;;  %vm2269_vm3 = vweird.f32 %v4945_v61  ;;  %v2288_v58 = vadd.f32 0.05243302, %v2287_v48  ;;  %v2299_v7 = vadd.f32 0.112945676, %v2298_v12  ;;  %v2759_v12 = vld [vmem:[%s3220_s22 + $0xb0] sm:$0xff] }
 0x1b9   : > { %v830_v38 = vmul.f32 %v4838_v52, %v3281_v33  ;;  %v3079_v45 = vpop.eup %3078  ;;  %v2321_v23 = vmul.f32 %v4971_v63, %v4971_v63  ;;  %v765_v59 = vadd.f32 %v733_v35, %v668_v43  ;;  %v927_v27 = vmul.f32 %v4847_v34, %v3288_v40 }
 0x1ba   : > { %v1025_v54 = vmul.f32 %v3293_v46, %v4967_v31  ;;  %v2623_v25 = vadd.f32 1.0, %v2990_v17  ;;  %v2265_v14 = vmul.f32 %v3079_v45, %v4945_v61  ;;  %v2289_v16 = vmul.f32 %v2288_v58, %v4920_v56 }
 0x1bb   : > { %v1122_v41 = vmul.f32 %v3295_v47, %v4975_v37  ;;  %v2300_v3 = vmul.f32 %v2299_v7, %v4920_v56  ;;  %v4991_v5 = vmin.f32 %v2321_v23, 16.0  ;;  %v862_v49 = vadd.f32 %v830_v38, %v765_v59  ;;  %v5004_v38 = vld [vmem:[#allocation2 + $0x1e9] sm:$0xff] }
 0x1bc   : > { %v443_v57 = vmul.f32 %v4781_v36, %v3239_v6  ;;  %v2655_v29 = vmul.f32 %v2623_v25, %v1279_v62  ;;  %v2266_v24 = vsub.f32 1.0, %v2265_v14  ;;  %v2290_v21 = vadd.f32 0.18741608, %v2289_v16 }
 0x1bd   : > { %v540_v4 = vmul.f32 %v4783_v50, %v3241_v8  ;;  %v2301_v9 = vadd.f32 0.4994258, %v2300_v3  ;;  %v2323_v39 = vmul.f32 2.1237322e-06, %v4991_v5  ;;  %v2334_v15 = vmul.f32 3.8918573e-05, %v4991_v5 }
 0x1be   : > { %v959_v18 = vadd.f32 %v927_v27, %v862_v49  ;;  %v2691_v43 = vmul.f32 %v4682_v2, %v2655_v29  ;;  %v2267_v60 = vmul.f32 %v3079_v45, %v2266_v24  ;;  %vm2270_vm4 = vweird.f32 %v3079_v45 }
 0x1bf   : > { %v572_v48 = vadd.f32 %v540_v4, %v443_v57  ;;  %v2302_v36 = vmul.f32 %v2301_v9, %v4920_v56  ;;  %v2324_v62 = vadd.f32 0.00028619796, %v2323_v39  ;;  %v2335_v35 = vadd.f32 0.001143296, %v2334_v15  ;;  %vm2271_vm5 = vmor %vm2269_vm3, %vm2270_vm4  ;;  %v5029_v9 = vld [vmem:[#allocation2 + $0x1ef] sm:$0xff] }
 0x1c0   : > { %v1057_v17 = vadd.f32 %v1025_v54, %v959_v18  ;;  %v2727_v58 = vadd.f32 %v4694_v20, %v2691_v43  ;;  %v2268_v50 = vadd.f32 %v3079_v45, %v2267_v60  ;;  %v2291_v7 = vmul.f32 %v2290_v21, %v4920_v56  ;;  %v5031_v39 = vld [vmem:[#allocation2 + $0x1f0] sm:$0xff] }
 0x1c1   : > { %v637_v23 = vmul.f32 %v4790_v55, %v3248_v11  ;;  %v5010_v59 = vadd.f32 1.0, %v2302_v36  ;;  %v2325_v27 = vmul.f32 %v2324_v62, %v4991_v5  ;;  %v2336_v54 = vmul.f32 %v2335_v35, %v4991_v5  ;;  %v5038_v60 = vld [vmem:[#allocation2 + $0x1f1] sm:$0xff] }
 0x1c2   : > { %v1154_v25 = vadd.f32 %v1122_v41, %v1057_v17  ;;  %v2791_v14 = vadd.f32 %v2759_v12, %v2727_v58  ;;  %v2253_v16 = vmul.f32 %v2252_v19, %v4842_v22  ;;  %v2272_v56 = vsel %vm2271_vm5, %v3079_v45, %v2268_v50 }
 0x1c3   : > { %vm2274_vm6 = vcmp.eq.f32.partialorder %v2273_v44, 8.507059e+37  ;;  %3080 = vrcp.f32 %v5010_v59  ;;  %v1219_v55 = vmul.f32 %v4865_v51, %v5004_v38  ;;  %v669_v61 = vadd.f32 %v637_v23, %v572_v48 }
 0x1c4   : > { %v2277_v3 = vsel %vm2274_vm6, %v2276_v1, %v2272_v56  ;;  %2823 = vst.msk [vmem:[%s3632_s7 + $0xb0] sm:$0xff] %vm274_vm0, %v2791_v14  ;;  %v2315_v57 = vand.u32 2147483648, %v5010_v59  ;;  %v2326_v29 = vadd.f32 0.0036580483, %v2325_v27  ;;  %v2337_v24 = vadd.f32 0.014752088, %v2336_v54 }
 0x1c5   : > { %v2278_v49 = vmul.f32 %v2277_v3, %v2253_v16  ;;  %v1280_v41 = vmul.f32 0.5, %v4827_v53  ;;  %v2292_v21 = vadd.f32 1.1283791, %v2291_v7  ;;  %v5022_v22 = vadd.f32 %v1219_v55, %v1154_v25 }
 0x1c6   : > { %v734_v19 = vmul.f32 %v4906_v42, %v3272_v26  ;;  %v2313_v1 = vand.u32 2147483647, %v5010_v59  ;;  %v2327_v45 = vmul.f32 %v2326_v29, %v4991_v5  ;;  %v2338_v4 = vmul.f32 %v2337_v24, %v4991_v5 }
 0x1c7   : > { %v2991_v44 = vclamps-f32 %v2278_v49, 1.0  ;;  %v2316_v15 = vor.u32 1.1754944e-38, %v2315_v57  ;;  %v5034_v53 = vmul.f32 0.70710677, %v5022_v22  ;;  %v831_v43 = vmul.f32 %v4914_v13, %v3281_v33 }
 0x1c8   : > { %v766_v18 = vadd.f32 %v734_v19, %v669_v61  ;;  %vm2309_vm7 = vweird.f32 %v5010_v59  ;;  %v2328_v12 = vadd.f32 0.05243302, %v2327_v45  ;;  %v2339_v36 = vadd.f32 0.112945676, %v2338_v4  ;;  %v2760_v61 = vld [vmem:[%s3220_s22 + $0xb8] sm:$0xff] }
 0x1c9   : > { %v2624_v48 = vadd.f32 1.0, %v2991_v44  ;;  %v928_v62 = vmul.f32 %v4942_v0, %v3288_v40  ;;  %v3081_v35 = vpop.eup %3080  ;;  %v2361_v17 = vmul.f32 %v5034_v53, %v5034_v53  ;;  %v1026_v50 = vmul.f32 %v3293_v46, %v5029_v9 }
 0x1ca   : > { %v863_v58 = vadd.f32 %v831_v43, %v766_v18  ;;  %v1123_v7 = vmul.f32 %v3295_v47, %v5031_v39  ;;  %v2305_v27 = vmul.f32 %v3081_v35, %v5010_v59  ;;  %v2329_v54 = vmul.f32 %v2328_v12, %v4991_v5 }
 0x1cb   : > { %v2656_v23 = vmul.f32 %v2624_v48, %v1280_v41  ;;  %v1220_v25 = vmul.f32 %v4865_v51, %v5038_v60  ;;  %v2340_v14 = vmul.f32 %v2339_v36, %v4991_v5  ;;  %v5054_v16 = vmin.f32 %v2361_v17, 16.0 }
 0x1cc   : > { %v960_v56 = vadd.f32 %v928_v62, %v863_v58  ;;  %v444_v3 = vmul.f32 %v4836_v30, %v3239_v6  ;;  %v2306_v49 = vsub.f32 1.0, %v2305_v27  ;;  %v2330_v57 = vadd.f32 0.18741608, %v2329_v54 }
 0x1cd   : > { %v2692_v55 = vmul.f32 %v4682_v2, %v2656_v23  ;;  %v541_v29 = vmul.f32 %v4838_v52, %v3241_v8  ;;  %v2341_v24 = vadd.f32 0.4994258, %v2340_v14  ;;  %v2363_v41 = vmul.f32 2.1237322e-06, %v5054_v16 }
 0x1ce   : > { %v2374_v19 = vmul.f32 3.8918573e-05, %v5054_v16  ;;  %v1058_v44 = vadd.f32 %v1026_v50, %v960_v56  ;;  %v2307_v4 = vmul.f32 %v3081_v35, %v2306_v49  ;;  %vm2310_vm8 = vweird.f32 %v3081_v35 }
 0x1cf   : > { %v2728_v45 = vadd.f32 %v4694_v20, %v2692_v55  ;;  %v573_v30 = vadd.f32 %v541_v29, %v444_v3  ;;  %v2342_v18 = vmul.f32 %v2341_v24, %v4991_v5  ;;  %v2364_v43 = vadd.f32 0.00028619796, %v2363_v41  ;;  %vm2311_vm9 = vmor %vm2309_vm7, %vm2310_vm8  ;;  %v5095_v29 = vld [vmem:[#allocation2 + $0x209] sm:$0xff] }
 0x1d0   : > { %v2375_v48 = vadd.f32 0.001143296, %v2374_v19  ;;  %v1155_v12 = vadd.f32 %v1123_v7, %v1058_v44  ;;  %v2308_v62 = vadd.f32 %v3081_v35, %v2307_v4  ;;  %v2331_v52 = vmul.f32 %v2330_v57, %v4991_v5 }
 0x1d1   : > { %v2792_v36 = vadd.f32 %v2760_v61, %v2728_v45  ;;  %v638_v17 = vmul.f32 %v4847_v34, %v3248_v11  ;;  %v5071_v58 = vadd.f32 1.0, %v2342_v18  ;;  %v2365_v50 = vmul.f32 %v2364_v43, %v5054_v16  ;;  %v5086_v61 = vld [vmem:[#allocation2 + $0x208] sm:$0xff] }
 0x1d2   : > { %v2376_v23 = vmul.f32 %v2375_v48, %v5054_v16  ;;  %v5075_v27 = vadd.f32 %v1220_v25, %v1155_v12  ;;  %v2293_v7 = vmul.f32 %v2292_v21, %v4904_v28  ;;  %v2312_v54 = vsel %vm2311_vm9, %v3081_v35, %v2308_v62  ;;  %v5084_v25 = vld [vmem:[#allocation2 + $0x207] sm:$0xff] }
 0x1d3   : > { %2824 = vst.msk [vmem:[%s3632_s7 + $0xb8] sm:$0xff] %vm274_vm0, %v2792_v36  ;;  %vm2314_vm10 = vcmp.eq.f32.partialorder %v2313_v1, 8.507059e+37  ;;  %v670_v5 = vadd.f32 %v638_v17, %v573_v30  ;;  %v1281_v34 = vmul.f32 0.5, %v4892_v32  ;;  %3082 = vrcp.f32 %v5071_v58 }
 0x1d4   : > { %v2317_v14 = vsel %vm2314_vm10, %v2316_v15, %v2312_v54  ;;  %v735_v59 = vmul.f32 %v4967_v31, %v3272_v26  ;;  %v2366_v3 = vadd.f32 0.0036580483, %v2365_v50  ;;  %v2377_v55 = vadd.f32 0.014752088, %v2376_v23 }
 0x1d5   : > { %v2318_v56 = vmul.f32 %v2317_v14, %v2293_v7  ;;  %v2332_v49 = vadd.f32 1.1283791, %v2331_v52  ;;  %v2353_v28 = vand.u32 2147483647, %v5071_v58  ;;  %v5090_v21 = vmul.f32 0.70710677, %v5075_v27 }
 0x1d6   : > { %v767_v32 = vadd.f32 %v735_v59, %v670_v5  ;;  %v2355_v15 = vand.u32 2147483648, %v5071_v58  ;;  %v2367_v35 = vmul.f32 %v2366_v3, %v5054_v16  ;;  %v2378_v57 = vmul.f32 %v2377_v55, %v5054_v16  ;;  %v2761_v59 = vld [vmem:[%s3220_s22 + $0xc0] sm:$0xff] }
 0x1d7   : > { %v2992_v1 = vclamps-f32 %v2318_v56, 1.0  ;;  %v2401_v24 = vmul.f32 %v5090_v21, %v5090_v21  ;;  %v832_v41 = vmul.f32 %v4975_v37, %v3281_v33  ;;  %v929_v19 = vmul.f32 %v5004_v38, %v3288_v40 }
 0x1d8   : > { %v1027_v44 = vmul.f32 %v3293_v46, %v5084_v25  ;;  %vm2349_vm11 = vweird.f32 %v5071_v58  ;;  %v2368_v4 = vadd.f32 0.05243302, %v2367_v35  ;;  %v2379_v30 = vadd.f32 0.112945676, %v2378_v57 }
 0x1d9   : > { %v2625_v45 = vadd.f32 1.0, %v2992_v1  ;;  %v1124_v18 = vmul.f32 %v3295_v47, %v5086_v61  ;;  %v3083_v43 = vpop.eup %3082  ;;  %v5108_v48 = vmin.f32 %v2401_v24, 16.0  ;;  %v864_v12 = vadd.f32 %v832_v41, %v767_v32 }
 0x1da   : > { %v1221_v36 = vmul.f32 %v4865_v51, %v5095_v29  ;;  %v445_v62 = vmul.f32 %v4906_v42, %v3239_v6  ;;  %v2345_v17 = vmul.f32 %v3083_v43, %v5071_v58  ;;  %vm2350_vm12 = vweird.f32 %v3083_v43 }
 0x1db   : > { %v2657_v52 = vmul.f32 %v2625_v45, %v1281_v34  ;;  %v2369_v50 = vmul.f32 %v2368_v4, %v5054_v16  ;;  %v2380_v23 = vmul.f32 %v2379_v30, %v5054_v16  ;;  %v2403_v7 = vmul.f32 2.1237322e-06, %v5108_v48  ;;  %vm2351_vm13 = vmor %vm2349_vm11, %vm2350_vm12 }
 0x1dc   : > { %v2414_v54 = vmul.f32 3.8918573e-05, %v5108_v48  ;;  %v961_v5 = vadd.f32 %v929_v19, %v864_v12  ;;  %v2346_v56 = vsub.f32 1.0, %v2345_v17  ;;  %v542_v42 = vmul.f32 %v4914_v13, %v3241_v8 }
 0x1dd   : > { %v2693_v14 = vmul.f32 %v4682_v2, %v2657_v52  ;;  %v2370_v3 = vadd.f32 0.18741608, %v2369_v50  ;;  %v2381_v34 = vadd.f32 0.4994258, %v2380_v23  ;;  %v2404_v55 = vadd.f32 0.00028619796, %v2403_v7 }
 0x1de   : > { %v2415_v32 = vadd.f32 0.001143296, %v2414_v54  ;;  %v1059_v1 = vadd.f32 %v1027_v44, %v961_v5  ;;  %v2347_v57 = vmul.f32 %v3083_v43, %v2346_v56  ;;  %v574_v41 = vadd.f32 %v542_v42, %v445_v62 }
 0x1df   : > { %v2729_v35 = vadd.f32 %v4694_v20, %v2693_v14  ;;  %v2371_v24 = vmul.f32 %v2370_v3, %v5054_v16  ;;  %v2382_v19 = vmul.f32 %v2381_v34, %v5054_v16  ;;  %v2405_v2 = vmul.f32 %v2404_v55, %v5108_v48  ;;  %v5149_v14 = vld [vmem:[#allocation2 + $0x20f] sm:$0xff] }
 0x1e0   : > { %v2416_v45 = vmul.f32 %v2415_v32, %v5108_v48  ;;  %v1156_v4 = vadd.f32 %v1124_v18, %v1059_v1  ;;  %v2348_v13 = vadd.f32 %v3083_v43, %v2347_v57  ;;  %v2356_v12 = vor.u32 1.1754944e-38, %v2355_v15  ;;  %v5157_v34 = vld [vmem:[#allocation2 + $0x210] sm:$0xff] }
 0x1e1   : > { %v2793_v30 = vadd.f32 %v2761_v59, %v2729_v35  ;;  %v639_v44 = vmul.f32 %v4942_v0, %v3248_v11  ;;  %v5133_v20 = vadd.f32 1.0, %v2382_v19  ;;  %v2406_v62 = vadd.f32 0.0036580483, %v2405_v2 }
 0x1e2   : > { %v2417_v52 = vadd.f32 0.014752088, %v2416_v45  ;;  %v5135_v16 = vadd.f32 %v1221_v36, %v1156_v4  ;;  %v2333_v18 = vmul.f32 %v2332_v49, %v4971_v63  ;;  %v2352_v17 = vsel %vm2351_vm13, %v3083_v43, %v2348_v13 }
 0x1e3   : > { %2825 = vst.msk [vmem:[%s3632_s7 + $0xc0] sm:$0xff] %vm274_vm0, %v2793_v30  ;;  %vm2354_vm14 = vcmp.eq.f32.partialorder %v2353_v28, 8.507059e+37  ;;  %v671_v15 = vadd.f32 %v639_v44, %v574_v41  ;;  %v2372_v23 = vadd.f32 1.1283791, %v2371_v24  ;;  %3084 = vrcp.f32 %v5133_v20 }
 0x1e4   : > { %v2357_v50 = vsel %vm2354_vm14, %v2356_v12, %v2352_v17  ;;  %v736_v0 = vmul.f32 %v5029_v9, %v3272_v26  ;;  %v2407_v7 = vmul.f32 %v2406_v62, %v5108_v48  ;;  %v2418_v36 = vmul.f32 %v2417_v52, %v5108_v48  ;;  %v5183_v52 = vld [vmem:[%s5366_s2] ss:$0 sm:$0xff] }
 0x1e5   : > { %v2358_v58 = vmul.f32 %v2357_v50, %v2333_v18  ;;  %v2393_v54 = vand.u32 2147483647, %v5133_v20  ;;  %v5147_v5 = vmul.f32 0.70710677, %v5135_v16  ;;  %v1282_v59 = vmul.f32 0.5, %v4960_v10 }
 0x1e6   : > { %v768_v63 = vadd.f32 %v736_v0, %v671_v15  ;;  %v2408_v28 = vadd.f32 0.05243302, %v2407_v7  ;;  %v2419_v43 = vadd.f32 0.112945676, %v2418_v36  ;;  %v2373_v56 = vmul.f32 %v2372_v23, %v5034_v53  ;;  %v2762_v23 = vld [vmem:[%s3220_s22 + $0xc8] sm:$0xff]  ;;  %v5190_v36 = vld [vmem:[#allocation2 + $0x211] sm:$0xff] }
 0x1e7   : > { %v2993_v49 = vclamps-f32 %v2358_v58, 1.0  ;;  %v2441_v3 = vmul.f32 %v5147_v5, %v5147_v5  ;;  %v833_v42 = vmul.f32 %v5031_v39, %v3281_v33  ;;  %vm2389_vm15 = vweird.f32 %v5133_v20 }
 0x1e8   : > { %v2395_v32 = vand.u32 2147483648, %v5133_v20  ;;  %v2409_v1 = vmul.f32 %v2408_v28, %v5108_v48  ;;  %v2420_v35 = vmul.f32 %v2419_v43, %v5108_v48  ;;  %v930_v24 = vmul.f32 %v5038_v60, %v3288_v40 }
 0x1e9   : > { %v2626_v55 = vadd.f32 1.0, %v2993_v49  ;;  %v3085_v10 = vpop.eup %3084  ;;  %v5163_v57 = vmin.f32 %v2441_v3, 16.0  ;;  %v865_v53 = vadd.f32 %v833_v42, %v768_v63  ;;  %v1028_v41 = vmul.f32 %v3293_v46, %v5149_v14 }
 0x1ea   : > { %v2385_v2 = vmul.f32 %v3085_v10, %v5133_v20  ;;  %vm5170_vm1 = vcmp.eq.f32.partialorder %v2393_v54, 8.507059e+37  ;;  %v1125_v4 = vmul.f32 %v3295_v47, %v5157_v34  ;;  %v446_v30 = vmul.f32 %v4967_v31, %v3239_v6  ;;  %v5195_v54 = vld [vmem:[%s5367_s3] ss:$0 sm:$0xff] }
 0x1eb   : > { %v2658_v19 = vmul.f32 %v2626_v55, %v1282_v59  ;;  %v2421_v13 = vadd.f32 0.4994258, %v2420_v35  ;;  %v2443_v12 = vmul.f32 2.1237322e-06, %v5163_v57  ;;  %v2454_v44 = vmul.f32 3.8918573e-05, %v5163_v57 }
 0x1ec   : > { %v962_v62 = vadd.f32 %v930_v24, %v865_v53  ;;  %v2386_v17 = vsub.f32 1.0, %v2385_v2  ;;  %v2410_v15 = vadd.f32 0.18741608, %v2409_v1  ;;  %v543_v50 = vmul.f32 %v4975_v37, %v3241_v8 }
 0x1ed   : > { %v2694_v18 = vmul.f32 %v5183_v52, %v2658_v19  ;;  %v2422_v31 = vmul.f32 %v2421_v13, %v5108_v48  ;;  %v2444_v0 = vadd.f32 0.00028619796, %v2443_v12  ;;  %v2455_v58 = vadd.f32 0.001143296, %v2454_v44 }
 0x1ee   : > { %v1060_v7 = vadd.f32 %v1028_v41, %v962_v62  ;;  %v2387_v49 = vmul.f32 %v3085_v10, %v2386_v17  ;;  %vm2390_vm2 = vweird.f32 %v3085_v10  ;;  %v575_v28 = vadd.f32 %v543_v50, %v446_v30  ;;  %v996_v62 = vld [vmem:[#allocation2 + $0x227] sm:$0xff] }
 0x1ef   : > { %v2730_v63 = vadd.f32 %v5195_v54, %v2694_v18  ;;  %v5198_v37 = vadd.f32 1.0, %v2422_v31  ;;  %v2445_v43 = vmul.f32 %v2444_v0, %v5163_v57  ;;  %v2456_v59 = vmul.f32 %v2455_v58, %v5163_v57  ;;  %vm2391_vm3 = vmor %vm2389_vm15, %vm2390_vm2 }
 0x1f0   : > { %v1157_v3 = vadd.f32 %v1125_v4, %v1060_v7  ;;  %v2388_v55 = vadd.f32 %v3085_v10, %v2387_v49  ;;  %v2396_v1 = vor.u32 1.1754944e-38, %v2395_v32  ;;  %v1222_v35 = vmul.f32 %v4865_v51, %v5190_v36 }
 0x1f1   : > { %v2794_v42 = vadd.f32 %v2762_v23, %v2730_v63  ;;  %v2411_v53 = vmul.f32 %v2410_v15, %v5108_v48  ;;  %3086 = vrcp.f32 %v5198_v37  ;;  %v2435_v24 = vand.u32 2147483648, %v5198_v37 }
 0x1f2   : > { %v640_v41 = vmul.f32 %v5004_v38, %v3248_v11  ;;  %v2392_v19 = vsel %vm2391_vm3, %v3085_v10, %v2388_v55  ;;  %v2446_v2 = vadd.f32 0.0036580483, %v2445_v43  ;;  %v2457_v32 = vadd.f32 0.014752088, %v2456_v59  ;;  %v1093_v38 = vld [vmem:[#allocation2 + $0x228] sm:$0xff] }
 0x1f3   : > { %2826 = vst.msk [vmem:[%s3632_s7 + $0xc8] sm:$0xff] %vm274_vm0, %v2794_v42  ;;  %v5213_v4 = vadd.f32 %v1222_v35, %v1157_v3  ;;  %v2397_v20 = vsel %vm5170_vm1, %v2396_v1, %v2392_v19  ;;  %v1283_v48 = vmul.f32 0.5, %v5022_v22  ;;  %v2412_v18 = vadd.f32 1.1283791, %v2411_v53 }
 0x1f4   : > { %v672_v30 = vadd.f32 %v640_v41, %v575_v28  ;;  %v2398_v13 = vmul.f32 %v2397_v20, %v2373_v56  ;;  %v2447_v12 = vmul.f32 %v2446_v2, %v5163_v57  ;;  %v2458_v44 = vmul.f32 %v2457_v32, %v5163_v57  ;;  %v2763_v20 = vld [vmem:[%s3220_s22 + $0xd0] sm:$0xff] }
 0x1f5   : > { %v2433_v10 = vand.u32 2147483647, %v5198_v37  ;;  %v5222_v17 = vmul.f32 0.70710677, %v5213_v4  ;;  %v737_v45 = vmul.f32 %v5084_v25, %v3272_v26  ;;  %vm2429_vm4 = vweird.f32 %v5198_v37 }
 0x1f6   : > { %v2994_v15 = vclamps-f32 %v2398_v13, 1.0  ;;  %v2436_v22 = vor.u32 1.1754944e-38, %v2435_v24  ;;  %v2448_v56 = vadd.f32 0.05243302, %v2447_v12  ;;  %v2459_v50 = vadd.f32 0.112945676, %v2458_v44 }
 0x1f7   : > { %v3087_v23 = vpop.eup %3086  ;;  %v2481_v31 = vmul.f32 %v5222_v17, %v5222_v17  ;;  %v769_v0 = vadd.f32 %v737_v45, %v672_v30  ;;  %v834_v58 = vmul.f32 %v5086_v61, %v3281_v33  ;;  %v931_v7 = vmul.f32 %v5095_v29, %v3288_v40  ;;  %v1190_v12 = vld [vmem:[#allocation2 + $0x229] sm:$0xff] }
 0x1f8   : > { %v2627_v63 = vadd.f32 1.0, %v2994_v15  ;;  %v2425_v25 = vmul.f32 %v3087_v23, %v5198_v37  ;;  %v1029_v49 = vmul.f32 %v3293_v46, %v996_v62  ;;  %v1126_v28 = vmul.f32 %v3295_v47, %v1093_v38 }
 0x1f9   : > { %v2460_v43 = vmul.f32 %v2459_v50, %v5163_v57  ;;  %v5237_v59 = vmin.f32 %v2481_v31, 16.0  ;;  %v866_v3 = vadd.f32 %v834_v58, %v769_v0  ;;  %v447_v42 = vmul.f32 %v5029_v9, %v3239_v6 }
 0x1fa   : > { %v2659_v61 = vmul.f32 %v2627_v63, %v1283_v48  ;;  %v2426_v55 = vsub.f32 1.0, %v2425_v25  ;;  %v2449_v29 = vmul.f32 %v2448_v56, %v5163_v57  ;;  %v544_v1 = vmul.f32 %v5031_v39, %v3241_v8 }
 0x1fb   : > { %v2461_v35 = vadd.f32 0.4994258, %v2460_v43  ;;  %v2483_v53 = vmul.f32 2.1237322e-06, %v5237_v59  ;;  %v2494_v24 = vmul.f32 3.8918573e-05, %v5237_v59  ;;  %v963_v41 = vadd.f32 %v931_v7, %v866_v3 }
 0x1fc   : > { %v2695_v19 = vmul.f32 %v5183_v52, %v2659_v61  ;;  %v2427_v2 = vmul.f32 %v3087_v23, %v2426_v55  ;;  %vm2430_vm5 = vweird.f32 %v3087_v23  ;;  %v576_v32 = vadd.f32 %v544_v1, %v447_v42 }
 0x1fd   : > { %v2462_v6 = vmul.f32 %v2461_v35, %v5163_v57  ;;  %v2484_v9 = vadd.f32 0.00028619796, %v2483_v53  ;;  %v2495_v30 = vadd.f32 0.001143296, %v2494_v24  ;;  %v1061_v48 = vadd.f32 %v1029_v49, %v963_v41  ;;  %vm2431_vm6 = vmor %vm2429_vm4, %vm2430_vm5  ;;  %v1094_v35 = vld [vmem:[#allocation2 + $0x230] sm:$0xff] }
 0x1fe   : > { %v2731_v13 = vadd.f32 %v5195_v54, %v2695_v19  ;;  %v2428_v8 = vadd.f32 %v3087_v23, %v2427_v2  ;;  %v2450_v39 = vadd.f32 0.18741608, %v2449_v29  ;;  %v641_v44 = vmul.f32 %v5038_v60, %v3248_v11  ;;  %v1191_v53 = vld [vmem:[#allocation2 + $0x231] sm:$0xff] }
 0x1ff   : > { %v5254_v62 = vadd.f32 1.0, %v2462_v6  ;;  %v2485_v38 = vmul.f32 %v2484_v9, %v5237_v59  ;;  %v2496_v45 = vmul.f32 %v2495_v30, %v5237_v59  ;;  %v1158_v15 = vadd.f32 %v1126_v28, %v1061_v48 }
 0x200   : > { %v2795_v56 = vadd.f32 %v2763_v20, %v2731_v13  ;;  %v2413_v50 = vmul.f32 %v2412_v18, %v5090_v21  ;;  %v2432_v31 = vsel %vm2431_vm6, %v3087_v23, %v2428_v8  ;;  %vm2434_vm7 = vcmp.eq.f32.partialorder %v2433_v10, 8.507059e+37  ;;  %v997_v23 = vld [vmem:[#allocation2 + $0x22f] sm:$0xff] }
 0x201   : > { %v2437_v0 = vsel %vm2434_vm7, %v2436_v22, %v2432_v31  ;;  %3088 = vrcp.f32 %v5254_v62  ;;  %v1223_v11 = vmul.f32 %v4865_v51, %v1190_v12  ;;  %v673_v60 = vadd.f32 %v641_v44, %v576_v32 }
 0x202   : > { %2827 = vst.msk [vmem:[%s3632_s7 + $0xd0] sm:$0xff] %vm274_vm0, %v2795_v56  ;;  %v2438_v37 = vmul.f32 %v2437_v0, %v2413_v50  ;;  %v2451_v58 = vmul.f32 %v2450_v39, %v5163_v57  ;;  %v2486_v7 = vadd.f32 0.0036580483, %v2485_v38  ;;  %v2497_v63 = vadd.f32 0.014752088, %v2496_v45 }
 0x203   : > { %v5264_v25 = vadd.f32 %v1223_v11, %v1158_v15  ;;  %v738_v21 = vmul.f32 %v5149_v14, %v3272_v26  ;;  %v835_v57 = vmul.f32 %v5157_v34, %v3281_v33  ;;  %v1284_v43 = vmul.f32 0.5, %v5075_v27 }
 0x204   : > { %v2995_v18 = vclamps-f32 %v2438_v37, 1.0  ;;  %v2487_v10 = vmul.f32 %v2486_v7, %v5237_v59  ;;  %v2498_v22 = vmul.f32 %v2497_v63, %v5237_v59  ;;  %v2452_v42 = vadd.f32 1.1283791, %v2451_v58 }
 0x205   : > { %v5271_v49 = vmul.f32 0.70710677, %v5264_v25  ;;  %v770_v28 = vadd.f32 %v738_v21, %v673_v60  ;;  %v932_v29 = vmul.f32 %v5190_v36, %v3288_v40  ;;  %v1030_v1 = vmul.f32 %v3293_v46, %v997_v23  ;;  %v2764_v40 = vld [vmem:[%s3220_s22 + $0xd8] sm:$0xff] }
 0x206   : > { %v2628_v3 = vadd.f32 1.0, %v2995_v18  ;;  %v2499_v61 = vadd.f32 0.112945676, %v2498_v22  ;;  %v2473_v27 = vand.u32 2147483647, %v5254_v62  ;;  %v2475_v41 = vand.u32 2147483648, %v5254_v62 }
 0x207   : > { %v3089_v55 = vpop.eup %3088  ;;  %v2521_v26 = vmul.f32 %v5271_v49, %v5271_v49  ;;  %v867_v14 = vadd.f32 %v835_v57, %v770_v28  ;;  %v2488_v34 = vadd.f32 0.05243302, %v2487_v10  ;;  %v1127_v46 = vmul.f32 %v3295_v47, %v1094_v35 }
 0x208   : > { %v2660_v24 = vmul.f32 %v2628_v3, %v1284_v43  ;;  %v2465_v33 = vmul.f32 %v3089_v55, %v5254_v62  ;;  %v2500_v19 = vmul.f32 %v2499_v61, %v5237_v59  ;;  %v1224_v6 = vmul.f32 %v4865_v51, %v1191_v53  ;;  %v2765_v53 = vld [vmem:[%s3220_s22 + $0xe0] sm:$0xff] }
 0x209   : > { %v5285_v2 = vmin.f32 %v2521_v26, 16.0  ;;  %v964_v32 = vadd.f32 %v932_v29, %v867_v14  ;;  %vm2470_vm8 = vweird.f32 %v3089_v55  ;;  %v2489_v12 = vmul.f32 %v2488_v34, %v5237_v59 }
 0x20a   : > { %v2696_v20 = vmul.f32 %v5183_v52, %v2660_v24  ;;  %v2466_v36 = vsub.f32 1.0, %v2465_v33  ;;  %v2501_v9 = vadd.f32 0.4994258, %v2500_v19  ;;  %vm2469_vm9 = vweird.f32 %v5254_v62 }
 0x20b   : > { %v2523_v30 = vmul.f32 2.1237322e-06, %v5285_v2  ;;  %v2534_v48 = vmul.f32 3.8918573e-05, %v5285_v2  ;;  %v1062_v13 = vadd.f32 %v1030_v1, %v964_v32  ;;  %v2476_v56 = vor.u32 1.1754944e-38, %v2475_v41  ;;  %vm2471_vm10 = vmor %vm2469_vm9, %vm2470_vm8 }
 0x20c   : > { %v2732_v8 = vadd.f32 %v5195_v54, %v2696_v20  ;;  %v2467_v39 = vmul.f32 %v3089_v55, %v2466_v36  ;;  %v2502_v44 = vmul.f32 %v2501_v9, %v5237_v59  ;;  %v2453_v60 = vmul.f32 %v2452_v42, %v5147_v5 }
 0x20d   : > { %v2524_v38 = vadd.f32 0.00028619796, %v2523_v30  ;;  %v2535_v45 = vadd.f32 0.001143296, %v2534_v48  ;;  %v1159_v47 = vadd.f32 %v1127_v46, %v1062_v13  ;;  %vm2474_vm11 = vcmp.eq.f32.partialorder %v2473_v27, 8.507059e+37 }
 0x20e   : > { %v2796_v15 = vadd.f32 %v2764_v40, %v2732_v8  ;;  %v2468_v51 = vadd.f32 %v3089_v55, %v2467_v39  ;;  %v2503_v50 = vadd.f32 1.0, %v2502_v44  ;;  %v2490_v7 = vadd.f32 0.18741608, %v2489_v12 }
 0x20f   : > { %v2525_v31 = vmul.f32 %v2524_v38, %v5285_v2  ;;  %v2536_v0 = vmul.f32 %v2535_v45, %v5285_v2  ;;  %v5299_v11 = vadd.f32 %v1224_v6, %v1159_v47  ;;  %v1285_v28 = vmul.f32 0.5, %v5135_v16 }
 0x210   : > { %2828 = vst.msk [vmem:[%s3632_s7 + $0xd8] sm:$0xff] %vm274_vm0, %v2796_v15  ;;  %v2472_v37 = vsel %vm2471_vm10, %v3089_v55, %v2468_v51  ;;  %3090 = vrcp.f32 %v2503_v50  ;;  %v2491_v23 = vmul.f32 %v2490_v7, %v5237_v59  ;;  %v2515_v24 = vand.u32 2147483648, %v2503_v50 }
 0x211   : > { %v2477_v58 = vsel %vm2474_vm11, %v2476_v56, %v2472_v37  ;;  %v2526_v62 = vadd.f32 0.0036580483, %v2525_v31  ;;  %v2537_v21 = vadd.f32 0.014752088, %v2536_v0  ;;  %v5305_v18 = vmul.f32 0.70710677, %v5299_v11 }
 0x212   : > { %v2478_v63 = vmul.f32 %v2477_v58, %v2453_v60  ;;  %v2492_v14 = vadd.f32 1.1283791, %v2491_v23  ;;  %v2513_v20 = vand.u32 2147483647, %v2503_v50  ;;  %vm2509_vm13 = vweird.f32 %v2503_v50 }
 0x213   : > { %v2538_v22 = vmul.f32 %v2537_v21, %v5285_v2  ;;  %v2561_v5 = vmul.f32 %v5305_v18, %v5305_v18  ;;  %v2527_v43 = vmul.f32 %v2526_v62, %v5285_v2  ;;  %v2516_v30 = vor.u32 1.1754944e-38, %v2515_v24 }
 0x214   : > { %v2996_v10 = vclamps-f32 %v2478_v63, 1.0  ;;  %v2493_v39 = vmul.f32 %v2492_v14, %v5222_v17  ;;  %vm2514_vm15 = vcmp.eq.f32.partialorder %v2513_v20, 8.507059e+37  ;;  %v1286_v31 = vmul.f32 0.5, %v5213_v4 }
 0x215   : > { %v2539_v3 = vadd.f32 0.112945676, %v2538_v22  ;;  %v5313_v61 = vmin.f32 %v2561_v5, 16.0  ;;  %v2528_v33 = vadd.f32 0.05243302, %v2527_v43  ;;  %v2766_v22 = vld [vmem:[%s3220_s22 + $0xe8] sm:$0xff] }
 0x216   : > { %v2629_v57 = vadd.f32 1.0, %v2996_v10  ;;  %v3091_v42 = vpop.eup %3090 }
 0x217   : > { %v2505_v26 = vmul.f32 %v3091_v42, %v2503_v50  ;;  %v2540_v29 = vmul.f32 %v2539_v3, %v5285_v2  ;;  %v2563_v1 = vmul.f32 2.1237322e-06, %v5313_v61  ;;  %v2574_v59 = vmul.f32 3.8918573e-05, %v5313_v61 }
 0x218   : > { %v2661_v55 = vmul.f32 %v2629_v57, %v1285_v28  ;;  %vm2510_vm12 = vweird.f32 %v3091_v42  ;;  %v2529_v48 = vmul.f32 %v2528_v33, %v5285_v2  ;;  %v1287_v33 = vmul.f32 0.5, %v5264_v25 }
 0x219   : > { %v2506_v16 = vsub.f32 1.0, %v2505_v26  ;;  %v2541_v27 = vadd.f32 0.4994258, %v2540_v29  ;;  %v2564_v34 = vadd.f32 0.00028619796, %v2563_v1  ;;  %vm2511_vm14 = vmor %vm2509_vm13, %vm2510_vm12 }
 0x21a   : > { %v2697_v35 = vmul.f32 %v5183_v52, %v2661_v55  ;;  %v2575_v41 = vadd.f32 0.001143296, %v2574_v59  ;;  %v2530_v15 = vadd.f32 0.18741608, %v2529_v48 }
 0x21b   : > { %v2507_v32 = vmul.f32 %v3091_v42, %v2506_v16  ;;  %v2542_v40 = vmul.f32 %v2541_v27, %v5285_v2  ;;  %v2565_v36 = vmul.f32 %v2564_v34, %v5313_v61 }
 0x21c   : > { %v2733_v19 = vadd.f32 %v5195_v54, %v2697_v35  ;;  %v2576_v46 = vmul.f32 %v2575_v41, %v5313_v61  ;;  %v2531_v37 = vmul.f32 %v2530_v15, %v5285_v2 }
 0x21d   : > { %v2508_v9 = vadd.f32 %v3091_v42, %v2507_v32  ;;  %v2543_v13 = vadd.f32 1.0, %v2542_v40  ;;  %v2566_v38 = vadd.f32 0.0036580483, %v2565_v36 }
 0x21e   : > { %v2797_v6 = vadd.f32 %v2765_v53, %v2733_v19  ;;  %v2577_v8 = vadd.f32 0.014752088, %v2576_v46  ;;  %v2532_v23 = vadd.f32 1.1283791, %v2531_v37  ;;  %v2767_v46 = vld [vmem:[%s3220_s22 + $0xf0] sm:$0xff] }
 0x21f   : > { %v2512_v12 = vsel %vm2511_vm14, %v3091_v42, %v2508_v9  ;;  %3092 = vrcp.f32 %v2543_v13  ;;  %v2567_v50 = vmul.f32 %v2566_v38, %v5313_v61  ;;  %v2555_v5 = vand.u32 2147483648, %v2543_v13 }
 0x220   : > { %2829 = vst.msk [vmem:[%s3632_s7 + $0xe0] sm:$0xff] %vm274_vm0, %v2797_v6  ;;  %v2517_v44 = vsel %vm2514_vm15, %v2516_v30, %v2512_v12  ;;  %v2578_v47 = vmul.f32 %v2577_v8, %v5313_v61  ;;  %v2553_v43 = vand.u32 2147483647, %v2543_v13  ;;  %vm2549_vm2 = vweird.f32 %v2543_v13 }
 0x221   : > { %v2518_v45 = vmul.f32 %v2517_v44, %v2493_v39  ;;  %v2568_v63 = vadd.f32 0.05243302, %v2567_v50  ;;  %v2556_v26 = vor.u32 1.1754944e-38, %v2555_v5  ;;  %v2533_v14 = vmul.f32 %v2532_v23, %v5271_v49 }
 0x222   : > { %v2579_v56 = vadd.f32 0.112945676, %v2578_v47  ;;  %vm2554_vm4 = vcmp.eq.f32.partialorder %v2553_v43, 8.507059e+37  ;;  %v1288_v12 = vmul.f32 0.5, %v5299_v11  ;;  %v2768_v47 = vld [vmem:[%s3220_s22 + $0xf8] sm:$0xff] }
 0x223   : > { %v2997_v51 = vclamps-f32 %v2518_v45, 1.0  ;;  %v2569_v2 = vmul.f32 %v2568_v63, %v5313_v61 }
 0x224   : > { %v2580_v60 = vmul.f32 %v2579_v56, %v5313_v61 }
 0x225   : > { %v2630_v0 = vadd.f32 1.0, %v2997_v51  ;;  %v3093_v17 = vpop.eup %3092  ;;  %v2570_v59 = vadd.f32 0.18741608, %v2569_v2 }
 0x226   : > { %v2545_v7 = vmul.f32 %v3093_v17, %v2543_v13  ;;  %v2581_v62 = vadd.f32 0.4994258, %v2580_v60  ;;  %vm2550_vm1 = vweird.f32 %v3093_v17 }
 0x227   : > { %v2662_v58 = vmul.f32 %v2630_v0, %v1286_v31  ;;  %vm2551_vm3 = vmor %vm2549_vm2, %vm2550_vm1  ;;  %v2571_v24 = vmul.f32 %v2570_v59, %v5313_v61 }
 0x228   : > { %v2546_v10 = vsub.f32 1.0, %v2545_v7  ;;  %v2582_v28 = vmul.f32 %v2581_v62, %v5313_v61 }
 0x229   : > { %v2698_v21 = vmul.f32 %v5183_v52, %v2662_v58  ;;  %v2572_v32 = vadd.f32 1.1283791, %v2571_v24 }
 0x22a   : > { %v2547_v57 = vmul.f32 %v3093_v17, %v2546_v10  ;;  %v2583_v3 = vadd.f32 1.0, %v2582_v28 }
 0x22b   : > { %v2734_v4 = vadd.f32 %v5195_v54, %v2698_v21  ;;  %v2573_v30 = vmul.f32 %v2572_v32, %v5305_v18 }
 0x22c   : > { %v2548_v55 = vadd.f32 %v3093_v17, %v2547_v57  ;;  %3094 = vrcp.f32 %v2583_v3  ;;  %v2595_v20 = vand.u32 2147483648, %v2583_v3  ;;  %v2593_v36 = vand.u32 2147483647, %v2583_v3 }
 0x22d   : > { %v2798_v42 = vadd.f32 %v2766_v22, %v2734_v4  ;;  %vm2589_vm6 = vweird.f32 %v2583_v3 }
 0x22e   : > { %v2552_v29 = vsel %vm2551_vm3, %v3093_v17, %v2548_v55  ;;  %v2596_v25 = vor.u32 1.1754944e-38, %v2595_v20  ;;  %vm2594_vm8 = vcmp.eq.f32.partialorder %v2593_v36, 8.507059e+37 }
 0x22f   : > { %2830 = vst.msk [vmem:[%s3632_s7 + $0xe8] sm:$0xff] %vm274_vm0, %v2798_v42  ;;  %v2557_v1 = vsel %vm2554_vm4, %v2556_v26, %v2552_v29 }
 0x230   : > { %v2558_v35 = vmul.f32 %v2557_v1, %v2533_v14 }
 0x232   : > { %v2998_v53 = vclamps-f32 %v2558_v35, 1.0  ;;  %v3095_v16 = vpop.eup %3094 }
 0x233   : > { %v2585_v34 = vmul.f32 %v3095_v16, %v2583_v3  ;;  %vm2590_vm5 = vweird.f32 %v3095_v16 }
 0x234   : > { %v2631_v27 = vadd.f32 1.0, %v2998_v53  ;;  %vm2591_vm7 = vmor %vm2589_vm6, %vm2590_vm5 }
 0x235   : > { %v2586_v19 = vsub.f32 1.0, %v2585_v34 }
 0x236   : > { %v2663_v41 = vmul.f32 %v2631_v27, %v1287_v33 }
 0x237   : > { %v2587_v40 = vmul.f32 %v3095_v16, %v2586_v19 }
 0x238   : > { %v2699_v49 = vmul.f32 %v5183_v52, %v2663_v41 }
 0x239   : > { %v2588_v9 = vadd.f32 %v3095_v16, %v2587_v40 }
 0x23a   : > { %v2735_v6 = vadd.f32 %v5195_v54, %v2699_v49 }
 0x23b   : > { %v2592_v48 = vsel %vm2591_vm7, %v3095_v16, %v2588_v9 }
 0x23c   : > { %v2799_v61 = vadd.f32 %v2767_v46, %v2735_v6  ;;  %v2597_v13 = vsel %vm2594_vm8, %v2596_v25, %v2592_v48 }
 0x23d   : > { %v2598_v8 = vmul.f32 %v2597_v13, %v2573_v30 }
 0x23e   : > { %2831 = vst.msk [vmem:[%s3632_s7 + $0xf0] sm:$0xff] %vm274_vm0, %v2799_v61 }
 0x23f   : > { %v2999_v39 = vclamps-f32 %v2598_v8, 1.0 }
 0x241   : > { %v2632_v44 = vadd.f32 1.0, %v2999_v39 }
 0x243   : > { %v2664_v38 = vmul.f32 %v2632_v44, %v1288_v12 }
 0x245   : > { %v2700_v45 = vmul.f32 %v5183_v52, %v2664_v38 }
 0x247   : > { %v2736_v15 = vadd.f32 %v5195_v54, %v2700_v45 }
 0x249   : > { %v2800_v51 = vadd.f32 %v2768_v47, %v2736_v15 }
 0x24b   : > { %2832 = vst.msk [vmem:[%s3632_s7 + $0xf8] sm:$0xff] %vm274_vm0, %v2800_v51 }
 0x24c PF: > { %s14_s17 = sadd.s32 1, %s3127_s17   ;;  %s5415_s15 = smov %s3123_s16 }
 0x24d   : > { %p11_p5 = scmp.ge.s32.totalorder %s14_s17, 4   ;;  %s5416_s16 = smov %s5418_s18 }
 0x24f   :  { %13 = sbr.rel (!%p11_p5) target bundleno = 2 (0x2), region = 78 }

</bundles_post_ra>
